<compile_context>
chip_gen: v6e
topology: v6e:2x2x1
jax: 0.10.0
libtpu: 0.0.40
codegen_flags: <defaults>
</compile_context>

<pallas_src>
import functools

import numpy as np
import jax
import jax.numpy as jnp
from jax import lax
from jax.experimental import pallas as pl
from jax.experimental.pallas import tpu as pltpu

BN_EPS = 1e-5
LANE = 128


def _round_up(x, m):
    return (x + m - 1) // m * m


def _device_kind():
    try:
        return jax.devices()[0].device_kind.lower()
    except Exception:
        return ""


def _is_v7():
    kind = _device_kind()
    return ("v7" in kind) or ("7x" in kind)


def _vmem_limit():
    # v7x: 64 MiB VMEM / TensorCore (scoped default 32); v5e/v6e: 128 MiB
    # (scoped default only 16/32 MiB, so always set it explicitly).
    return (40 << 20) if _is_v7() else (64 << 20)


def _tiling(n):
    """Node tile size and padded node count.

    Tiles are as large as possible (amortize the ~0.35us per-grid-step cost,
    reach the HBM roofline) while keeping >= 2 row tiles on v7x so the
    'parallel' grid axis spans both TensorCores."""
    cap = 512 if _is_v7() else 1024
    n_min = _round_up(max(n, LANE), LANE)
    num_tiles = max(1, -(-n_min // cap))          # ceil-div
    if _is_v7() and n_min > LANE:
        num_tiles = max(num_tiles, 2)             # use both TensorCores
    tile = _round_up(-(-n_min // num_tiles), LANE)
    return tile, tile * num_tiles


# --------------------------------------------------------------------------- #
# Fused per-layer kernel:                                                      #
#   tiled (A+I)@h (bf16 MXU, f32 acc)  +  prev-layer BN affine fold  +  MLP   #
#   + ReLU  +  masked partial BN stats  +  partial global_add_pool.           #
# --------------------------------------------------------------------------- #
def _gin_layer_kernel(n_nodes, tile,
                      adj_ref, h_ref, deg_ref, aprev_ref, bprev_ref,
                      w1_ref, b1_ref, w2_ref, b2_ref, pool_ref,
                      t_ref, sum_ref, sq_ref, pp_ref,
                      acc_ref):
    # Program ids are read at the top level only (never inside pl.when bodies;
    # that breaks the CPU/interpret lowering of pallas_call).
    m = pl.program_id(0)
    k = pl.program_id(1)
    last_k = pl.num_programs(1) - 1

    @pl.when(k == 0)
    def _init():
        acc_ref[...] = jnp.zeros_like(acc_ref)

    # (A+I) @ h : bf16 x bf16 operands, f32 accumulation -> native MXU rate.
    # h is fully VMEM-resident (one DMA per layer); slice the k-th tile.
    acc_ref[...] += jnp.dot(adj_ref[...], h_ref[k],
                            preferred_element_type=jnp.float32)

    @pl.when(k == last_k)
    def _epilogue():
        # Fold the previous layer's BatchNorm affine through the (linear)
        # aggregation:  (A+I)@(t*a + 1*b) = ((A+I)@t)*a + deg*b.
        agg = acc_ref[...] * aprev_ref[...] + deg_ref[...] * bprev_ref[...]

        # GIN MLP: Linear -> ReLU -> Linear, then the outer F.relu.
        t = jnp.dot(agg, w1_ref[...],
                    preferred_element_type=jnp.float32) + b1_ref[...]
        t = jnp.maximum(t, 0.0)
        t = jnp.dot(t, w2_ref[...],
                    preferred_element_type=jnp.float32) + b2_ref[...]
        t = jnp.maximum(t, 0.0)
        t_ref[...] = t.astype(jnp.bfloat16)[None]

        # Masked partial BatchNorm statistics (padded node rows must not count;
        # they are non-zero after the MLP biases).
        rows = m * tile + lax.broadcasted_iota(jnp.int32, (tile, 1), 0)
        valid = (rows < n_nodes).astype(jnp.float32)
        tv = t * valid
        sum_ref[...] = jnp.sum(tv, axis=0, keepdims=True)[None]
        sq_ref[...] = jnp.sum(tv * tv, axis=0, keepdims=True)[None]

        # Partial global_add_pool of the raw (pre-BN) activations; the BN
        # affine is applied in the wrapper: pool@(t*a+b) = (pool@t)*a + counts*b.
        pp_ref[...] = jnp.dot(pool_ref[...], t.astype(jnp.bfloat16),
                              preferred_element_type=jnp.float32)[None]


def _gin_layer(adj_p, h3, deg_p, a_prev, b_prev, w1, b1, w2, b2, pool_p, *,
               n_nodes, tile, vmem_limit):
    num_k, _, d_in = h3.shape
    n_pad = adj_p.shape[0]
    num_m = n_pad // tile
    g_pad = pool_p.shape[0]
    d_out = w1.shape[1]
    kernel = functools.partial(_gin_layer_kernel, n_nodes, tile)
    return pl.pallas_call(
        kernel,
        grid=(num_m, num_k),
        in_specs=[
            pl.BlockSpec((tile, tile), lambda m, k: (m, k)),            # adjacency
            pl.BlockSpec((num_k, tile, d_in), lambda m, k: (0, 0, 0)),  # resident h
            pl.BlockSpec((tile, 1), lambda m, k: (m, 0)),               # deg(A+I)
            pl.BlockSpec((1, d_in), lambda m, k: (0, 0)),               # prev BN scale
            pl.BlockSpec((1, d_in), lambda m, k: (0, 0)),               # prev BN shift
            pl.BlockSpec((d_in, d_out), lambda m, k: (0, 0)),           # w1
            pl.BlockSpec((1, d_out), lambda m, k: (0, 0)),              # b1
            pl.BlockSpec((d_out, d_out), lambda m, k: (0, 0)),          # w2
            pl.BlockSpec((1, d_out), lambda m, k: (0, 0)),              # b2
            pl.BlockSpec((g_pad, tile), lambda m, k: (0, m)),           # pool cols
        ],
        out_specs=[
            pl.BlockSpec((1, tile, d_out), lambda m, k: (m, 0, 0)),     # t (bf16)
            pl.BlockSpec((1, 1, d_out), lambda m, k: (m, 0, 0)),        # partial sum
            pl.BlockSpec((1, 1, d_out), lambda m, k: (m, 0, 0)),        # partial sumsq
            pl.BlockSpec((1, g_pad, d_out), lambda m, k: (m, 0, 0)),    # partial pool
        ],
        out_shape=[
            jax.ShapeDtypeStruct((num_m, tile, d_out), jnp.bfloat16),
            jax.ShapeDtypeStruct((num_m, 1, d_out), jnp.float32),
            jax.ShapeDtypeStruct((num_m, 1, d_out), jnp.float32),
            jax.ShapeDtypeStruct((num_m, g_pad, d_out), jnp.float32),
        ],
        scratch_shapes=[pltpu.VMEM((tile, d_in), jnp.float32)],
        compiler_params=pltpu.CompilerParams(
            dimension_semantics=("parallel", "arbitrary"),
            vmem_limit_bytes=vmem_limit),
    )(adj_p, h3, deg_p, a_prev, b_prev, w1, b1, w2, b2, pool_p)


# --------------------------------------------------------------------------- #
# Full encoder forward                                                         #
# --------------------------------------------------------------------------- #
@functools.partial(jax.jit, static_argnames=("n_nodes", "n_graphs", "dim"))
def encoder_forward(x3, adj_p, deg_p, pool_p, counts, params_padded, *,
                    n_nodes, n_graphs, dim):
    """Padded inputs come from prepare_inputs/pad_params (done once).
    Returns (None, [num_graphs, L*dim]) like the PyTorch module."""
    tile = x3.shape[1]
    vmem_limit = _vmem_limit()
    a_prev = jnp.ones((1, x3.shape[2]), jnp.float32)   # layer 0: identity affine
    b_prev = jnp.zeros((1, x3.shape[2]), jnp.float32)
    h3 = x3
    pooled = []
    for (w1, b1, w2, b2, gamma, beta) in params_padded:
        t3, psum, psq, pp = _gin_layer(
            adj_p, h3, deg_p, a_prev, b_prev, w1, b1, w2, b2, pool_p,
            n_nodes=n_nodes, tile=tile, vmem_limit=vmem_limit)

        # Finalize BatchNorm (training mode, biased variance) on tiny tensors.
        s = jnp.sum(psum[:, 0, :], axis=0)
        sq = jnp.sum(psq[:, 0, :], axis=0)
        mean = s / n_nodes
        # NOTE: one-pass E[x^2]-mean^2 (clamped at 0); can lose precision for
        # very large activation magnitudes.
        var = jnp.maximum(sq / n_nodes - mean * mean, 0.0)
        a = gamma * lax.rsqrt(var + BN_EPS)            # (1, d_pad) BN scale
        b = beta - mean[None, :] * a                   # (1, d_pad) BN shift

        # global_add_pool of normalized h: pool@(t*a+b) = (pool@t)*a + counts*b.
        pooled_i = jnp.sum(pp, axis=0) * a + counts[:, None] * b
        pooled.append(pooled_i[:n_graphs, :dim])

        # Next layer consumes raw bf16 t; the BN affine is folded in-kernel.
        h3, a_prev, b_prev = t3, a, b
    return None, jnp.concatenate(pooled, axis=1)


def prepare_inputs(x, adj_hat, pool):
    """One-time padding/packing of the graph batch (amortized across layers
    and forward calls).  adjacency / pool stored in bf16 (exact for 0/1 masks
    and integer edge multiplicities <= 256)."""
    N, F = x.shape
    G = pool.shape[0]
    tile, n_pad = _tiling(N)
    f_pad = _round_up(F, LANE)
    g_pad = _round_up(G, 16)                          # bf16 packs 16 sublanes/vreg
    num_k = n_pad // tile
    adj_p = jnp.zeros((n_pad, n_pad), jnp.bfloat16).at[:N, :N].set(
        adj_hat.astype(jnp.bfloat16))
    pool_p = jnp.zeros((g_pad, n_pad), jnp.bfloat16).at[:G, :N].set(
        pool.astype(jnp.bfloat16))
    deg_p = jnp.zeros((n_pad, 1), jnp.float32).at[:N, 0].set(
        jnp.sum(adj_hat, axis=1))
    counts = jnp.zeros((g_pad,), jnp.float32).at[:G].set(jnp.sum(pool, axis=1))
    x3 = jnp.zeros((n_pad, f_pad), jnp.bfloat16).at[:N, :F].set(
        x.astype(jnp.bfloat16)).reshape(num_k, tile, f_pad)
    return x3, adj_p, deg_p, pool_p, counts


def pad_params(params, num_features, dim):
    f_pad = _round_up(num_features, LANE)
    d_pad = _round_up(dim, LANE)
    out = []
    for i, (w1, b1, w2, b2, gamma, beta) in enumerate(params):
        d_in = f_pad if i == 0 else d_pad
        w1_p = jnp.zeros((d_in, d_pad), jnp.float32).at[:w1.shape[0], :dim].set(w1)
        b1_p = jnp.zeros((1, d_pad), jnp.float32).at[:, :dim].set(b1.reshape(1, -1))
        w2_p = jnp.zeros((d_pad, d_pad), jnp.float32).at[:dim, :dim].set(w2)
        b2_p = jnp.zeros((1, d_pad), jnp.float32).at[:, :dim].set(b2.reshape(1, -1))
        gm_p = jnp.zeros((1, d_pad), jnp.float32).at[:, :dim].set(gamma.reshape(1, -1))
        bt_p = jnp.zeros((1, d_pad), jnp.float32).at[:, :dim].set(beta.reshape(1, -1))
        out.append((w1_p, b1_p, w2_p, b2_p, gm_p, bt_p))
    return out


# --------------------------------------------------------------------------- #
# Plain-JAX f32 reference & parameter init                                     #
# --------------------------------------------------------------------------- #
def reference_forward(x, adj_hat, pool, params):
    h = x
    outs = []
    for (w1, b1, w2, b2, gamma, beta) in params:
        agg = adj_hat @ h
        t = jnp.maximum(agg @ w1 + b1, 0.0)
        t = t @ w2 + b2
        t = jnp.maximum(t, 0.0)
        mean = t.mean(0, keepdims=True)
        var = ((t - mean) ** 2).mean(0, keepdims=True)
        t = (t - mean) / jnp.sqrt(var + BN_EPS) * gamma + beta
        h = t
        outs.append(pool @ h)
    return jnp.concatenate(outs, axis=1)


def init_params(key, num_features, dim, num_gc_layers):
    params = []
    for i in range(num_gc_layers):
        in_dim = num_features if i == 0 else dim
        key, k1, k2 = jax.random.split(key, 3)
        w1 = jax.random.normal(k1, (in_dim, dim), jnp.float32) * 0.1
        b1 = jnp.zeros((1, dim), jnp.float32)
        w2 = jax.random.normal(k2, (dim, dim), jnp.float32) * 0.1
        b2 = jnp.zeros((1, dim), jnp.float32)
        gamma = jnp.ones((1, dim), jnp.float32)   # BatchNorm1d default weight
        beta = jnp.zeros((1, dim), jnp.float32)   # BatchNorm1d default bias
        params.append((w1, b1, w2, b2, gamma, beta))
    return params


if __name__ == "__main__":
    # Small synthetic graph batch.
    N = 16            # total nodes
    F_IN = 4          # num_features
    DIM = 32          # hidden dim
    L = 3             # num_gc_layers
    G = 2             # num_graphs
    E = 40            # num edges

    key = jax.random.PRNGKey(0)
    key, kx, ks, kd = jax.random.split(key, 4)

    x = jax.random.normal(kx, (N, F_IN), jnp.float32)
    src = jax.random.randint(ks, (E,), 0, N)
    dst = jax.random.randint(kd, (E,), 0, N)
    batch = jnp.concatenate([jnp.zeros(N // 2, jnp.int32),
                             jnp.ones(N - N // 2, jnp.int32)])

    # Dense adjacency (A[i, j] = #edges j->i) + identity ((1+eps)*x_i, eps=0).
    adj = jnp.zeros((N, N), jnp.float32).at[dst, src].add(1.0)
    adj_hat = adj + jnp.eye(N, dtype=jnp.float32)
    # Dense pooling matrix for global_add_pool.
    pool = (batch[None, :] ==
            jnp.arange(G, dtype=jnp.int32)[:, None]).astype(jnp.float32)

    params = init_params(key, F_IN, DIM, L)

    # One-time padding / packing (amortized across layers and calls).
    x3, adj_p, deg_p, pool_p, counts = prepare_inputs(x, adj_hat, pool)
    params_p = pad_params(params, F_IN, DIM)

    _, out = encoder_forward(x3, adj_p, deg_p, pool_p, counts, params_p,
                             n_nodes=N, n_graphs=G, dim=DIM)
    out = jax.block_until_ready(out)

    ref = reference_forward(x, adj_hat, pool, params)
    assert out.shape == (G, L * DIM)
    # bf16 MXU operands (per perf review) -> validate at a bf16-appropriate
    # aggregate tolerance (f32 accumulation, ~3 significant digits per value).
    rel_err = float(jnp.linalg.norm(out - ref) / (jnp.linalg.norm(ref) + 1e-12))
    assert rel_err < 3e-2, f"relative error too large: {rel_err}"
    print("KERNEL_OK")
</pallas_src>

<mosaic_0001>
module attributes {stable_mosaic.version = 11 : i64} {
  func.func @_gin_layer_kernel(%arg0: i32, %arg1: i32, %arg2: memref<128x128xbf16, #tpu.memory_space<vmem>>, %arg3: memref<1x128x128xbf16, #tpu.memory_space<vmem>>, %arg4: memref<128x1xf32, #tpu.memory_space<vmem>>, %arg5: memref<1x128xf32, #tpu.memory_space<vmem>>, %arg6: memref<1x128xf32, #tpu.memory_space<vmem>>, %arg7: memref<128x128xf32, #tpu.memory_space<vmem>>, %arg8: memref<1x128xf32, #tpu.memory_space<vmem>>, %arg9: memref<128x128xf32, #tpu.memory_space<vmem>>, %arg10: memref<1x128xf32, #tpu.memory_space<vmem>>, %arg11: memref<16x128xbf16, #tpu.memory_space<vmem>>, %arg12: memref<1x128x128xbf16, #tpu.memory_space<vmem>>, %arg13: memref<1x1x128xf32, #tpu.memory_space<vmem>>, %arg14: memref<1x1x128xf32, #tpu.memory_space<vmem>>, %arg15: memref<1x16x128xf32, #tpu.memory_space<vmem>>, %arg16: memref<128x128xf32, #tpu.memory_space<vmem>>) attributes {dimension_semantics = [#tpu.dimension_semantics<parallel>, #tpu.dimension_semantics<arbitrary>], iteration_bounds = array<i64: 1, 1>, scalar_prefetch = 0 : i64, scratch_operands = 1 : i64, tpu.core_type = #tpu.core_type<tc>, window_params = [{transform_indices = @transform_0, window_bounds = array<i64: 128, 128>}, {pipeline_mode = #tpu.pipeline_mode<synchronous>, transform_indices = @transform_1, window_bounds = array<i64: 1, 128, 128>}, {transform_indices = @transform_2, window_bounds = array<i64: 128, 1>}, {pipeline_mode = #tpu.pipeline_mode<synchronous>, transform_indices = @transform_3, window_bounds = array<i64: 1, 128>}, {pipeline_mode = #tpu.pipeline_mode<synchronous>, transform_indices = @transform_4, window_bounds = array<i64: 1, 128>}, {pipeline_mode = #tpu.pipeline_mode<synchronous>, transform_indices = @transform_5, window_bounds = array<i64: 128, 128>}, {pipeline_mode = #tpu.pipeline_mode<synchronous>, transform_indices = @transform_6, window_bounds = array<i64: 1, 128>}, {pipeline_mode = #tpu.pipeline_mode<synchronous>, transform_indices = @transform_7, window_bounds = array<i64: 128, 128>}, {pipeline_mode = #tpu.pipeline_mode<synchronous>, transform_indices = @transform_8, window_bounds = array<i64: 1, 128>}, {transform_indices = @transform_9, window_bounds = array<i64: 16, 128>}, {transform_indices = @transform_10, window_bounds = array<i64: 1, 128, 128>}, {transform_indices = @transform_11, window_bounds = array<i64: 1, 1, 128>}, {transform_indices = @transform_12, window_bounds = array<i64: 1, 1, 128>}, {transform_indices = @transform_13, window_bounds = array<i64: 1, 16, 128>}]} {
    %c0_i32 = arith.constant 0 : i32
    %0 = arith.cmpi eq, %arg1, %c0_i32 : i32
    %1 = arith.extui %0 : i1 to i32
    %c0_i32_0 = arith.constant 0 : i32
    %2 = arith.cmpi ne, %1, %c0_i32_0 : i32
    scf.if %2 {
      %cst_10 = arith.constant 0.000000e+00 : f32
      %14 = vector.broadcast %cst_10 : f32 to vector<128x128xf32>
      %c0_11 = arith.constant 0 : index
      %c0_12 = arith.constant 0 : index
      %15 = vector.load %arg16[%c0_11, %c0_12] : memref<128x128xf32, #tpu.memory_space<vmem>>, vector<128x128xf32>
      tpu.vector_store %arg16[%c0_11, %c0_12], %14 {strides = array<i32>} : memref<128x128xf32, #tpu.memory_space<vmem>>, vector<128x128xf32>,
    } else {
    }
    %c0 = arith.constant 0 : index
    %c0_1 = arith.constant 0 : index
    %3 = vector.load %arg16[%c0, %c0_1] : memref<128x128xf32, #tpu.memory_space<vmem>>, vector<128x128xf32>
    %c0_2 = arith.constant 0 : index
    %c0_3 = arith.constant 0 : index
    %4 = vector.load %arg2[%c0_2, %c0_3] : memref<128x128xbf16, #tpu.memory_space<vmem>>, vector<128x128xbf16>
    %5 = arith.index_cast %arg1 : i32 to index
    %c0_4 = arith.constant 0 : index
    %c0_5 = arith.constant 0 : index
    %6 = vector.load %arg3[%5, %c0_4, %c0_5] : memref<1x128x128xbf16, #tpu.memory_space<vmem>>, vector<1x128x128xbf16>
    %7 = vector.shape_cast %6 : vector<1x128x128xbf16> to vector<128x128xbf16>
    %cst = arith.constant dense<0.000000e+00> : vector<128x128xf32>
    %8 = tpu.matmul %4, %7, %cst {dimension_numbers = #tpu.dot_dimension_numbers<[1], [0], [0], [1], [0, 0, 1, 1], [], []>} : vector<128x128xbf16>, vector<128x128xbf16>, vector<128x128xf32> -> vector<128x128xf32>
    %9 = arith.addf %3, %8 : vector<128x128xf32>
    %c0_6 = arith.constant 0 : index
    %c0_7 = arith.constant 0 : index
    %10 = vector.load %arg16[%c0_6, %c0_7] : memref<128x128xf32, #tpu.memory_space<vmem>>, vector<128x128xf32>
    tpu.vector_store %arg16[%c0_6, %c0_7], %9 {strides = array<i32>} : memref<128x128xf32, #tpu.memory_space<vmem>>, vector<128x128xf32>,
    %c0_i32_8 = arith.constant 0 : i32
    %11 = arith.cmpi eq, %arg1, %c0_i32_8 : i32
    %12 = arith.extui %11 : i1 to i32
    %c0_i32_9 = arith.constant 0 : i32
    %13 = arith.cmpi ne, %12, %c0_i32_9 : i32
    scf.if %13 {
      %c0_10 = arith.constant 0 : index
      %c0_11 = arith.constant 0 : index
      %14 = vector.load %arg16[%c0_10, %c0_11] : memref<128x128xf32, #tpu.memory_space<vmem>>, vector<128x128xf32>
      %c0_12 = arith.constant 0 : index
      %c0_13 = arith.constant 0 : index
      %15 = vector.load %arg5[%c0_12, %c0_13] : memref<1x128xf32, #tpu.memory_space<vmem>>, vector<1x128xf32>
      %16 = vector.broadcast %15 : vector<1x128xf32> to vector<128x128xf32>
      %17 = arith.mulf %14, %16 : vector<128x128xf32>
      %c0_14 = arith.constant 0 : index
      %c0_15 = arith.constant 0 : index
      %18 = vector.load %arg4[%c0_14, %c0_15] : memref<128x1xf32, #tpu.memory_space<vmem>>, vector<128x1xf32>
      %c0_16 = arith.constant 0 : index
      %c0_17 = arith.constant 0 : index
      %19 = vector.load %arg6[%c0_16, %c0_17] : memref<1x128xf32, #tpu.memory_space<vmem>>, vector<1x128xf32>
      %20 = vector.broadcast %18 : vector<128x1xf32> to vector<128x128xf32>
      %21 = vector.broadcast %19 : vector<1x128xf32> to vector<128x128xf32>
      %22 = arith.mulf %20, %21 : vector<128x128xf32>
      %23 = arith.addf %17, %22 : vector<128x128xf32>
      %c0_18 = arith.constant 0 : index
      %c0_19 = arith.constant 0 : index
      %24 = vector.load %arg7[%c0_18, %c0_19] : memref<128x128xf32, #tpu.memory_space<vmem>>, vector<128x128xf32>
      %cst_20 = arith.constant dense<0.000000e+00> : vector<128x128xf32>
      %25 = tpu.matmul %23, %24, %cst_20 {dimension_numbers = #tpu.dot_dimension_numbers<[1], [0], [0], [1], [0, 0, 1, 1], [], []>} : vector<128x128xf32>, vector<128x128xf32>, vector<128x128xf32> -> vector<128x128xf32>
      %c0_21 = arith.constant 0 : index
      %c0_22 = arith.constant 0 : index
      %26 = vector.load %arg8[%c0_21, %c0_22] : memref<1x128xf32, #tpu.memory_space<vmem>>, vector<1x128xf32>
      %27 = vector.broadcast %26 : vector<1x128xf32> to vector<128x128xf32>
      %28 = arith.addf %25, %27 : vector<128x128xf32>
      %cst_23 = arith.constant 0.000000e+00 : f32
      %29 = vector.broadcast %cst_23 : f32 to vector<128x128xf32>
      %30 = arith.maximumf %28, %29 : vector<128x128xf32>
      %c0_24 = arith.constant 0 : index
      %c0_25 = arith.constant 0 : index
      %31 = vector.load %arg9[%c0_24, %c0_25] : memref<128x128xf32, #tpu.memory_space<vmem>>, vector<128x128xf32>
      %cst_26 = arith.constant dense<0.000000e+00> : vector<128x128xf32>
      %32 = tpu.matmul %30, %31, %cst_26 {dimension_numbers = #tpu.dot_dimension_numbers<[1], [0], [0], [1], [0, 0, 1, 1], [], []>} : vector<128x128xf32>, vector<128x128xf32>, vector<128x128xf32> -> vector<128x128xf32>
      %c0_27 = arith.constant 0 : index
      %c0_28 = arith.constant 0 : index
      %33 = vector.load %arg10[%c0_27, %c0_28] : memref<1x128xf32, #tpu.memory_space<vmem>>, vector<1x128xf32>
      %34 = vector.broadcast %33 : vector<1x128xf32> to vector<128x128xf32>
      %35 = arith.addf %32, %34 : vector<128x128xf32>
      %cst_29 = arith.constant 0.000000e+00 : f32
      %36 = vector.broadcast %cst_29 : f32 to vector<128x128xf32>
      %37 = arith.maximumf %35, %36 : vector<128x128xf32>
      %38 = arith.truncf %37 : vector<128x128xf32> to vector<128x128xbf16>
      %39 = vector.shape_cast %38 : vector<128x128xbf16> to vector<1x128x128xbf16>
      %c0_30 = arith.constant 0 : index
      %c0_31 = arith.constant 0 : index
      %c0_32 = arith.constant 0 : index
      %40 = vector.load %arg12[%c0_30, %c0_31, %c0_32] : memref<1x128x128xbf16, #tpu.memory_space<vmem>>, vector<1x128x128xbf16>
      tpu.vector_store %arg12[%c0_30, %c0_31, %c0_32], %39 {strides = array<i32>} : memref<1x128x128xbf16, #tpu.memory_space<vmem>>, vector<1x128x128xbf16>,
      %c128_i32 = arith.constant 128 : i32
      %41 = arith.muli %arg0, %c128_i32 : i32
      %42 = tpu.iota {dimensions = array<i32: 0>} : vector<128x1xi32>
      %43 = vector.broadcast %41 : i32 to vector<128x1xi32>
      %44 = arith.addi %43, %42 : vector<128x1xi32>
      %c16_i32 = arith.constant 16 : i32
      %45 = vector.broadcast %c16_i32 : i32 to vector<128x1xi32>
      %46 = arith.cmpi slt, %44, %45 : vector<128x1xi32>
      %47 = arith.extui %46 : vector<128x1xi1> to vector<128x1xi32>
      %48 = arith.sitofp %47 : vector<128x1xi32> to vector<128x1xf32>
      %49 = vector.broadcast %48 : vector<128x1xf32> to vector<128x128xf32>
      %50 = arith.mulf %37, %49 : vector<128x128xf32>
      %cst_33 = arith.constant dense<0.000000e+00> : vector<128xf32>
      %51 = vector.multi_reduction <add>, %50, %cst_33 [0] : vector<128x128xf32> to vector<128xf32>
      %52 = vector.shape_cast %51 : vector<128xf32> to vector<1x128xf32>
      %53 = vector.shape_cast %52 : vector<1x128xf32> to vector<1x1x128xf32>
      %c0_34 = arith.constant 0 : index
      %c0_35 = arith.constant 0 : index
      %c0_36 = arith.constant 0 : index
      %54 = vector.load %arg13[%c0_34, %c0_35, %c0_36] : memref<1x1x128xf32, #tpu.memory_space<vmem>>, vector<1x1x128xf32>
      tpu.vector_store %arg13[%c0_34, %c0_35, %c0_36], %53 {strides = array<i32>} : memref<1x1x128xf32, #tpu.memory_space<vmem>>, vector<1x1x128xf32>,
      %55 = arith.mulf %50, %50 : vector<128x128xf32>
      %cst_37 = arith.constant dense<0.000000e+00> : vector<128xf32>
      %56 = vector.multi_reduction <add>, %55, %cst_37 [0] : vector<128x128xf32> to vector<128xf32>
      %57 = vector.shape_cast %56 : vector<128xf32> to vector<1x128xf32>
      %58 = vector.shape_cast %57 : vector<1x128xf32> to vector<1x1x128xf32>
      %c0_38 = arith.constant 0 : index
      %c0_39 = arith.constant 0 : index
      %c0_40 = arith.constant 0 : index
      %59 = vector.load %arg14[%c0_38, %c0_39, %c0_40] : memref<1x1x128xf32, #tpu.memory_space<vmem>>, vector<1x1x128xf32>
      tpu.vector_store %arg14[%c0_38, %c0_39, %c0_40], %58 {strides = array<i32>} : memref<1x1x128xf32, #tpu.memory_space<vmem>>, vector<1x1x128xf32>,
      %c0_41 = arith.constant 0 : index
      %c0_42 = arith.constant 0 : index
      %60 = vector.load %arg11[%c0_41, %c0_42] : memref<16x128xbf16, #tpu.memory_space<vmem>>, vector<16x128xbf16>
      %61 = arith.truncf %37 : vector<128x128xf32> to vector<128x128xbf16>
      %cst_43 = arith.constant dense<0.000000e+00> : vector<16x128xf32>
      %62 = tpu.matmul %60, %61, %cst_43 {dimension_numbers = #tpu.dot_dimension_numbers<[1], [0], [0], [1], [0, 0, 1, 1], [], []>} : vector<16x128xbf16>, vector<128x128xbf16>, vector<16x128xf32> -> vector<16x128xf32>
      %63 = vector.shape_cast %62 : vector<16x128xf32> to vector<1x16x128xf32>
      %c0_44 = arith.constant 0 : index
      %c0_45 = arith.constant 0 : index
      %c0_46 = arith.constant 0 : index
      %64 = vector.load %arg15[%c0_44, %c0_45, %c0_46] : memref<1x16x128xf32, #tpu.memory_space<vmem>>, vector<1x16x128xf32>
      tpu.vector_store %arg15[%c0_44, %c0_45, %c0_46], %63 {strides = array<i32>} : memref<1x16x128xf32, #tpu.memory_space<vmem>>, vector<1x16x128xf32>,
    } else {
    }
    return
  }
  func.func @transform_0(%arg0: i32, %arg1: i32) -> (i32, i32) {
    %c0_i32 = arith.constant 0 : i32
    return %arg0, %arg1 : i32, i32
  }
  func.func @transform_1(%arg0: i32, %arg1: i32) -> (i32, i32, i32) {
    %c0_i32 = arith.constant 0 : i32
    %c0_i32_0 = arith.constant 0 : i32
    %c0_i32_1 = arith.constant 0 : i32
    %c0_i32_2 = arith.constant 0 : i32
    return %c0_i32, %c0_i32_0, %c0_i32_1 : i32, i32, i32
  }
  func.func @transform_2(%arg0: i32, %arg1: i32) -> (i32, i32) {
    %c0_i32 = arith.constant 0 : i32
    %c0_i32_0 = arith.constant 0 : i32
    return %arg0, %c0_i32 : i32, i32
  }
  func.func @transform_3(%arg0: i32, %arg1: i32) -> (i32, i32) {
    %c0_i32 = arith.constant 0 : i32
    %c0_i32_0 = arith.constant 0 : i32
    %c0_i32_1 = arith.constant 0 : i32
    return %c0_i32, %c0_i32_0 : i32, i32
  }
  func.func @transform_4(%arg0: i32, %arg1: i32) -> (i32, i32) {
    %c0_i32 = arith.constant 0 : i32
    %c0_i32_0 = arith.constant 0 : i32
    %c0_i32_1 = arith.constant 0 : i32
    return %c0_i32, %c0_i32_0 : i32, i32
  }
  func.func @transform_5(%arg0: i32, %arg1: i32) -> (i32, i32) {
    %c0_i32 = arith.constant 0 : i32
    %c0_i32_0 = arith.constant 0 : i32
    %c0_i32_1 = arith.constant 0 : i32
    return %c0_i32, %c0_i32_0 : i32, i32
  }
  func.func @transform_6(%arg0: i32, %arg1: i32) -> (i32, i32) {
    %c0_i32 = arith.constant 0 : i32
    %c0_i32_0 = arith.constant 0 : i32
    %c0_i32_1 = arith.constant 0 : i32
    return %c0_i32, %c0_i32_0 : i32, i32
  }
  func.func @transform_7(%arg0: i32, %arg1: i32) -> (i32, i32) {
    %c0_i32 = arith.constant 0 : i32
    %c0_i32_0 = arith.constant 0 : i32
    %c0_i32_1 = arith.constant 0 : i32
    return %c0_i32, %c0_i32_0 : i32, i32
  }
  func.func @transform_8(%arg0: i32, %arg1: i32) -> (i32, i32) {
    %c0_i32 = arith.constant 0 : i32
    %c0_i32_0 = arith.constant 0 : i32
    %c0_i32_1 = arith.constant 0 : i32
    return %c0_i32, %c0_i32_0 : i32, i32
  }
  func.func @transform_9(%arg0: i32, %arg1: i32) -> (i32, i32) {
    %c0_i32 = arith.constant 0 : i32
    %c0_i32_0 = arith.constant 0 : i32
    return %c0_i32, %arg0 : i32, i32
  }
  func.func @transform_10(%arg0: i32, %arg1: i32) -> (i32, i32, i32) {
    %c0_i32 = arith.constant 0 : i32
    %c0_i32_0 = arith.constant 0 : i32
    %c0_i32_1 = arith.constant 0 : i32
    return %arg0, %c0_i32, %c0_i32_0 : i32, i32, i32
  }
  func.func @transform_11(%arg0: i32, %arg1: i32) -> (i32, i32, i32) {
    %c0_i32 = arith.constant 0 : i32
    %c0_i32_0 = arith.constant 0 : i32
    %c0_i32_1 = arith.constant 0 : i32
    return %arg0, %c0_i32, %c0_i32_0 : i32, i32, i32
  }
  func.func @transform_12(%arg0: i32, %arg1: i32) -> (i32, i32, i32) {
    %c0_i32 = arith.constant 0 : i32
    %c0_i32_0 = arith.constant 0 : i32
    %c0_i32_1 = arith.constant 0 : i32
    return %arg0, %c0_i32, %c0_i32_0 : i32, i32, i32
  }
  func.func @transform_13(%arg0: i32, %arg1: i32) -> (i32, i32, i32) {
    %c0_i32 = arith.constant 0 : i32
    %c0_i32_0 = arith.constant 0 : i32
    %c0_i32_1 = arith.constant 0 : i32
    return %arg0, %c0_i32, %c0_i32_0 : i32, i32, i32
  }
}

module attributes {stable_mosaic.version = 11 : i64} {
  func.func @_gin_layer_kernel(%arg0: i32, %arg1: i32, %arg2: memref<128x128xbf16, #tpu.memory_space<vmem>>, %arg3: memref<1x128x128xbf16, #tpu.memory_space<vmem>>, %arg4: memref<128x1xf32, #tpu.memory_space<vmem>>, %arg5: memref<1x128xf32, #tpu.memory_space<vmem>>, %arg6: memref<1x128xf32, #tpu.memory_space<vmem>>, %arg7: memref<128x128xf32, #tpu.memory_space<vmem>>, %arg8: memref<1x128xf32, #tpu.memory_space<vmem>>, %arg9: memref<128x128xf32, #tpu.memory_space<vmem>>, %arg10: memref<1x128xf32, #tpu.memory_space<vmem>>, %arg11: memref<16x128xbf16, #tpu.memory_space<vmem>>, %arg12: memref<1x128x128xbf16, #tpu.memory_space<vmem>>, %arg13: memref<1x1x128xf32, #tpu.memory_space<vmem>>, %arg14: memref<1x1x128xf32, #tpu.memory_space<vmem>>, %arg15: memref<1x16x128xf32, #tpu.memory_space<vmem>>, %arg16: memref<128x128xf32, #tpu.memory_space<vmem>>) attributes {dimension_semantics = [#tpu.dimension_semantics<parallel>, #tpu.dimension_semantics<arbitrary>], iteration_bounds = array<i64: 1, 1>, scalar_prefetch = 0 : i64, scratch_operands = 1 : i64, tpu.core_type = #tpu.core_type<tc>, window_params = [{transform_indices = @transform_0, window_bounds = array<i64: 128, 128>}, {pipeline_mode = #tpu.pipeline_mode<synchronous>, transform_indices = @transform_1, window_bounds = array<i64: 1, 128, 128>}, {transform_indices = @transform_2, window_bounds = array<i64: 128, 1>}, {pipeline_mode = #tpu.pipeline_mode<synchronous>, transform_indices = @transform_3, window_bounds = array<i64: 1, 128>}, {pipeline_mode = #tpu.pipeline_mode<synchronous>, transform_indices = @transform_4, window_bounds = array<i64: 1, 128>}, {pipeline_mode = #tpu.pipeline_mode<synchronous>, transform_indices = @transform_5, window_bounds = array<i64: 128, 128>}, {pipeline_mode = #tpu.pipeline_mode<synchronous>, transform_indices = @transform_6, window_bounds = array<i64: 1, 128>}, {pipeline_mode = #tpu.pipeline_mode<synchronous>, transform_indices = @transform_7, window_bounds = array<i64: 128, 128>}, {pipeline_mode = #tpu.pipeline_mode<synchronous>, transform_indices = @transform_8, window_bounds = array<i64: 1, 128>}, {transform_indices = @transform_9, window_bounds = array<i64: 16, 128>}, {transform_indices = @transform_10, window_bounds = array<i64: 1, 128, 128>}, {transform_indices = @transform_11, window_bounds = array<i64: 1, 1, 128>}, {transform_indices = @transform_12, window_bounds = array<i64: 1, 1, 128>}, {transform_indices = @transform_13, window_bounds = array<i64: 1, 16, 128>}]} {
    %c0_i32 = arith.constant 0 : i32
    %0 = arith.cmpi eq, %arg1, %c0_i32 : i32
    %1 = arith.extui %0 : i1 to i32
    %c0_i32_0 = arith.constant 0 : i32
    %2 = arith.cmpi ne, %1, %c0_i32_0 : i32
    scf.if %2 {
      %cst_10 = arith.constant 0.000000e+00 : f32
      %14 = vector.broadcast %cst_10 : f32 to vector<128x128xf32>
      %c0_11 = arith.constant 0 : index
      %c0_12 = arith.constant 0 : index
      %15 = vector.load %arg16[%c0_11, %c0_12] : memref<128x128xf32, #tpu.memory_space<vmem>>, vector<128x128xf32>
      tpu.vector_store %arg16[%c0_11, %c0_12], %14 {strides = array<i32>} : memref<128x128xf32, #tpu.memory_space<vmem>>, vector<128x128xf32>,
    } else {
    }
    %c0 = arith.constant 0 : index
    %c0_1 = arith.constant 0 : index
    %3 = vector.load %arg16[%c0, %c0_1] : memref<128x128xf32, #tpu.memory_space<vmem>>, vector<128x128xf32>
    %c0_2 = arith.constant 0 : index
    %c0_3 = arith.constant 0 : index
    %4 = vector.load %arg2[%c0_2, %c0_3] : memref<128x128xbf16, #tpu.memory_space<vmem>>, vector<128x128xbf16>
    %5 = arith.index_cast %arg1 : i32 to index
    %c0_4 = arith.constant 0 : index
    %c0_5 = arith.constant 0 : index
    %6 = vector.load %arg3[%5, %c0_4, %c0_5] : memref<1x128x128xbf16, #tpu.memory_space<vmem>>, vector<1x128x128xbf16>
    %7 = vector.shape_cast %6 : vector<1x128x128xbf16> to vector<128x128xbf16>
    %cst = arith.constant dense<0.000000e+00> : vector<128x128xf32>
    %8 = tpu.matmul %4, %7, %cst {dimension_numbers = #tpu.dot_dimension_numbers<[1], [0], [0], [1], [0, 0, 1, 1], [], []>} : vector<128x128xbf16>, vector<128x128xbf16>, vector<128x128xf32> -> vector<128x128xf32>
    %9 = arith.addf %3, %8 : vector<128x128xf32>
    %c0_6 = arith.constant 0 : index
    %c0_7 = arith.constant 0 : index
    %10 = vector.load %arg16[%c0_6, %c0_7] : memref<128x128xf32, #tpu.memory_space<vmem>>, vector<128x128xf32>
    tpu.vector_store %arg16[%c0_6, %c0_7], %9 {strides = array<i32>} : memref<128x128xf32, #tpu.memory_space<vmem>>, vector<128x128xf32>,
    %c0_i32_8 = arith.constant 0 : i32
    %11 = arith.cmpi eq, %arg1, %c0_i32_8 : i32
    %12 = arith.extui %11 : i1 to i32
    %c0_i32_9 = arith.constant 0 : i32
    %13 = arith.cmpi ne, %12, %c0_i32_9 : i32
    scf.if %13 {
      %c0_10 = arith.constant 0 : index
      %c0_11 = arith.constant 0 : index
      %14 = vector.load %arg16[%c0_10, %c0_11] : memref<128x128xf32, #tpu.memory_space<vmem>>, vector<128x128xf32>
      %c0_12 = arith.constant 0 : index
      %c0_13 = arith.constant 0 : index
      %15 = vector.load %arg5[%c0_12, %c0_13] : memref<1x128xf32, #tpu.memory_space<vmem>>, vector<1x128xf32>
      %16 = vector.broadcast %15 : vector<1x128xf32> to vector<128x128xf32>
      %17 = arith.mulf %14, %16 : vector<128x128xf32>
      %c0_14 = arith.constant 0 : index
      %c0_15 = arith.constant 0 : index
      %18 = vector.load %arg4[%c0_14, %c0_15] : memref<128x1xf32, #tpu.memory_space<vmem>>, vector<128x1xf32>
      %c0_16 = arith.constant 0 : index
      %c0_17 = arith.constant 0 : index
      %19 = vector.load %arg6[%c0_16, %c0_17] : memref<1x128xf32, #tpu.memory_space<vmem>>, vector<1x128xf32>
      %20 = vector.broadcast %18 : vector<128x1xf32> to vector<128x128xf32>
      %21 = vector.broadcast %19 : vector<1x128xf32> to vector<128x128xf32>
      %22 = arith.mulf %20, %21 : vector<128x128xf32>
      %23 = arith.addf %17, %22 : vector<128x128xf32>
      %c0_18 = arith.constant 0 : index
      %c0_19 = arith.constant 0 : index
      %24 = vector.load %arg7[%c0_18, %c0_19] : memref<128x128xf32, #tpu.memory_space<vmem>>, vector<128x128xf32>
      %cst_20 = arith.constant dense<0.000000e+00> : vector<128x128xf32>
      %25 = tpu.matmul %23, %24, %cst_20 {dimension_numbers = #tpu.dot_dimension_numbers<[1], [0], [0], [1], [0, 0, 1, 1], [], []>} : vector<128x128xf32>, vector<128x128xf32>, vector<128x128xf32> -> vector<128x128xf32>
      %c0_21 = arith.constant 0 : index
      %c0_22 = arith.constant 0 : index
      %26 = vector.load %arg8[%c0_21, %c0_22] : memref<1x128xf32, #tpu.memory_space<vmem>>, vector<1x128xf32>
      %27 = vector.broadcast %26 : vector<1x128xf32> to vector<128x128xf32>
      %28 = arith.addf %25, %27 : vector<128x128xf32>
      %cst_23 = arith.constant 0.000000e+00 : f32
      %29 = vector.broadcast %cst_23 : f32 to vector<128x128xf32>
      %30 = arith.maximumf %28, %29 : vector<128x128xf32>
      %c0_24 = arith.constant 0 : index
      %c0_25 = arith.constant 0 : index
      %31 = vector.load %arg9[%c0_24, %c0_25] : memref<128x128xf32, #tpu.memory_space<vmem>>, vector<128x128xf32>
      %cst_26 = arith.constant dense<0.000000e+00> : vector<128x128xf32>
      %32 = tpu.matmul %30, %31, %cst_26 {dimension_numbers = #tpu.dot_dimension_numbers<[1], [0], [0], [1], [0, 0, 1, 1], [], []>} : vector<128x128xf32>, vector<128x128xf32>, vector<128x128xf32> -> vector<128x128xf32>
      %c0_27 = arith.constant 0 : index
      %c0_28 = arith.constant 0 : index
      %33 = vector.load %arg10[%c0_27, %c0_28] : memref<1x128xf32, #tpu.memory_space<vmem>>, vector<1x128xf32>
      %34 = vector.broadcast %33 : vector<1x128xf32> to vector<128x128xf32>
      %35 = arith.addf %32, %34 : vector<128x128xf32>
      %cst_29 = arith.constant 0.000000e+00 : f32
      %36 = vector.broadcast %cst_29 : f32 to vector<128x128xf32>
      %37 = arith.maximumf %35, %36 : vector<128x128xf32>
      %38 = arith.truncf %37 : vector<128x128xf32> to vector<128x128xbf16>
      %39 = vector.shape_cast %38 : vector<128x128xbf16> to vector<1x128x128xbf16>
      %c0_30 = arith.constant 0 : index
      %c0_31 = arith.constant 0 : index
      %c0_32 = arith.constant 0 : index
      %40 = vector.load %arg12[%c0_30, %c0_31, %c0_32] : memref<1x128x128xbf16, #tpu.memory_space<vmem>>, vector<1x128x128xbf16>
      tpu.vector_store %arg12[%c0_30, %c0_31, %c0_32], %39 {strides = array<i32>} : memref<1x128x128xbf16, #tpu.memory_space<vmem>>, vector<1x128x128xbf16>,
      %c128_i32 = arith.constant 128 : i32
      %41 = arith.muli %arg0, %c128_i32 : i32
      %42 = tpu.iota {dimensions = array<i32: 0>} : vector<128x1xi32>
      %43 = vector.broadcast %41 : i32 to vector<128x1xi32>
      %44 = arith.addi %43, %42 : vector<128x1xi32>
      %c16_i32 = arith.constant 16 : i32
      %45 = vector.broadcast %c16_i32 : i32 to vector<128x1xi32>
      %46 = arith.cmpi slt, %44, %45 : vector<128x1xi32>
      %47 = arith.extui %46 : vector<128x1xi1> to vector<128x1xi32>
      %48 = arith.sitofp %47 : vector<128x1xi32> to vector<128x1xf32>
      %49 = vector.broadcast %48 : vector<128x1xf32> to vector<128x128xf32>
      %50 = arith.mulf %37, %49 : vector<128x128xf32>
      %cst_33 = arith.constant dense<0.000000e+00> : vector<128xf32>
      %51 = vector.multi_reduction <add>, %50, %cst_33 [0] : vector<128x128xf32> to vector<128xf32>
      %52 = vector.shape_cast %51 : vector<128xf32> to vector<1x128xf32>
      %53 = vector.shape_cast %52 : vector<1x128xf32> to vector<1x1x128xf32>
      %c0_34 = arith.constant 0 : index
      %c0_35 = arith.constant 0 : index
      %c0_36 = arith.constant 0 : index
      %54 = vector.load %arg13[%c0_34, %c0_35, %c0_36] : memref<1x1x128xf32, #tpu.memory_space<vmem>>, vector<1x1x128xf32>
      tpu.vector_store %arg13[%c0_34, %c0_35, %c0_36], %53 {strides = array<i32>} : memref<1x1x128xf32, #tpu.memory_space<vmem>>, vector<1x1x128xf32>,
      %55 = arith.mulf %50, %50 : vector<128x128xf32>
      %cst_37 = arith.constant dense<0.000000e+00> : vector<128xf32>
      %56 = vector.multi_reduction <add>, %55, %cst_37 [0] : vector<128x128xf32> to vector<128xf32>
      %57 = vector.shape_cast %56 : vector<128xf32> to vector<1x128xf32>
      %58 = vector.shape_cast %57 : vector<1x128xf32> to vector<1x1x128xf32>
      %c0_38 = arith.constant 0 : index
      %c0_39 = arith.constant 0 : index
      %c0_40 = arith.constant 0 : index
      %59 = vector.load %arg14[%c0_38, %c0_39, %c0_40] : memref<1x1x128xf32, #tpu.memory_space<vmem>>, vector<1x1x128xf32>
      tpu.vector_store %arg14[%c0_38, %c0_39, %c0_40], %58 {strides = array<i32>} : memref<1x1x128xf32, #tpu.memory_space<vmem>>, vector<1x1x128xf32>,
      %c0_41 = arith.constant 0 : index
      %c0_42 = arith.constant 0 : index
      %60 = vector.load %arg11[%c0_41, %c0_42] : memref<16x128xbf16, #tpu.memory_space<vmem>>, vector<16x128xbf16>
      %61 = arith.truncf %37 : vector<128x128xf32> to vector<128x128xbf16>
      %cst_43 = arith.constant dense<0.000000e+00> : vector<16x128xf32>
      %62 = tpu.matmul %60, %61, %cst_43 {dimension_numbers = #tpu.dot_dimension_numbers<[1], [0], [0], [1], [0, 0, 1, 1], [], []>} : vector<16x128xbf16>, vector<128x128xbf16>, vector<16x128xf32> -> vector<16x128xf32>
      %63 = vector.shape_cast %62 : vector<16x128xf32> to vector<1x16x128xf32>
      %c0_44 = arith.constant 0 : index
      %c0_45 = arith.constant 0 : index
      %c0_46 = arith.constant 0 : index
      %64 = vector.load %arg15[%c0_44, %c0_45, %c0_46] : memref<1x16x128xf32, #tpu.memory_space<vmem>>, vector<1x16x128xf32>
      tpu.vector_store %arg15[%c0_44, %c0_45, %c0_46], %63 {strides = array<i32>} : memref<1x16x128xf32, #tpu.memory_space<vmem>>, vector<1x16x128xf32>,
    } else {
    }
    return
  }
  func.func @transform_0(%arg0: i32, %arg1: i32) -> (i32, i32) {
    %c0_i32 = arith.constant 0 : i32
    return %arg0, %arg1 : i32, i32
  }
  func.func @transform_1(%arg0: i32, %arg1: i32) -> (i32, i32, i32) {
    %c0_i32 = arith.constant 0 : i32
    %c0_i32_0 = arith.constant 0 : i32
    %c0_i32_1 = arith.constant 0 : i32
    %c0_i32_2 = arith.constant 0 : i32
    return %c0_i32, %c0_i32_0, %c0_i32_1 : i32, i32, i32
  }
  func.func @transform_2(%arg0: i32, %arg1: i32) -> (i32, i32) {
    %c0_i32 = arith.constant 0 : i32
    %c0_i32_0 = arith.constant 0 : i32
    return %arg0, %c0_i32 : i32, i32
  }
  func.func @transform_3(%arg0: i32, %arg1: i32) -> (i32, i32) {
    %c0_i32 = arith.constant 0 : i32
    %c0_i32_0 = arith.constant 0 : i32
    %c0_i32_1 = arith.constant 0 : i32
    return %c0_i32, %c0_i32_0 : i32, i32
  }
  func.func @transform_4(%arg0: i32, %arg1: i32) -> (i32, i32) {
    %c0_i32 = arith.constant 0 : i32
    %c0_i32_0 = arith.constant 0 : i32
    %c0_i32_1 = arith.constant 0 : i32
    return %c0_i32, %c0_i32_0 : i32, i32
  }
  func.func @transform_5(%arg0: i32, %arg1: i32) -> (i32, i32) {
    %c0_i32 = arith.constant 0 : i32
    %c0_i32_0 = arith.constant 0 : i32
    %c0_i32_1 = arith.constant 0 : i32
    return %c0_i32, %c0_i32_0 : i32, i32
  }
  func.func @transform_6(%arg0: i32, %arg1: i32) -> (i32, i32) {
    %c0_i32 = arith.constant 0 : i32
    %c0_i32_0 = arith.constant 0 : i32
    %c0_i32_1 = arith.constant 0 : i32
    return %c0_i32, %c0_i32_0 : i32, i32
  }
  func.func @transform_7(%arg0: i32, %arg1: i32) -> (i32, i32) {
    %c0_i32 = arith.constant 0 : i32
    %c0_i32_0 = arith.constant 0 : i32
    %c0_i32_1 = arith.constant 0 : i32
    return %c0_i32, %c0_i32_0 : i32, i32
  }
  func.func @transform_8(%arg0: i32, %arg1: i32) -> (i32, i32) {
    %c0_i32 = arith.constant 0 : i32
    %c0_i32_0 = arith.constant 0 : i32
    %c0_i32_1 = arith.constant 0 : i32
    return %c0_i32, %c0_i32_0 : i32, i32
  }
  func.func @transform_9(%arg0: i32, %arg1: i32) -> (i32, i32) {
    %c0_i32 = arith.constant 0 : i32
    %c0_i32_0 = arith.constant 0 : i32
    return %c0_i32, %arg0 : i32, i32
  }
  func.func @transform_10(%arg0: i32, %arg1: i32) -> (i32, i32, i32) {
    %c0_i32 = arith.constant 0 : i32
    %c0_i32_0 = arith.constant 0 : i32
    %c0_i32_1 = arith.constant 0 : i32
    return %arg0, %c0_i32, %c0_i32_0 : i32, i32, i32
  }
  func.func @transform_11(%arg0: i32, %arg1: i32) -> (i32, i32, i32) {
    %c0_i32 = arith.constant 0 : i32
    %c0_i32_0 = arith.constant 0 : i32
    %c0_i32_1 = arith.constant 0 : i32
    return %arg0, %c0_i32, %c0_i32_0 : i32, i32, i32
  }
  func.func @transform_12(%arg0: i32, %arg1: i32) -> (i32, i32, i32) {
    %c0_i32 = arith.constant 0 : i32
    %c0_i32_0 = arith.constant 0 : i32
    %c0_i32_1 = arith.constant 0 : i32
    return %arg0, %c0_i32, %c0_i32_0 : i32, i32, i32
  }
  func.func @transform_13(%arg0: i32, %arg1: i32) -> (i32, i32, i32) {
    %c0_i32 = arith.constant 0 : i32
    %c0_i32_0 = arith.constant 0 : i32
    %c0_i32_1 = arith.constant 0 : i32
    return %arg0, %c0_i32, %c0_i32_0 : i32, i32, i32
  }
}

module attributes {stable_mosaic.version = 11 : i64} {
  func.func @_gin_layer_kernel(%arg0: i32, %arg1: i32, %arg2: memref<128x128xbf16, #tpu.memory_space<vmem>>, %arg3: memref<1x128x128xbf16, #tpu.memory_space<vmem>>, %arg4: memref<128x1xf32, #tpu.memory_space<vmem>>, %arg5: memref<1x128xf32, #tpu.memory_space<vmem>>, %arg6: memref<1x128xf32, #tpu.memory_space<vmem>>, %arg7: memref<128x128xf32, #tpu.memory_space<vmem>>, %arg8: memref<1x128xf32, #tpu.memory_space<vmem>>, %arg9: memref<128x128xf32, #tpu.memory_space<vmem>>, %arg10: memref<1x128xf32, #tpu.memory_space<vmem>>, %arg11: memref<16x128xbf16, #tpu.memory_space<vmem>>, %arg12: memref<1x128x128xbf16, #tpu.memory_space<vmem>>, %arg13: memref<1x1x128xf32, #tpu.memory_space<vmem>>, %arg14: memref<1x1x128xf32, #tpu.memory_space<vmem>>, %arg15: memref<1x16x128xf32, #tpu.memory_space<vmem>>, %arg16: memref<128x128xf32, #tpu.memory_space<vmem>>) attributes {dimension_semantics = [#tpu.dimension_semantics<parallel>, #tpu.dimension_semantics<arbitrary>], iteration_bounds = array<i64: 1, 1>, scalar_prefetch = 0 : i64, scratch_operands = 1 : i64, tpu.core_type = #tpu.core_type<tc>, window_params = [{transform_indices = @transform_0, window_bounds = array<i64: 128, 128>}, {pipeline_mode = #tpu.pipeline_mode<synchronous>, transform_indices = @transform_1, window_bounds = array<i64: 1, 128, 128>}, {transform_indices = @transform_2, window_bounds = array<i64: 128, 1>}, {pipeline_mode = #tpu.pipeline_mode<synchronous>, transform_indices = @transform_3, window_bounds = array<i64: 1, 128>}, {pipeline_mode = #tpu.pipeline_mode<synchronous>, transform_indices = @transform_4, window_bounds = array<i64: 1, 128>}, {pipeline_mode = #tpu.pipeline_mode<synchronous>, transform_indices = @transform_5, window_bounds = array<i64: 128, 128>}, {pipeline_mode = #tpu.pipeline_mode<synchronous>, transform_indices = @transform_6, window_bounds = array<i64: 1, 128>}, {pipeline_mode = #tpu.pipeline_mode<synchronous>, transform_indices = @transform_7, window_bounds = array<i64: 128, 128>}, {pipeline_mode = #tpu.pipeline_mode<synchronous>, transform_indices = @transform_8, window_bounds = array<i64: 1, 128>}, {transform_indices = @transform_9, window_bounds = array<i64: 16, 128>}, {transform_indices = @transform_10, window_bounds = array<i64: 1, 128, 128>}, {transform_indices = @transform_11, window_bounds = array<i64: 1, 1, 128>}, {transform_indices = @transform_12, window_bounds = array<i64: 1, 1, 128>}, {transform_indices = @transform_13, window_bounds = array<i64: 1, 16, 128>}]} {
    %c0_i32 = arith.constant 0 : i32
    %0 = arith.cmpi eq, %arg1, %c0_i32 : i32
    %1 = arith.extui %0 : i1 to i32
    %c0_i32_0 = arith.constant 0 : i32
    %2 = arith.cmpi ne, %1, %c0_i32_0 : i32
    scf.if %2 {
      %cst_10 = arith.constant 0.000000e+00 : f32
      %14 = vector.broadcast %cst_10 : f32 to vector<128x128xf32>
      %c0_11 = arith.constant 0 : index
      %c0_12 = arith.constant 0 : index
      %15 = vector.load %arg16[%c0_11, %c0_12] : memref<128x128xf32, #tpu.memory_space<vmem>>, vector<128x128xf32>
      tpu.vector_store %arg16[%c0_11, %c0_12], %14 {strides = array<i32>} : memref<128x128xf32, #tpu.memory_space<vmem>>, vector<128x128xf32>,
    } else {
    }
    %c0 = arith.constant 0 : index
    %c0_1 = arith.constant 0 : index
    %3 = vector.load %arg16[%c0, %c0_1] : memref<128x128xf32, #tpu.memory_space<vmem>>, vector<128x128xf32>
    %c0_2 = arith.constant 0 : index
    %c0_3 = arith.constant 0 : index
    %4 = vector.load %arg2[%c0_2, %c0_3] : memref<128x128xbf16, #tpu.memory_space<vmem>>, vector<128x128xbf16>
    %5 = arith.index_cast %arg1 : i32 to index
    %c0_4 = arith.constant 0 : index
    %c0_5 = arith.constant 0 : index
    %6 = vector.load %arg3[%5, %c0_4, %c0_5] : memref<1x128x128xbf16, #tpu.memory_space<vmem>>, vector<1x128x128xbf16>
    %7 = vector.shape_cast %6 : vector<1x128x128xbf16> to vector<128x128xbf16>
    %cst = arith.constant dense<0.000000e+00> : vector<128x128xf32>
    %8 = tpu.matmul %4, %7, %cst {dimension_numbers = #tpu.dot_dimension_numbers<[1], [0], [0], [1], [0, 0, 1, 1], [], []>} : vector<128x128xbf16>, vector<128x128xbf16>, vector<128x128xf32> -> vector<128x128xf32>
    %9 = arith.addf %3, %8 : vector<128x128xf32>
    %c0_6 = arith.constant 0 : index
    %c0_7 = arith.constant 0 : index
    %10 = vector.load %arg16[%c0_6, %c0_7] : memref<128x128xf32, #tpu.memory_space<vmem>>, vector<128x128xf32>
    tpu.vector_store %arg16[%c0_6, %c0_7], %9 {strides = array<i32>} : memref<128x128xf32, #tpu.memory_space<vmem>>, vector<128x128xf32>,
    %c0_i32_8 = arith.constant 0 : i32
    %11 = arith.cmpi eq, %arg1, %c0_i32_8 : i32
    %12 = arith.extui %11 : i1 to i32
    %c0_i32_9 = arith.constant 0 : i32
    %13 = arith.cmpi ne, %12, %c0_i32_9 : i32
    scf.if %13 {
      %c0_10 = arith.constant 0 : index
      %c0_11 = arith.constant 0 : index
      %14 = vector.load %arg16[%c0_10, %c0_11] : memref<128x128xf32, #tpu.memory_space<vmem>>, vector<128x128xf32>
      %c0_12 = arith.constant 0 : index
      %c0_13 = arith.constant 0 : index
      %15 = vector.load %arg5[%c0_12, %c0_13] : memref<1x128xf32, #tpu.memory_space<vmem>>, vector<1x128xf32>
      %16 = vector.broadcast %15 : vector<1x128xf32> to vector<128x128xf32>
      %17 = arith.mulf %14, %16 : vector<128x128xf32>
      %c0_14 = arith.constant 0 : index
      %c0_15 = arith.constant 0 : index
      %18 = vector.load %arg4[%c0_14, %c0_15] : memref<128x1xf32, #tpu.memory_space<vmem>>, vector<128x1xf32>
      %c0_16 = arith.constant 0 : index
      %c0_17 = arith.constant 0 : index
      %19 = vector.load %arg6[%c0_16, %c0_17] : memref<1x128xf32, #tpu.memory_space<vmem>>, vector<1x128xf32>
      %20 = vector.broadcast %18 : vector<128x1xf32> to vector<128x128xf32>
      %21 = vector.broadcast %19 : vector<1x128xf32> to vector<128x128xf32>
      %22 = arith.mulf %20, %21 : vector<128x128xf32>
      %23 = arith.addf %17, %22 : vector<128x128xf32>
      %c0_18 = arith.constant 0 : index
      %c0_19 = arith.constant 0 : index
      %24 = vector.load %arg7[%c0_18, %c0_19] : memref<128x128xf32, #tpu.memory_space<vmem>>, vector<128x128xf32>
      %cst_20 = arith.constant dense<0.000000e+00> : vector<128x128xf32>
      %25 = tpu.matmul %23, %24, %cst_20 {dimension_numbers = #tpu.dot_dimension_numbers<[1], [0], [0], [1], [0, 0, 1, 1], [], []>} : vector<128x128xf32>, vector<128x128xf32>, vector<128x128xf32> -> vector<128x128xf32>
      %c0_21 = arith.constant 0 : index
      %c0_22 = arith.constant 0 : index
      %26 = vector.load %arg8[%c0_21, %c0_22] : memref<1x128xf32, #tpu.memory_space<vmem>>, vector<1x128xf32>
      %27 = vector.broadcast %26 : vector<1x128xf32> to vector<128x128xf32>
      %28 = arith.addf %25, %27 : vector<128x128xf32>
      %cst_23 = arith.constant 0.000000e+00 : f32
      %29 = vector.broadcast %cst_23 : f32 to vector<128x128xf32>
      %30 = arith.maximumf %28, %29 : vector<128x128xf32>
      %c0_24 = arith.constant 0 : index
      %c0_25 = arith.constant 0 : index
      %31 = vector.load %arg9[%c0_24, %c0_25] : memref<128x128xf32, #tpu.memory_space<vmem>>, vector<128x128xf32>
      %cst_26 = arith.constant dense<0.000000e+00> : vector<128x128xf32>
      %32 = tpu.matmul %30, %31, %cst_26 {dimension_numbers = #tpu.dot_dimension_numbers<[1], [0], [0], [1], [0, 0, 1, 1], [], []>} : vector<128x128xf32>, vector<128x128xf32>, vector<128x128xf32> -> vector<128x128xf32>
      %c0_27 = arith.constant 0 : index
      %c0_28 = arith.constant 0 : index
      %33 = vector.load %arg10[%c0_27, %c0_28] : memref<1x128xf32, #tpu.memory_space<vmem>>, vector<1x128xf32>
      %34 = vector.broadcast %33 : vector<1x128xf32> to vector<128x128xf32>
      %35 = arith.addf %32, %34 : vector<128x128xf32>
      %cst_29 = arith.constant 0.000000e+00 : f32
      %36 = vector.broadcast %cst_29 : f32 to vector<128x128xf32>
      %37 = arith.maximumf %35, %36 : vector<128x128xf32>
      %38 = arith.truncf %37 : vector<128x128xf32> to vector<128x128xbf16>
      %39 = vector.shape_cast %38 : vector<128x128xbf16> to vector<1x128x128xbf16>
      %c0_30 = arith.constant 0 : index
      %c0_31 = arith.constant 0 : index
      %c0_32 = arith.constant 0 : index
      %40 = vector.load %arg12[%c0_30, %c0_31, %c0_32] : memref<1x128x128xbf16, #tpu.memory_space<vmem>>, vector<1x128x128xbf16>
      tpu.vector_store %arg12[%c0_30, %c0_31, %c0_32], %39 {strides = array<i32>} : memref<1x128x128xbf16, #tpu.memory_space<vmem>>, vector<1x128x128xbf16>,
      %c128_i32 = arith.constant 128 : i32
      %41 = arith.muli %arg0, %c128_i32 : i32
      %42 = tpu.iota {dimensions = array<i32: 0>} : vector<128x1xi32>
      %43 = vector.broadcast %41 : i32 to vector<128x1xi32>
      %44 = arith.addi %43, %42 : vector<128x1xi32>
      %c16_i32 = arith.constant 16 : i32
      %45 = vector.broadcast %c16_i32 : i32 to vector<128x1xi32>
      %46 = arith.cmpi slt, %44, %45 : vector<128x1xi32>
      %47 = arith.extui %46 : vector<128x1xi1> to vector<128x1xi32>
      %48 = arith.sitofp %47 : vector<128x1xi32> to vector<128x1xf32>
      %49 = vector.broadcast %48 : vector<128x1xf32> to vector<128x128xf32>
      %50 = arith.mulf %37, %49 : vector<128x128xf32>
      %cst_33 = arith.constant dense<0.000000e+00> : vector<128xf32>
      %51 = vector.multi_reduction <add>, %50, %cst_33 [0] : vector<128x128xf32> to vector<128xf32>
      %52 = vector.shape_cast %51 : vector<128xf32> to vector<1x128xf32>
      %53 = vector.shape_cast %52 : vector<1x128xf32> to vector<1x1x128xf32>
      %c0_34 = arith.constant 0 : index
      %c0_35 = arith.constant 0 : index
      %c0_36 = arith.constant 0 : index
      %54 = vector.load %arg13[%c0_34, %c0_35, %c0_36] : memref<1x1x128xf32, #tpu.memory_space<vmem>>, vector<1x1x128xf32>
      tpu.vector_store %arg13[%c0_34, %c0_35, %c0_36], %53 {strides = array<i32>} : memref<1x1x128xf32, #tpu.memory_space<vmem>>, vector<1x1x128xf32>,
      %55 = arith.mulf %50, %50 : vector<128x128xf32>
      %cst_37 = arith.constant dense<0.000000e+00> : vector<128xf32>
      %56 = vector.multi_reduction <add>, %55, %cst_37 [0] : vector<128x128xf32> to vector<128xf32>
      %57 = vector.shape_cast %56 : vector<128xf32> to vector<1x128xf32>
      %58 = vector.shape_cast %57 : vector<1x128xf32> to vector<1x1x128xf32>
      %c0_38 = arith.constant 0 : index
      %c0_39 = arith.constant 0 : index
      %c0_40 = arith.constant 0 : index
      %59 = vector.load %arg14[%c0_38, %c0_39, %c0_40] : memref<1x1x128xf32, #tpu.memory_space<vmem>>, vector<1x1x128xf32>
      tpu.vector_store %arg14[%c0_38, %c0_39, %c0_40], %58 {strides = array<i32>} : memref<1x1x128xf32, #tpu.memory_space<vmem>>, vector<1x1x128xf32>,
      %c0_41 = arith.constant 0 : index
      %c0_42 = arith.constant 0 : index
      %60 = vector.load %arg11[%c0_41, %c0_42] : memref<16x128xbf16, #tpu.memory_space<vmem>>, vector<16x128xbf16>
      %61 = arith.truncf %37 : vector<128x128xf32> to vector<128x128xbf16>
      %cst_43 = arith.constant dense<0.000000e+00> : vector<16x128xf32>
      %62 = tpu.matmul %60, %61, %cst_43 {dimension_numbers = #tpu.dot_dimension_numbers<[1], [0], [0], [1], [0, 0, 1, 1], [], []>} : vector<16x128xbf16>, vector<128x128xbf16>, vector<16x128xf32> -> vector<16x128xf32>
      %63 = vector.shape_cast %62 : vector<16x128xf32> to vector<1x16x128xf32>
      %c0_44 = arith.constant 0 : index
      %c0_45 = arith.constant 0 : index
      %c0_46 = arith.constant 0 : index
      %64 = vector.load %arg15[%c0_44, %c0_45, %c0_46] : memref<1x16x128xf32, #tpu.memory_space<vmem>>, vector<1x16x128xf32>
      tpu.vector_store %arg15[%c0_44, %c0_45, %c0_46], %63 {strides = array<i32>} : memref<1x16x128xf32, #tpu.memory_space<vmem>>, vector<1x16x128xf32>,
    } else {
    }
    return
  }
  func.func @transform_0(%arg0: i32, %arg1: i32) -> (i32, i32) {
    %c0_i32 = arith.constant 0 : i32
    return %arg0, %arg1 : i32, i32
  }
  func.func @transform_1(%arg0: i32, %arg1: i32) -> (i32, i32, i32) {
    %c0_i32 = arith.constant 0 : i32
    %c0_i32_0 = arith.constant 0 : i32
    %c0_i32_1 = arith.constant 0 : i32
    %c0_i32_2 = arith.constant 0 : i32
    return %c0_i32, %c0_i32_0, %c0_i32_1 : i32, i32, i32
  }
  func.func @transform_2(%arg0: i32, %arg1: i32) -> (i32, i32) {
    %c0_i32 = arith.constant 0 : i32
    %c0_i32_0 = arith.constant 0 : i32
    return %arg0, %c0_i32 : i32, i32
  }
  func.func @transform_3(%arg0: i32, %arg1: i32) -> (i32, i32) {
    %c0_i32 = arith.constant 0 : i32
    %c0_i32_0 = arith.constant 0 : i32
    %c0_i32_1 = arith.constant 0 : i32
    return %c0_i32, %c0_i32_0 : i32, i32
  }
  func.func @transform_4(%arg0: i32, %arg1: i32) -> (i32, i32) {
    %c0_i32 = arith.constant 0 : i32
    %c0_i32_0 = arith.constant 0 : i32
    %c0_i32_1 = arith.constant 0 : i32
    return %c0_i32, %c0_i32_0 : i32, i32
  }
  func.func @transform_5(%arg0: i32, %arg1: i32) -> (i32, i32) {
    %c0_i32 = arith.constant 0 : i32
    %c0_i32_0 = arith.constant 0 : i32
    %c0_i32_1 = arith.constant 0 : i32
    return %c0_i32, %c0_i32_0 : i32, i32
  }
  func.func @transform_6(%arg0: i32, %arg1: i32) -> (i32, i32) {
    %c0_i32 = arith.constant 0 : i32
    %c0_i32_0 = arith.constant 0 : i32
    %c0_i32_1 = arith.constant 0 : i32
    return %c0_i32, %c0_i32_0 : i32, i32
  }
  func.func @transform_7(%arg0: i32, %arg1: i32) -> (i32, i32) {
    %c0_i32 = arith.constant 0 : i32
    %c0_i32_0 = arith.constant 0 : i32
    %c0_i32_1 = arith.constant 0 : i32
    return %c0_i32, %c0_i32_0 : i32, i32
  }
  func.func @transform_8(%arg0: i32, %arg1: i32) -> (i32, i32) {
    %c0_i32 = arith.constant 0 : i32
    %c0_i32_0 = arith.constant 0 : i32
    %c0_i32_1 = arith.constant 0 : i32
    return %c0_i32, %c0_i32_0 : i32, i32
  }
  func.func @transform_9(%arg0: i32, %arg1: i32) -> (i32, i32) {
    %c0_i32 = arith.constant 0 : i32
    %c0_i32_0 = arith.constant 0 : i32
    return %c0_i32, %arg0 : i32, i32
  }
  func.func @transform_10(%arg0: i32, %arg1: i32) -> (i32, i32, i32) {
    %c0_i32 = arith.constant 0 : i32
    %c0_i32_0 = arith.constant 0 : i32
    %c0_i32_1 = arith.constant 0 : i32
    return %arg0, %c0_i32, %c0_i32_0 : i32, i32, i32
  }
  func.func @transform_11(%arg0: i32, %arg1: i32) -> (i32, i32, i32) {
    %c0_i32 = arith.constant 0 : i32
    %c0_i32_0 = arith.constant 0 : i32
    %c0_i32_1 = arith.constant 0 : i32
    return %arg0, %c0_i32, %c0_i32_0 : i32, i32, i32
  }
  func.func @transform_12(%arg0: i32, %arg1: i32) -> (i32, i32, i32) {
    %c0_i32 = arith.constant 0 : i32
    %c0_i32_0 = arith.constant 0 : i32
    %c0_i32_1 = arith.constant 0 : i32
    return %arg0, %c0_i32, %c0_i32_0 : i32, i32, i32
  }
  func.func @transform_13(%arg0: i32, %arg1: i32) -> (i32, i32, i32) {
    %c0_i32 = arith.constant 0 : i32
    %c0_i32_0 = arith.constant 0 : i32
    %c0_i32_1 = arith.constant 0 : i32
    return %arg0, %c0_i32, %c0_i32_0 : i32, i32, i32
  }
}

</mosaic_0001>

<bundles_post_ra>
// kernel: encoder_forward.3
= control target key start
LH: loop header
LB: loop body
LE: loop exit
PB: predicated region body
PF: predicated region fallthrough
CT: control target
= control target key end

     0   :  { %19 = vsyncpa [#allocation4], 0  ;;  %s1971_s0 = inlined_call_operand.vmem [shape: bf16[128,128], index: 0, kind: input, shape index: {}]   ;;  %s1972_s1 = inlined_call_operand.hbm [shape: bf16[1,128,128], index: 1, kind: input, shape index: {}]   ;;  %s1973_s2 = inlined_call_operand.vmem [shape: f32[128,1], index: 2, kind: input, shape index: {}]   ;;  %s1974_s3 = inlined_call_operand.vmem [shape: f32[1,128], index: 3, kind: input, shape index: {}]   ;;  %s1975_s4 = inlined_call_operand.vmem [shape: f32[1,128], index: 4, kind: input, shape index: {}]   ;;  %s1976_s5 = inlined_call_operand.hbm [shape: f32[128,128], index: 5, kind: input, shape index: {}]   ;;  %s1977_s6 = inlined_call_operand.vmem [shape: f32[1,128], index: 6, kind: input, shape index: {}]   ;;  %s1978_s7 = inlined_call_operand.hbm [shape: f32[128,128], index: 7, kind: input, shape index: {}]   ;;  %s1979_s8 = inlined_call_operand.vmem [shape: f32[1,128], index: 8, kind: input, shape index: {}]   ;;  %s1980_s9 = inlined_call_operand.vmem [shape: bf16[16,128], index: 9, kind: input, shape index: {}]   ;;  %s1981_s10 = inlined_call_operand.vmem [shape: bf16[1,128,128], index: 10, kind: output, shape index: {0}]   ;;  %s1982_s11 = inlined_call_operand.vmem [shape: f32[1,1,128], index: 11, kind: output, shape index: {1}]   ;;  %s1983_s12 = inlined_call_operand.vmem [shape: f32[1,1,128], index: 12, kind: output, shape index: {2}]   ;;  %s1984_s13 = inlined_call_operand.vmem [shape: f32[1,16,128], index: 13, kind: output, shape index: {3}]  }
   0x1   :  { %20 = vsyncpa [#allocation6], 0  ;;  %s1676_s25 = smov [#allocation5]  }
   0x2   :  { %s46_s26 = sshll.u32 %s1676_s25, 4  ;;  %s47_s26 = int_to_ptr.vmem [resolvable:$true] %s46_s26 }
   0x3   :  { %s1620_s27 = scalar_lea.vmem %s47_s26, 2048  ;;  %p1625_p1 = scmp.lt.s32.totalorder %s47_s26, %s47_s26 }
   0x4   :  { %p1621_p0 = scmp.ne.s32.totalorder %s47_s26, %s1620_s27  ;;  %p1626_p2 = scmp.lt.s32.totalorder %s1620_s27, %s1620_s27 }
   0x6   :  { %p1627_p3 = por %p1626_p2, %p1625_p1 }
   0x8   :  { %p1628_p4 = pnand %p1627_p3, %p1621_p0 }
   0xa   :  { %1631 = shalt.err (!%p1628_p4)
}
   0xb   :  { %s1677_s28 = smov 128   ;;  %s1678_s29 = smov 8  }
   0xc   :  { %52 = dma.hbm_to_vmem [thread:$0]  %s1976_s5, 2048, %s47_s26, [#allocation6], %s1677_s28, %s1677_s28, %s1678_s29  }
   0xd   :  { %s1679_s15 = smov [#allocation3]  }
   0xe   :  { %s28_s16 = sshll.u32 %s1679_s15, 4  ;;  %s29_s16 = int_to_ptr.vmem [resolvable:$true] %s28_s16 }
   0xf   :  { %s1640_s17 = scalar_lea.vmem %s29_s16, 1024  ;;  %p1645_p6 = scmp.lt.s32.totalorder %s29_s16, %s29_s16 }
  0x10   :  { %p1641_p5 = scmp.ne.s32.totalorder %s29_s16, %s1640_s17  ;;  %p1646_p7 = scmp.lt.s32.totalorder %s1640_s17, %s1640_s17 }
  0x12   :  { %p1647_p8 = por %p1646_p7, %p1645_p6 }
  0x14   :  { %p1648_p9 = pnand %p1647_p8, %p1641_p5 }
  0x16   :  { %1651 = shalt.err (!%p1648_p9)
}
  0x17   :  { %s1680_s18 = smov 64   ;;  %s1681_s19 = smov 4  }
  0x18   :  { %34 = dma.hbm_to_vmem [thread:$0]  %s1972_s1, 1024, %s29_s16, [#allocation4], %s1680_s18, %s1680_s18, %s1681_s19  }
  0x19   :  { %s1682_s22 = smov [#allocation7]  }
  0x1a   :  { %s60_s23 = sshll.u32 %s1682_s22, 4  ;;  %s61_s23 = int_to_ptr.vmem [resolvable:$true] %s60_s23 }
  0x1b   :  { %s1660_s5 = scalar_lea.vmem %s61_s23, 2048  ;;  %p1665_p11 = scmp.lt.s32.totalorder %s61_s23, %s61_s23 }
  0x1c   :  { %p1661_p10 = scmp.ne.s32.totalorder %s61_s23, %s1660_s5  ;;  %p1666_p12 = scmp.lt.s32.totalorder %s1660_s5, %s1660_s5 }
  0x1e   :  { %p1667_p13 = por %p1666_p12, %p1665_p11 }
  0x20   :  { %p1668_p0 = pnand %p1667_p13, %p1661_p10 }
  0x22   :  { %1671 = shalt.err (!%p1668_p0)
}
  0x23   :  { %66 = dma.hbm_to_vmem [thread:$0]  %s1978_s7, 2048, %s61_s23, [#allocation6], %s1677_s28, %s1677_s28, %s1678_s29  }
  0x24   :  { %1672 = dma.done.wait [#allocation4], 1024  }
  0x25   :  { %1673 = vsyncadd [#allocation4], 4294966272 }
  0x26   :  { %1674 = dma.done.wait [#allocation6], 4096  }
  0x27   :  { %1675 = vsyncadd [#allocation6], 4294963200  ;;  %v1683_v0 = vmov 0   ;;  %v1595_v1 = vld [vmem:[#allocation3 + $0x38] sm:$0xff]   ;;  %v1596_v2 = vld [vmem:[#allocation3 + $0x30] sm:$0xff]   ;;  %vm1685_vm0 = vmmov 0  }
  0x28   :  { %1593 = vset.pattern.permute.xlu0 %v1683_v0  ;;  %1594 = vset.pattern.permute.xlu1 %v1683_v0  ;;  %v1597_v3 = vld [vmem:[#allocation3 + $0x28] sm:$0xff]   ;;  %v1598_v4 = vld [vmem:[#allocation3 + $0x20] sm:$0xff]   ;;  %v1599_v6 = vld [vmem:[#allocation3 + $0x18] sm:$0xff]  }
  0x29   :  { %1419 = vmatprep.subr.bf16.mxu0 %v1595_v1  ;;  %v1603_v5 = vld [vmem:[%s1971_s0] sm:$0xff]   ;;  %v1600_v7 = vld [vmem:[#allocation3 + $0x10] sm:$0xff]   ;;  %v420_v10 = vld [vmem:[%s1973_s2 + $0x8] sm:$0xff] }
  0x2a   :  { %1420 = vmatpush3.bf16.msra.mxu0 %v1595_v1  ;;  %1435 = vmatprep.mubr.bf16.mxu0 %v1603_v5  ;;  %v419_v8 = vld [vmem:[%s1973_s2] sm:$0xff]  ;;  %v421_v9 = vld [vmem:[%s1973_s2 + $0x10] sm:$0xff]  ;;  %v422_v11 = vld [vmem:[%s1973_s2 + $0x18] sm:$0xff] }
  0x2b   :  { %1421 = vmatprep.subr.bf16.mxu0 %v1596_v2  ;;  %438 = vperm.xlu0 %1593, %v419_v8   ;;  %v1601_v12 = vld [vmem:[#allocation3 + $0x8] sm:$0xff]   ;;  %v569_v13 = vld [vmem:[#allocation5 + $0x78] sm:$0xff]  ;;  %v423_v14 = vld [vmem:[%s1973_s2 + $0x20] sm:$0xff] }
  0x2c   :  { %448 = vperm.xlu1 %1594, %v421_v9   ;;  %v424_v15 = vld [vmem:[%s1973_s2 + $0x28] sm:$0xff]  ;;  %1451 = vmatprep.subr.mxu1 %v569_v13  ;;  %v568_v16 = vld [vmem:[#allocation5 + $0x70] sm:$0xff]  ;;  %v1602_v17 = vld [vmem:[#allocation3] sm:$0xff]  }
  0x2d   :  { %1452 = vmatpush3.msra.mxu1 %v569_v13  ;;  %v567_v18 = vld [vmem:[#allocation5 + $0x68] sm:$0xff]  ;;  %v425_v19 = vld [vmem:[%s1973_s2 + $0x30] sm:$0xff]  ;;  %v426_v20 = vld [vmem:[%s1973_s2 + $0x38] sm:$0xff] }
  0x2e   :  { %1422 = vmatpush3.bf16.msra.mxu0 %v1596_v2  ;;  %1453 = vmatprep.subr.mxu1 %v568_v16  ;;  %v566_v21 = vld [vmem:[#allocation5 + $0x60] sm:$0xff]  ;;  %v565_v22 = vld [vmem:[#allocation5 + $0x58] sm:$0xff]  ;;  %v1604_v23 = vld [vmem:[%s1971_s0 + $0x8] sm:$0xff]  }
  0x2f   :  { %1423 = vmatprep.subr.bf16.mxu0 %v1597_v3  ;;  %443 = vperm.xlu0 %1593, %v420_v10   ;;  %v427_v24 = vld [vmem:[%s1973_s2 + $0x40] sm:$0xff]  ;;  %v428_v25 = vld [vmem:[%s1973_s2 + $0x48] sm:$0xff]  ;;  %v1605_v26 = vld [vmem:[%s1971_s0 + $0x10] sm:$0xff]  }
  0x30   :  { %453 = vperm.xlu1 %1594, %v422_v11   ;;  %1454 = vmatpush3.msra.mxu1 %v568_v16  ;;  %v564_v27 = vld [vmem:[#allocation5 + $0x50] sm:$0xff]  ;;  %v430_v29 = vld [vmem:[%s1973_s2 + $0x58] sm:$0xff]  ;;  %v563_v30 = vld [vmem:[#allocation5 + $0x48] sm:$0xff] }
  0x31   :  { %1455 = vmatprep.subr.mxu1 %v567_v18  ;;  %v429_v28 = vld [vmem:[%s1973_s2 + $0x50] sm:$0xff]  ;;  %v562_v31 = vld [vmem:[#allocation5 + $0x40] sm:$0xff]  ;;  %v1606_v32 = vld [vmem:[%s1971_s0 + $0x18] sm:$0xff]  }
  0x32   :  { %1424 = vmatpush3.bf16.msra.mxu0 %v1597_v3  ;;  %1456 = vmatpush3.msra.mxu1 %v567_v18  ;;  %v431_v33 = vld [vmem:[%s1973_s2 + $0x60] sm:$0xff]  ;;  %v432_v34 = vld [vmem:[%s1973_s2 + $0x68] sm:$0xff]  ;;  %v561_v36 = vld [vmem:[#allocation5 + $0x38] sm:$0xff] }
  0x33   :  { %1425 = vmatprep.subr.bf16.mxu0 %v1598_v4  ;;  %458 = vperm.xlu0 %1593, %v423_v14   ;;  %v1607_v35 = vld [vmem:[%s1971_s0 + $0x20] sm:$0xff]   ;;  %v433_v37 = vld [vmem:[%s1973_s2 + $0x70] sm:$0xff]  ;;  %v434_v38 = vld [vmem:[%s1973_s2 + $0x78] sm:$0xff] }
  0x34   :  { %463 = vperm.xlu1 %1594, %v424_v15   ;;  %1457 = vmatprep.subr.mxu1 %v566_v21  ;;  %v560_v39 = vld [vmem:[#allocation5 + $0x30] sm:$0xff]  ;;  %v559_v40 = vld [vmem:[#allocation5 + $0x28] sm:$0xff]  ;;  %v1610_v43 = vld [vmem:[%s1971_s0 + $0x38] sm:$0xff]  }
  0x35   :  { %1458 = vmatpush3.msra.mxu1 %v566_v21  ;;  %v1608_v41 = vld [vmem:[%s1971_s0 + $0x28] sm:$0xff]   ;;  %v1609_v42 = vld [vmem:[%s1971_s0 + $0x30] sm:$0xff]   ;;  %v558_v44 = vld [vmem:[#allocation5 + $0x20] sm:$0xff] }
  0x36   :  { %1426 = vmatpush3.bf16.msra.mxu0 %v1598_v4  ;;  %1459 = vmatprep.subr.mxu1 %v565_v22  ;;  %v557_v45 = vld [vmem:[#allocation5 + $0x18] sm:$0xff]  ;;  %v556_v46 = vld [vmem:[#allocation5 + $0x10] sm:$0xff]  ;;  %v555_v47 = vld [vmem:[#allocation5 + $0x8] sm:$0xff] }
  0x37   :  { %1427 = vmatprep.subr.bf16.mxu0 %v1599_v6  ;;  %468 = vperm.xlu0 %1593, %v425_v19   ;;  %v554_v48 = vld [vmem:[#allocation5] sm:$0xff]  ;;  %v753_v49 = vld [vmem:[#allocation7 + $0x78] sm:$0xff]  ;;  %v752_v50 = vld [vmem:[#allocation7 + $0x70] sm:$0xff] }
  0x38   :  { %473 = vperm.xlu1 %1594, %v426_v20   ;;  %1460 = vmatpush3.msra.mxu1 %v565_v22  ;;  %v751_v51 = vld [vmem:[#allocation7 + $0x68] sm:$0xff]  ;;  %v750_v52 = vld [vmem:[#allocation7 + $0x60] sm:$0xff]  ;;  %v749_v53 = vld [vmem:[#allocation7 + $0x58] sm:$0xff] }
  0x39   :  { %1461 = vmatprep.subr.mxu1 %v564_v27  ;;  %v748_v54 = vld [vmem:[#allocation7 + $0x50] sm:$0xff]  ;;  %v747_v55 = vld [vmem:[#allocation7 + $0x48] sm:$0xff]  ;;  %v746_v56 = vld [vmem:[#allocation7 + $0x40] sm:$0xff] }
  0x3a   :  { %1428 = vmatpush3.bf16.msra.mxu0 %v1599_v6  ;;  %1462 = vmatpush3.msra.mxu1 %v564_v27  ;;  %v745_v57 = vld [vmem:[#allocation7 + $0x38] sm:$0xff]  ;;  %v744_v58 = vld [vmem:[#allocation7 + $0x30] sm:$0xff]  ;;  %v743_v59 = vld [vmem:[#allocation7 + $0x28] sm:$0xff] }
  0x3b   :  { %1429 = vmatprep.subr.bf16.mxu0 %v1600_v7  ;;  %478 = vperm.xlu0 %1593, %v427_v24   ;;  %v742_v60 = vld [vmem:[#allocation7 + $0x20] sm:$0xff] }
  0x3c   :  { %483 = vperm.xlu1 %1594, %v428_v25   ;;  %1463 = vmatprep.subr.mxu1 %v563_v30  ;;  %v1840_v2 = vld [vmem:[%s1975_s4] ss:$0 sm:$0xff] }
  0x3d   :  { %1464 = vmatpush3.msra.mxu1 %v563_v30  ;;  %v1846_v6 = vld [vmem:[%s1974_s3] ss:$0 sm:$0xff] }
  0x3e   :  { %1430 = vmatpush3.bf16.msra.mxu0 %v1600_v7  ;;  %1465 = vmatprep.subr.mxu1 %v562_v31 }
  0x3f   :  { %1431 = vmatprep.subr.bf16.mxu0 %v1601_v12  ;;  %488 = vperm.xlu0 %1593, %v429_v28  }
  0x40   :  { %493 = vperm.xlu1 %1594, %v430_v29   ;;  %1466 = vmatpush3.msra.mxu1 %v562_v31 }
  0x41   :  { %1467 = vmatprep.subr.mxu1 %v561_v36 }
  0x42   :  { %1432 = vmatpush3.bf16.msra.mxu0 %v1601_v12  ;;  %1468 = vmatpush3.msra.mxu1 %v561_v36 }
  0x43   :  { %1433 = vmatprep.subr.bf16.mxu0 %v1602_v17  ;;  %498 = vperm.xlu0 %1593, %v431_v33  }
  0x44   :  { %503 = vperm.xlu1 %1594, %v432_v34   ;;  %1469 = vmatprep.subr.mxu1 %v560_v39 }
  0x45   :  { %1470 = vmatpush3.msra.mxu1 %v560_v39 }
  0x46   :  { %1434 = vmatpush3.bf16.msra.mxu0 %v1602_v17  ;;  %1471 = vmatprep.subr.mxu1 %v559_v40 }
  0x47   :  { %508 = vperm.xlu0 %1593, %v433_v37   ;;  %1472 = vmatpush3.msra.mxu1 %v559_v40 }
  0x48   :  { %513 = vperm.xlu1 %1594, %v434_v38   ;;  %1473 = vmatprep.subr.mxu1 %v558_v44 }
  0x49   :  { %1436 = vmatmul.mubr.bf16.vlgmr.msra.gmra.mxu0 %v1604_v23  ;;  %1474 = vmatpush3.msra.mxu1 %v558_v44 }
  0x4a   :  { %1439 = vmatprep.mubr.bf16.mxu0 %v1605_v26  ;;  %1475 = vmatprep.subr.mxu1 %v557_v45 }
  0x4b   :  { %1476 = vmatpush3.msra.mxu1 %v557_v45  ;;  %1507 = vmatprep.subr.mxu0 %v753_v49 }
  0x4c   :  { %1477 = vmatprep.subr.mxu1 %v556_v46  ;;  %1508 = vmatpush3.msra.mxu0 %v753_v49 }
  0x4d   :  { %1478 = vmatpush3.msra.mxu1 %v556_v46  ;;  %1509 = vmatprep.subr.mxu0 %v752_v50 }
  0x4e   :  { %1479 = vmatprep.subr.mxu1 %v555_v47  ;;  %1510 = vmatpush3.msra.mxu0 %v752_v50 }
  0x4f   :  { %1480 = vmatpush3.msra.mxu1 %v555_v47  ;;  %1511 = vmatprep.subr.mxu0 %v751_v51 }
  0x50   :  { %1481 = vmatprep.subr.mxu1 %v554_v48  ;;  %1512 = vmatpush3.msra.mxu0 %v751_v51 }
  0x51   :  { %1440 = vmatmul.mubr.bf16.gmra.mxu0 %v1606_v32  ;;  %1482 = vmatpush3.msra.mxu1 %v554_v48 }
  0x52   :  { %1443 = vmatprep.mubr.bf16.mxu0 %v1607_v35  ;;  %1513 = vmatprep.subr.mxu0 %v750_v52 }
  0x53   :  { %1514 = vmatpush3.msra.mxu0 %v750_v52 }
  0x54   :  { %1515 = vmatprep.subr.mxu0 %v749_v53 }
  0x55   :  { %1516 = vmatpush3.msra.mxu0 %v749_v53 }
  0x56   :  { %1517 = vmatprep.subr.mxu0 %v748_v54 }
  0x57   :  { %1518 = vmatpush3.msra.mxu0 %v748_v54 }
  0x58   :  { %1519 = vmatprep.subr.mxu0 %v747_v55 }
  0x59   :  { %1444 = vmatmul.mubr.bf16.gmra.mxu0 %v1608_v41 }
  0x5a   :  { %1447 = vmatprep.mubr.bf16.mxu0 %v1609_v42  ;;  %1520 = vmatpush3.msra.mxu0 %v747_v55 }
  0x5b   :  { %1521 = vmatprep.subr.mxu0 %v746_v56 }
  0x5c   :  { %1522 = vmatpush3.msra.mxu0 %v746_v56 }
  0x5d   :  { %1523 = vmatprep.subr.mxu0 %v745_v57 }
  0x5e   :  { %1524 = vmatpush3.msra.mxu0 %v745_v57 }
  0x5f   :  { %1525 = vmatprep.subr.mxu0 %v744_v58 }
  0x60   :  { %1526 = vmatpush3.msra.mxu0 %v744_v58 }
  0x61   :  { %1448 = vmatmul.mubr.bf16.gmra.mxu0 %v1610_v43  ;;  %1527 = vmatprep.subr.mxu0 %v743_v59 }
  0x62   :  { %1528 = vmatpush3.msra.mxu0 %v743_v59 }
  0x63   :  { %1529 = vmatprep.subr.mxu0 %v742_v60 }
  0x64   :  { %1530 = vmatpush3.msra.mxu0 %v742_v60 }
  0xa6   :  { %v439_v61 = vpop.permute.xlu0 %438 }
  0xa7   :  { %v449_v62 = vpop.permute.xlu1 %448  ;;  %v522_v4 = vmul.f32 %v1840_v2, %v439_v61 }
  0xa8   :  { %v524_v12 = vmul.f32 %v1840_v2, %v449_v62 }
  0xaa   :  { %v444_v63 = vpop.permute.xlu0 %443 }
  0xab   :  { %v454_v0 = vpop.permute.xlu1 %453  ;;  %v523_v15 = vmul.f32 %v1840_v2, %v444_v63 }
  0xac   :  { %v525_v19 = vmul.f32 %v1840_v2, %v454_v0 }
  0xae   :  { %v459_v1 = vpop.permute.xlu0 %458 }
  0xaf   :  { %v464_v5 = vpop.permute.xlu1 %463  ;;  %v526_v24 = vmul.f32 %v1840_v2, %v459_v1 }
  0xb0   :  { %v527_v33 = vmul.f32 %v1840_v2, %v464_v5 }
  0xb2   :  { %v469_v10 = vpop.permute.xlu0 %468 }
  0xb3   :  { %v474_v17 = vpop.permute.xlu1 %473  ;;  %v528_v35 = vmul.f32 %v1840_v2, %v469_v10 }
  0xb4   :  { %v529_v42 = vmul.f32 %v1840_v2, %v474_v17  ;;  %v741_v17 = vld [vmem:[#allocation7 + $0x18] sm:$0xff] }
  0xb5   :  { %1531 = vmatprep.subr.mxu0 %v741_v17 }
  0xb6   :  { %v479_v25 = vpop.permute.xlu0 %478  ;;  %1532 = vmatpush3.msra.mxu0 %v741_v17 }
  0xb7   :  { %v484_v30 = vpop.permute.xlu1 %483  ;;  %v530_v43 = vmul.f32 %v1840_v2, %v479_v25 }
  0xb8   :  { %v531_v51 = vmul.f32 %v1840_v2, %v484_v30 }
  0xba   :  { %v489_v37 = vpop.permute.xlu0 %488 }
  0xbb   :  { %v494_v45 = vpop.permute.xlu1 %493  ;;  %v532_v54 = vmul.f32 %v1840_v2, %v489_v37 }
  0xbc   :  { %v533_v61 = vmul.f32 %v1840_v2, %v494_v45 }
  0xbe   :  { %v499_v52 = vpop.permute.xlu0 %498 }
  0xbf   :  { %v504_v58 = vpop.permute.xlu1 %503  ;;  %v534_v62 = vmul.f32 %v1840_v2, %v499_v52 }
  0xc2   :  { %v509_v1 = vpop.permute.xlu0 %508 }
  0xc3   :  { %v536_v10 = vmul.f32 %v1840_v2, %v509_v1 }
 0x109   :  { %v1437_v3 = vpop.f32.mrf.mxu0 }
 0x10a   :  { %v405_v13 = vmul.f32 %v1437_v3, %v1846_v6 }
 0x10b   :  { %v282_v7 = vpop.f32.mrf.mxu0 }
 0x10c   :  { %v403_v8 = vmul.f32 %v1846_v6, %v282_v7  ;;  %v540_v22 = vadd.f32 %v524_v12, %v405_v13 }
 0x10d   :  { %v1438_v9 = vpop.f32.mrf.mxu0 }
 0x10e   :  { %v538_v11 = vadd.f32 %v522_v4, %v403_v8  ;;  %v406_v20 = vmul.f32 %v1438_v9, %v1846_v6  ;;  %v535_v8 = vmul.f32 %v1840_v2, %v504_v58 }
 0x10f   :  { %v285_v14 = vpop.f32.mrf.mxu0 }
 0x110   :  { %v404_v16 = vmul.f32 %v1846_v6, %v285_v14  ;;  %1483 = vmatprep.mubr.f32.mxu1 %v538_v11  ;;  %v541_v28 = vadd.f32 %v525_v19, %v406_v20  ;;  %v514_v11 = vpop.permute.xlu1 %513  ;;  %v739_v19 = vld [vmem:[#allocation7 + $0x8] sm:$0xff]  ;;  %v738_v20 = vld [vmem:[#allocation7] sm:$0xff] }
 0x111   :  { %v1441_v18 = vpop.f32.mrf.mxu0 }
 0x112   :  { %v539_v21 = vadd.f32 %v523_v15, %v404_v16  ;;  %v409_v31 = vmul.f32 %v1441_v18, %v1846_v6  ;;  %v537_v15 = vmul.f32 %v1840_v2, %v514_v11  ;;  %v740_v18 = vld [vmem:[#allocation7 + $0x10] sm:$0xff]  ;;  %v1248_v2 = vld [vmem:[%s1977_s6] ss:$0 sm:$0xff] }
 0x113   :  { %v298_v23 = vpop.f32.mrf.mxu0  ;;  %1533 = vmatprep.subr.mxu0 %v740_v18 }
 0x114   :  { %v407_v26 = vmul.f32 %v1846_v6, %v298_v23  ;;  %1484 = vmatmul.mubr.f32.vlgmr.msra.gmra.mxu1 %v539_v21  ;;  %v544_v40 = vadd.f32 %v528_v35, %v409_v31  ;;  %1534 = vmatpush3.msra.mxu0 %v740_v18 }
 0x115   :  { %v1442_v27 = vpop.f32.mrf.mxu0  ;;  %1486 = vmatprep.mubr.f32.mxu1 %v540_v22  ;;  %1535 = vmatprep.subr.mxu0 %v739_v19 }
 0x116   :  { %v542_v29 = vadd.f32 %v526_v24, %v407_v26  ;;  %v410_v38 = vmul.f32 %v1442_v27, %v1846_v6  ;;  %1536 = vmatpush3.msra.mxu0 %v739_v19 }
 0x117   :  { %v301_v32 = vpop.f32.mrf.mxu0  ;;  %1537 = vmatprep.subr.mxu0 %v738_v20 }
 0x118   :  { %v408_v34 = vmul.f32 %v1846_v6, %v301_v32  ;;  %1487 = vmatmul.mubr.f32.gmra.mxu1 %v541_v28  ;;  %v545_v47 = vadd.f32 %v529_v42, %v410_v38  ;;  %1538 = vmatpush3.msra.mxu0 %v738_v20 }
 0x119   :  { %v1445_v36 = vpop.f32.mrf.mxu0  ;;  %1489 = vmatprep.mubr.f32.mxu1 %v542_v29 }
 0x11a   :  { %v543_v39 = vadd.f32 %v527_v33, %v408_v34  ;;  %v413_v49 = vmul.f32 %v1445_v36, %v1846_v6 }
 0x11b   :  { %v314_v41 = vpop.f32.mrf.mxu0 }
 0x11c   :  { %v411_v44 = vmul.f32 %v1846_v6, %v314_v41  ;;  %1490 = vmatmul.mubr.f32.gmra.mxu1 %v543_v39  ;;  %v548_v59 = vadd.f32 %v532_v54, %v413_v49 }
 0x11d   :  { %v1446_v46 = vpop.f32.mrf.mxu0  ;;  %1492 = vmatprep.mubr.f32.mxu1 %v544_v40 }
 0x11e   :  { %v546_v48 = vadd.f32 %v530_v43, %v411_v44  ;;  %v414_v56 = vmul.f32 %v1446_v46, %v1846_v6 }
 0x11f   :  { %v317_v50 = vpop.f32.mrf.mxu0 }
 0x120   :  { %v412_v53 = vmul.f32 %v1846_v6, %v317_v50  ;;  %1493 = vmatmul.mubr.f32.gmra.mxu1 %v545_v47  ;;  %v549_v3 = vadd.f32 %v533_v61, %v414_v56 }
 0x121   :  { %v1449_v55 = vpop.f32.mrf.mxu0  ;;  %1495 = vmatprep.mubr.f32.mxu1 %v546_v48 }
 0x122   :  { %v547_v57 = vadd.f32 %v531_v51, %v412_v53  ;;  %v417_v5 = vmul.f32 %v1449_v55, %v1846_v6 }
 0x123   :  { %v330_v60 = vpop.f32.mrf.mxu0 }
 0x124   :  { %v415_v63 = vmul.f32 %v1846_v6, %v330_v60  ;;  %1496 = vmatmul.mubr.f32.gmra.mxu1 %v547_v57  ;;  %v552_v14 = vadd.f32 %v536_v10, %v417_v5  ;;  %v1684_v5 = vmov 0.0  }
 0x125   :  { %v1450_v0 = vpop.f32.mrf.mxu0  ;;  %1498 = vmatprep.mubr.f32.mxu1 %v548_v59  ;;  %1563 = vmatprep.subr.bf16.mxu1 %v1684_v5 }
 0x126   :  { %v550_v4 = vadd.f32 %v534_v62, %v415_v63  ;;  %v418_v12 = vmul.f32 %v1450_v0, %v1846_v6 }
 0x127   :  { %v333_v7 = vpop.f32.mrf.mxu0 }
 0x128   :  { %v416_v9 = vmul.f32 %v1846_v6, %v333_v7  ;;  %1499 = vmatmul.mubr.f32.gmra.mxu1 %v549_v3  ;;  %v553_v16 = vadd.f32 %v537_v15, %v418_v12  ;;  %v1887_v7 = vld [vmem:[%s1979_s8] ss:$0 sm:$0xff] }
 0x129   :  { %1501 = vmatprep.mubr.f32.mxu1 %v550_v4 }
 0x12a   :  { %v551_v13 = vadd.f32 %v535_v8, %v416_v9 }
 0x12c   :  { %1502 = vmatmul.mubr.f32.gmra.mxu1 %v551_v13 }
 0x12d   :  { %1504 = vmatprep.mubr.f32.mxu1 %v552_v14 }
 0x130   :  { %1505 = vmatmul.mubr.f32.gmra.mxu1 %v553_v16 }
 0x131   :  { %1579 = vmatprep.mubr.msk.bf16.mxu1 %vm1685_vm0, %v1684_v5 }
 0x1d4   :  { %v1485_v6 = vpop.f32.mrf.mxu1 }
 0x1d5   :  { %v649_v21 = vadd.f32 %v1485_v6, %v1248_v2 }
 0x1d6   :  { %v643_v22 = vpop.f32.mrf.mxu1 }
 0x1d7   :  { %v644_v23 = vadd.f32 %v1248_v2, %v643_v22  ;;  %v723_v26 = vmax.f32 %v649_v21, 0.0 }
 0x1d8   :  { %v1488_v24 = vpop.f32.mrf.mxu1 }
 0x1d9   :  { %v722_v25 = vmax.f32 %v644_v23, 0.0  ;;  %v659_v27 = vadd.f32 %v1488_v24, %v1248_v2 }
 0x1da   :  { %v653_v28 = vpop.f32.mrf.mxu1 }
 0x1db   :  { %v654_v29 = vadd.f32 %v1248_v2, %v653_v28  ;;  %1539 = vmatprep.mubr.f32.mxu0 %v722_v25  ;;  %v725_v32 = vmax.f32 %v659_v27, 0.0 }
 0x1dc   :  { %v1491_v30 = vpop.f32.mrf.mxu1  ;;  %1540 = vmatmul.mubr.f32.vlgmr.msra.gmra.mxu0 %v723_v26 }
 0x1dd   :  { %v724_v31 = vmax.f32 %v654_v29, 0.0  ;;  %v669_v33 = vadd.f32 %v1491_v30, %v1248_v2 }
 0x1de   :  { %v663_v34 = vpop.f32.mrf.mxu1 }
 0x1df   :  { %v664_v35 = vadd.f32 %v1248_v2, %v663_v34  ;;  %1542 = vmatprep.mubr.f32.mxu0 %v724_v31  ;;  %v727_v38 = vmax.f32 %v669_v33, 0.0 }
 0x1e0   :  { %v1494_v36 = vpop.f32.mrf.mxu1  ;;  %1543 = vmatmul.mubr.f32.gmra.mxu0 %v725_v32 }
 0x1e1   :  { %v726_v37 = vmax.f32 %v664_v35, 0.0  ;;  %v679_v39 = vadd.f32 %v1494_v36, %v1248_v2 }
 0x1e2   :  { %v673_v40 = vpop.f32.mrf.mxu1 }
 0x1e3   :  { %v674_v41 = vadd.f32 %v1248_v2, %v673_v40  ;;  %1545 = vmatprep.mubr.f32.mxu0 %v726_v37  ;;  %v729_v44 = vmax.f32 %v679_v39, 0.0 }
 0x1e4   :  { %v1497_v42 = vpop.f32.mrf.mxu1  ;;  %1546 = vmatmul.mubr.f32.gmra.mxu0 %v727_v38 }
 0x1e5   :  { %v728_v43 = vmax.f32 %v674_v41, 0.0  ;;  %v689_v45 = vadd.f32 %v1497_v42, %v1248_v2 }
 0x1e6   :  { %v683_v46 = vpop.f32.mrf.mxu1 }
 0x1e7   :  { %v684_v47 = vadd.f32 %v1248_v2, %v683_v46  ;;  %1548 = vmatprep.mubr.f32.mxu0 %v728_v43  ;;  %v731_v50 = vmax.f32 %v689_v45, 0.0 }
 0x1e8   :  { %v1500_v48 = vpop.f32.mrf.mxu1  ;;  %1549 = vmatmul.mubr.f32.gmra.mxu0 %v729_v44 }
 0x1e9   :  { %v730_v49 = vmax.f32 %v684_v47, 0.0  ;;  %v699_v51 = vadd.f32 %v1500_v48, %v1248_v2 }
 0x1ea   :  { %v693_v52 = vpop.f32.mrf.mxu1 }
 0x1eb   :  { %v694_v53 = vadd.f32 %v1248_v2, %v693_v52  ;;  %1551 = vmatprep.mubr.f32.mxu0 %v730_v49  ;;  %v733_v56 = vmax.f32 %v699_v51, 0.0 }
 0x1ec   :  { %v1503_v54 = vpop.f32.mrf.mxu1  ;;  %1552 = vmatmul.mubr.f32.gmra.mxu0 %v731_v50 }
 0x1ed   :  { %v732_v55 = vmax.f32 %v694_v53, 0.0  ;;  %v709_v57 = vadd.f32 %v1503_v54, %v1248_v2 }
 0x1ee   :  { %v703_v58 = vpop.f32.mrf.mxu1 }
 0x1ef   :  { %v704_v59 = vadd.f32 %v1248_v2, %v703_v58  ;;  %1554 = vmatprep.mubr.f32.mxu0 %v732_v55  ;;  %v735_v62 = vmax.f32 %v709_v57, 0.0 }
 0x1f0   :  { %v1506_v60 = vpop.f32.mrf.mxu1  ;;  %1555 = vmatmul.mubr.f32.gmra.mxu0 %v733_v56 }
 0x1f1   :  { %v734_v61 = vmax.f32 %v704_v59, 0.0  ;;  %v719_v63 = vadd.f32 %v1506_v60, %v1248_v2 }
 0x1f2   :  { %v713_v0 = vpop.f32.mrf.mxu1 }
 0x1f3   :  { %v714_v1 = vadd.f32 %v1248_v2, %v713_v0  ;;  %1557 = vmatprep.mubr.f32.mxu0 %v734_v61  ;;  %v737_v4 = vmax.f32 %v719_v63, 0.0 }
 0x1f4   :  { %1558 = vmatmul.mubr.f32.gmra.mxu0 %v735_v62 }
 0x1f5   :  { %v736_v3 = vmax.f32 %v714_v1, 0.0 }
 0x1f7   :  { %1560 = vmatprep.mubr.f32.mxu0 %v736_v3 }
 0x1f8   :  { %1561 = vmatmul.mubr.f32.gmra.mxu0 %v737_v4 }
 0x29c   :  { %v1541_v8 = vpop.f32.mrf.mxu0 }
 0x29d   :  { %v833_v9 = vadd.f32 %v1541_v8, %v1887_v7 }
 0x29e   :  { %v827_v10 = vpop.f32.mrf.mxu0 }
 0x29f   :  { %v828_v11 = vadd.f32 %v1887_v7, %v827_v10  ;;  %v907_v13 = vmax.f32 %v833_v9, 0.0 }
 0x2a0   :  { %v1544_v12 = vpop.f32.mrf.mxu0 }
 0x2a1   :  { %v906_v14 = vmax.f32 %v828_v11, 0.0  ;;  %v843_v15 = vadd.f32 %v1544_v12, %v1887_v7  ;;  %v1124_v23 = vmul.f32 %v907_v13, %v907_v13 }
 0x2a2   :  { %v837_v16 = vpop.f32.mrf.mxu0 }
 0x2a3   :  { %v1892_v17 = vpack.c.bf16 %v907_v13, %v906_v14  ;;  %v909_v18 = vmax.f32 %v843_v15, 0.0  ;;  %v838_v19 = vadd.f32 %v1887_v7, %v837_v16  ;;  %v1123_v6 = vmul.f32 %v906_v14, %v906_v14 }
 0x2a4   :  { %v1547_v20 = vpop.f32.mrf.mxu0  ;;  %v1101_v26 = vadd.f32 %v907_v13, %v906_v14 }
 0x2a5   :  { %1287 = vst [vmem:[%s1981_s10] sm:$0xff] %v1892_v17   ;;  %v853_v2 = vadd.f32 %v1547_v20, %v1887_v7  ;;  %v908_v21 = vmax.f32 %v838_v19, 0.0  ;;  %v1088_v27 = vmul.f32 0.0, %v909_v18  ;;  %v1139_v33 = vadd.f32 %v1124_v23, %v1123_v6 }
 0x2a6   :  { %v847_v22 = vpop.f32.mrf.mxu0 }
 0x2a7   :  { %v911_v24 = vmax.f32 %v853_v2, 0.0  ;;  %v848_v25 = vadd.f32 %v1887_v7, %v847_v22  ;;  %v1901_v28 = vpack.c.bf16 %v909_v18, %v908_v21  ;;  %v1087_v29 = vmul.f32 0.0, %v908_v21 }
 0x2a8   :  { %v1550_v30 = vpop.f32.mrf.mxu0  ;;  %v1126_v41 = vmul.f32 %v1088_v27, %v1088_v27 }
 0x2a9   :  { %v910_v31 = vmax.f32 %v848_v25, 0.0  ;;  %v863_v32 = vadd.f32 %v1550_v30, %v1887_v7  ;;  %1323 = vst [vmem:[%s1981_s10 + $0x8] sm:$0xff] %v1901_v28   ;;  %v1102_v34 = vadd.f32 %v1101_v26, %v1087_v29  ;;  %v1125_v35 = vmul.f32 %v1087_v29, %v1087_v29 }
 0x2aa   :  { %v857_v36 = vpop.f32.mrf.mxu0  ;;  %v1090_v37 = vmul.f32 0.0, %v911_v24 }
 0x2ab   :  { %v1908_v38 = vpack.c.bf16 %v911_v24, %v910_v31  ;;  %v1089_v39 = vmul.f32 0.0, %v910_v31  ;;  %v913_v40 = vmax.f32 %v863_v32, 0.0  ;;  %v1140_v42 = vadd.f32 %v1139_v33, %v1125_v35 }
 0x2ac   :  { %v1103_v43 = vadd.f32 %v1102_v34, %v1088_v27  ;;  %v858_v44 = vadd.f32 %v1887_v7, %v857_v36  ;;  %v1553_v45 = vpop.f32.mrf.mxu0  ;;  %v1128_v52 = vmul.f32 %v1090_v37, %v1090_v37 }
 0x2ad   :  { %1324 = vst [vmem:[%s1981_s10 + $0x10] sm:$0xff] %v1908_v38   ;;  %v1127_v46 = vmul.f32 %v1089_v39, %v1089_v39  ;;  %v873_v47 = vadd.f32 %v1553_v45, %v1887_v7  ;;  %v1141_v49 = vadd.f32 %v1140_v42, %v1126_v41  ;;  %v1092_v53 = vmul.f32 0.0, %v913_v40 }
 0x2ae   :  { %v1104_v48 = vadd.f32 %v1103_v43, %v1089_v39  ;;  %v912_v50 = vmax.f32 %v858_v44, 0.0  ;;  %v867_v51 = vpop.f32.mrf.mxu0 }
 0x2af   :  { %v915_v54 = vmax.f32 %v873_v47, 0.0  ;;  %v868_v55 = vadd.f32 %v1887_v7, %v867_v51  ;;  %v1142_v56 = vadd.f32 %v1141_v49, %v1127_v46  ;;  %v1130_v11 = vmul.f32 %v1092_v53, %v1092_v53 }
 0x2b0   :  { %v1917_v57 = vpack.c.bf16 %v913_v40, %v912_v50  ;;  %v1091_v58 = vmul.f32 0.0, %v912_v50  ;;  %v1105_v59 = vadd.f32 %v1104_v48, %v1090_v37  ;;  %v1556_v60 = vpop.f32.mrf.mxu0 }
 0x2b1   :  { %v914_v61 = vmax.f32 %v868_v55, 0.0  ;;  %v883_v62 = vadd.f32 %v1556_v60, %v1887_v7  ;;  %v1143_v1 = vadd.f32 %v1142_v56, %v1128_v52  ;;  %v1094_v4 = vmul.f32 0.0, %v915_v54 }
 0x2b2   :  { %1325 = vst [vmem:[%s1981_s10 + $0x18] sm:$0xff] %v1917_v57   ;;  %v1106_v63 = vadd.f32 %v1105_v59, %v1091_v58  ;;  %v1129_v0 = vmul.f32 %v1091_v58, %v1091_v58  ;;  %v877_v3 = vpop.f32.mrf.mxu0 }
 0x2b3   :  { %v1924_v8 = vpack.c.bf16 %v915_v54, %v914_v61  ;;  %v1093_v9 = vmul.f32 0.0, %v914_v61  ;;  %v917_v10 = vmax.f32 %v883_v62, 0.0  ;;  %v878_v14 = vadd.f32 %v1887_v7, %v877_v3 }
 0x2b4   :  { %v1144_v12 = vadd.f32 %v1143_v1, %v1129_v0  ;;  %v1107_v13 = vadd.f32 %v1106_v63, %v1092_v53  ;;  %v1559_v15 = vpop.f32.mrf.mxu0  ;;  %v1132_v21 = vmul.f32 %v1094_v4, %v1094_v4 }
 0x2b5   :  { %1326 = vst [vmem:[%s1981_s10 + $0x20] sm:$0xff] %v1924_v8   ;;  %v1131_v16 = vmul.f32 %v1093_v9, %v1093_v9  ;;  %v893_v18 = vadd.f32 %v1559_v15, %v1887_v7  ;;  %v916_v2 = vmax.f32 %v878_v14, 0.0  ;;  %v1096_v22 = vmul.f32 0.0, %v917_v10 }
 0x2b6   :  { %v1108_v19 = vadd.f32 %v1107_v13, %v1093_v9  ;;  %v1145_v20 = vadd.f32 %v1144_v12, %v1130_v11  ;;  %v887_v6 = vpop.f32.mrf.mxu0 }
 0x2b7   :  { %v919_v23 = vmax.f32 %v893_v18, 0.0  ;;  %v888_v24 = vadd.f32 %v1887_v7, %v887_v6  ;;  %v927_v26 = vpack.c.bf16 %v917_v10, %v916_v2  ;;  %v1095_v27 = vmul.f32 0.0, %v916_v2 }
 0x2b8   :  { %v1146_v25 = vadd.f32 %v1145_v20, %v1131_v16  ;;  %v1109_v29 = vadd.f32 %v1108_v19, %v1094_v4  ;;  %v1562_v30 = vpop.f32.mrf.mxu0  ;;  %v1134_v42 = vmul.f32 %v1096_v22, %v1096_v22 }
 0x2b9   :  { %v918_v31 = vmax.f32 %v888_v24, 0.0  ;;  %v903_v32 = vadd.f32 %v1562_v30, %v1887_v7  ;;  %1327 = vst [vmem:[%s1981_s10 + $0x28] sm:$0xff] %v927_v26   ;;  %v1133_v34 = vmul.f32 %v1095_v27, %v1095_v27  ;;  %v1098_v37 = vmul.f32 0.0, %v919_v23 }
 0x2ba   :  { %v1110_v33 = vadd.f32 %v1109_v29, %v1095_v27  ;;  %v1147_v35 = vadd.f32 %v1146_v25, %v1132_v21  ;;  %v897_v36 = vpop.f32.mrf.mxu0 }
 0x2bb   :  { %v928_v39 = vpack.c.bf16 %v919_v23, %v918_v31  ;;  %v1097_v40 = vmul.f32 0.0, %v918_v31  ;;  %v921_v41 = vmax.f32 %v903_v32, 0.0  ;;  %v898_v45 = vadd.f32 %v1887_v7, %v897_v36 }
 0x2bc   :  { %v1148_v43 = vadd.f32 %v1147_v35, %v1133_v34  ;;  %v1111_v44 = vadd.f32 %v1110_v33, %v1096_v22  ;;  %v1136_v50 = vmul.f32 %v1098_v37, %v1098_v37 }
 0x2bd   :  { %1328 = vst [vmem:[%s1981_s10 + $0x30] sm:$0xff] %v928_v39   ;;  %v1135_v46 = vmul.f32 %v1097_v40, %v1097_v40  ;;  %v920_v49 = vmax.f32 %v898_v45, 0.0  ;;  %v1100_v51 = vmul.f32 0.0, %v921_v41 }
 0x2be   :  { %v1112_v47 = vadd.f32 %v1111_v44, %v1097_v40  ;;  %v1149_v48 = vadd.f32 %v1148_v43, %v1134_v42 }
 0x2bf   :  { %v929_v53 = vpack.c.bf16 %v921_v41, %v920_v49  ;;  %v1099_v54 = vmul.f32 0.0, %v920_v49  ;;  %v1138_v59 = vmul.f32 %v1100_v51, %v1100_v51 }
 0x2c0   :  { %v1150_v52 = vadd.f32 %v1149_v48, %v1135_v46  ;;  %v1113_v55 = vadd.f32 %v1112_v47, %v1098_v37 }
 0x2c1   :  { %1329 = vst [vmem:[%s1981_s10 + $0x38] sm:$0xff] %v929_v53   ;;  %v1137_v7 = vmul.f32 %v1099_v54, %v1099_v54  ;;  %1564 = vmatpush3.bf16.msra.mxu1 %v929_v53 }
 0x2c2   :  { %v1114_v56 = vadd.f32 %v1113_v55, %v1099_v54  ;;  %v1151_v58 = vadd.f32 %v1150_v52, %v1136_v50  ;;  %1565 = vmatprep.subr.bf16.mxu1 %v1684_v5 }
 0x2c4   :  { %v1115_v60 = vadd.f32 %v1114_v56, %v1100_v51  ;;  %v1152_v61 = vadd.f32 %v1151_v58, %v1137_v7 }
 0x2c5   :  { %1566 = vmatpush3.bf16.msra.mxu1 %v928_v39 }
 0x2c6   :  { %v1116_v62 = vrot.slane %v1115_v60, 4  ;;  %v1153_v63 = vadd.f32 %v1152_v61, %v1138_v59  ;;  %1567 = vmatprep.subr.bf16.mxu1 %v1684_v5 }
 0x2c8   :  { %v1117_v0 = vadd.f32 %v1116_v62, %v1115_v60  ;;  %v1154_v1 = vrot.slane %v1153_v63, 4 }
 0x2c9   :  { %1568 = vmatpush3.bf16.msra.mxu1 %v927_v26 }
 0x2ca   :  { %v1118_v3 = vrot.slane %v1117_v0, 2  ;;  %v1155_v4 = vadd.f32 %v1154_v1, %v1153_v63  ;;  %1569 = vmatprep.subr.bf16.mxu1 %v1684_v5 }
 0x2cc   :  { %v1119_v9 = vadd.f32 %v1118_v3, %v1117_v0  ;;  %v1156_v10 = vrot.slane %v1155_v4, 2 }
 0x2cd   :  { %1570 = vmatpush3.bf16.msra.mxu1 %v1924_v8  ;;  %v1611_v8 = vld [vmem:[%s1980_s9] sm:$0xff]  }
 0x2ce   :  { %v1120_v11 = vrot.slane %v1119_v9, 1  ;;  %v1157_v12 = vadd.f32 %v1156_v10, %v1155_v4  ;;  %1571 = vmatprep.subr.bf16.mxu1 %v1684_v5 }
 0x2d0   :  { %v1121_v13 = vadd.f32 %v1120_v11, %v1119_v9  ;;  %v1158_v14 = vrot.slane %v1157_v12, 1 }
 0x2d1   :  { %1572 = vmatpush3.bf16.msra.mxu1 %v1917_v57 }
 0x2d2   :  { %1122 = vst [vmem:[%s1982_s11] sm:$0x1] %v1121_v13  ;;  %v1159_v15 = vadd.f32 %v1158_v14, %v1157_v12  ;;  %1573 = vmatprep.subr.bf16.mxu1 %v1684_v5 }
 0x2d4   :  { %1160 = vst [vmem:[%s1983_s12] sm:$0x1] %v1159_v15 }
 0x2d5   :  { %1574 = vmatpush3.bf16.msra.mxu1 %v1908_v38 }
 0x2d6   :  { %1575 = vmatprep.subr.bf16.mxu1 %v1684_v5 }
 0x2d9   :  { %1576 = vmatpush3.bf16.msra.mxu1 %v1901_v28 }
 0x2da   :  { %1577 = vmatprep.subr.bf16.mxu1 %v1684_v5 }
 0x2dd   :  { %1578 = vmatpush3.bf16.msra.mxu1 %v1892_v17 }
 0x2e0   :  { %1580 = vmatmul.mubr.bf16.vlgmr.msra.gmra.mxu1 %v1611_v8 }
 0x3a0   :  { %v1203_v57 = vpop.f32.mrf.mxu1 }
 0x3a1   :  { %1210 = vst [vmem:[%s1984_s13] sm:$0xff] %v1203_v57 }
 0x3a2   :  { %v1581_v16 = vpop.f32.mrf.mxu1 }
 0x3a4   :  { %v1206_v38 = vpop.f32.mrf.mxu1 }
 0x3a5   :  { %1211 = vst [vmem:[%s1984_s13 + $0x8] sm:$0xff] %v1206_v38 }
 0x3a6   :  { %v1582_v28 = vpop.f32.mrf.mxu1 }
 0x3a7   :  { %1228 = vsyncpa [#allocation4], 1 }
 0x3a8   :  { %1229 = vsyncpa [#allocation6], 1 }

// kernel: encoder_forward.4
= control target key start
LH: loop header
LB: loop body
LE: loop exit
PB: predicated region body
PF: predicated region fallthrough
CT: control target
= control target key end

     0   :  { %v1562_v1 = vmov 0   ;;  %vm1564_vm0 = vmmov 0   ;;  %s1961_s1 = inlined_call_operand.vmem [shape: bf16[1,128,128], index: 1, kind: input, shape index: {}]   ;;  %s1962_s0 = inlined_call_operand.vmem [shape: bf16[128,128], index: 0, kind: input, shape index: {}]   ;;  %s1963_s2 = inlined_call_operand.vmem [shape: f32[128,1], index: 2, kind: input, shape index: {}]   ;;  %s1964_s5 = inlined_call_operand.vmem [shape: f32[128,128], index: 5, kind: input, shape index: {}]   ;;  %s1965_s7 = inlined_call_operand.vmem [shape: f32[128,128], index: 7, kind: input, shape index: {}]   ;;  %s1966_s4 = inlined_call_operand.vmem [shape: f32[1,128], index: 4, kind: input, shape index: {}]   ;;  %s1967_s3 = inlined_call_operand.vmem [shape: f32[1,128], index: 3, kind: input, shape index: {}]   ;;  %s1968_s6 = inlined_call_operand.vmem [shape: f32[1,128], index: 6, kind: input, shape index: {}]   ;;  %s1969_s9 = inlined_call_operand.vmem [shape: bf16[16,128], index: 9, kind: input, shape index: {}]   ;;  %s1970_s8 = inlined_call_operand.vmem [shape: f32[1,128], index: 8, kind: input, shape index: {}]   ;;  %s1971_s10 = inlined_call_operand.vmem [shape: bf16[1,128,128], index: 10, kind: output, shape index: {0}]   ;;  %s1972_s11 = inlined_call_operand.vmem [shape: f32[1,1,128], index: 11, kind: output, shape index: {1}]   ;;  %s1973_s12 = inlined_call_operand.vmem [shape: f32[1,1,128], index: 12, kind: output, shape index: {2}]   ;;  %s1974_s13 = inlined_call_operand.vmem [shape: f32[1,16,128], index: 13, kind: output, shape index: {3}]  }
   0x1   :  { %v1545_v0 = vld [vmem:[%s1961_s1 + $0x38] sm:$0xff]   ;;  %1543 = vset.pattern.permute.xlu0 %v1562_v1  ;;  %1544 = vset.pattern.permute.xlu1 %v1562_v1  ;;  %v1546_v2 = vld [vmem:[%s1961_s1 + $0x30] sm:$0xff]   ;;  %v1547_v3 = vld [vmem:[%s1961_s1 + $0x28] sm:$0xff]  }
   0x2   :  { %1376 = vmatprep.subr.bf16.mxu0 %v1545_v0  ;;  %v1548_v4 = vld [vmem:[%s1961_s1 + $0x20] sm:$0xff]   ;;  %v1549_v6 = vld [vmem:[%s1961_s1 + $0x18] sm:$0xff]   ;;  %v1550_v7 = vld [vmem:[%s1961_s1 + $0x10] sm:$0xff]  }
   0x3   :  { %1377 = vmatpush3.bf16.msra.mxu0 %v1545_v0  ;;  %v1553_v5 = vld [vmem:[%s1962_s0] sm:$0xff]   ;;  %v380_v9 = vld [vmem:[%s1963_s2 + $0x10] sm:$0xff]  ;;  %v379_v10 = vld [vmem:[%s1963_s2 + $0x8] sm:$0xff] }
   0x4   :  { %1378 = vmatprep.subr.bf16.mxu0 %v1546_v2  ;;  %1392 = vmatprep.mubr.bf16.mxu0 %v1553_v5  ;;  %v378_v8 = vld [vmem:[%s1963_s2] sm:$0xff]  ;;  %v381_v11 = vld [vmem:[%s1963_s2 + $0x18] sm:$0xff]  ;;  %v1551_v12 = vld [vmem:[%s1961_s1 + $0x8] sm:$0xff]  }
   0x5   :  { %397 = vperm.xlu0 %1543, %v378_v8   ;;  %407 = vperm.xlu1 %1544, %v380_v9   ;;  %v528_v13 = vld [vmem:[%s1964_s5 + $0x78] sm:$0xff]  ;;  %v382_v14 = vld [vmem:[%s1963_s2 + $0x20] sm:$0xff]  ;;  %v383_v15 = vld [vmem:[%s1963_s2 + $0x28] sm:$0xff] }
   0x6   :  { %1408 = vmatprep.subr.mxu1 %v528_v13  ;;  %v527_v16 = vld [vmem:[%s1964_s5 + $0x70] sm:$0xff]  ;;  %v1552_v17 = vld [vmem:[%s1961_s1] sm:$0xff]   ;;  %v526_v18 = vld [vmem:[%s1964_s5 + $0x68] sm:$0xff] }
   0x7   :  { %1379 = vmatpush3.bf16.msra.mxu0 %v1546_v2  ;;  %1409 = vmatpush3.msra.mxu1 %v528_v13  ;;  %v384_v19 = vld [vmem:[%s1963_s2 + $0x30] sm:$0xff]  ;;  %v385_v20 = vld [vmem:[%s1963_s2 + $0x38] sm:$0xff]  ;;  %v525_v21 = vld [vmem:[%s1964_s5 + $0x60] sm:$0xff] }
   0x8   :  { %1380 = vmatprep.subr.bf16.mxu0 %v1547_v3  ;;  %1410 = vmatprep.subr.mxu1 %v527_v16  ;;  %v524_v22 = vld [vmem:[%s1964_s5 + $0x58] sm:$0xff]  ;;  %v1554_v23 = vld [vmem:[%s1962_s0 + $0x8] sm:$0xff]   ;;  %v386_v24 = vld [vmem:[%s1963_s2 + $0x40] sm:$0xff] }
   0x9   :  { %402 = vperm.xlu0 %1543, %v379_v10   ;;  %412 = vperm.xlu1 %1544, %v381_v11   ;;  %v387_v25 = vld [vmem:[%s1963_s2 + $0x48] sm:$0xff]  ;;  %v1555_v26 = vld [vmem:[%s1962_s0 + $0x10] sm:$0xff]   ;;  %v389_v29 = vld [vmem:[%s1963_s2 + $0x58] sm:$0xff] }
   0xa   :  { %1411 = vmatpush3.msra.mxu1 %v527_v16  ;;  %v523_v27 = vld [vmem:[%s1964_s5 + $0x50] sm:$0xff]  ;;  %v522_v30 = vld [vmem:[%s1964_s5 + $0x48] sm:$0xff]  ;;  %v521_v31 = vld [vmem:[%s1964_s5 + $0x40] sm:$0xff] }
   0xb   :  { %1381 = vmatpush3.bf16.msra.mxu0 %v1547_v3  ;;  %1412 = vmatprep.subr.mxu1 %v526_v18  ;;  %v388_v28 = vld [vmem:[%s1963_s2 + $0x50] sm:$0xff]  ;;  %v1556_v32 = vld [vmem:[%s1962_s0 + $0x18] sm:$0xff]   ;;  %v390_v33 = vld [vmem:[%s1963_s2 + $0x60] sm:$0xff] }
   0xc   :  { %1382 = vmatprep.subr.bf16.mxu0 %v1548_v4  ;;  %1413 = vmatpush3.msra.mxu1 %v526_v18  ;;  %v391_v34 = vld [vmem:[%s1963_s2 + $0x68] sm:$0xff]  ;;  %v1557_v35 = vld [vmem:[%s1962_s0 + $0x20] sm:$0xff]   ;;  %v520_v36 = vld [vmem:[%s1964_s5 + $0x38] sm:$0xff] }
   0xd   :  { %417 = vperm.xlu0 %1543, %v382_v14   ;;  %422 = vperm.xlu1 %1544, %v383_v15   ;;  %v392_v37 = vld [vmem:[%s1963_s2 + $0x70] sm:$0xff]  ;;  %v393_v38 = vld [vmem:[%s1963_s2 + $0x78] sm:$0xff]  ;;  %v518_v40 = vld [vmem:[%s1964_s5 + $0x28] sm:$0xff] }
   0xe   :  { %1414 = vmatprep.subr.mxu1 %v525_v21  ;;  %v519_v39 = vld [vmem:[%s1964_s5 + $0x30] sm:$0xff]  ;;  %v1558_v41 = vld [vmem:[%s1962_s0 + $0x28] sm:$0xff]   ;;  %v1560_v43 = vld [vmem:[%s1962_s0 + $0x38] sm:$0xff]  }
   0xf   :  { %1383 = vmatpush3.bf16.msra.mxu0 %v1548_v4  ;;  %1415 = vmatpush3.msra.mxu1 %v525_v21  ;;  %v1559_v42 = vld [vmem:[%s1962_s0 + $0x30] sm:$0xff]   ;;  %v517_v44 = vld [vmem:[%s1964_s5 + $0x20] sm:$0xff]  ;;  %v516_v45 = vld [vmem:[%s1964_s5 + $0x18] sm:$0xff] }
  0x10   :  { %1384 = vmatprep.subr.bf16.mxu0 %v1549_v6  ;;  %1416 = vmatprep.subr.mxu1 %v524_v22  ;;  %v515_v46 = vld [vmem:[%s1964_s5 + $0x10] sm:$0xff]  ;;  %v514_v47 = vld [vmem:[%s1964_s5 + $0x8] sm:$0xff]  ;;  %v513_v48 = vld [vmem:[%s1964_s5] sm:$0xff] }
  0x11   :  { %427 = vperm.xlu0 %1543, %v384_v19   ;;  %432 = vperm.xlu1 %1544, %v385_v20   ;;  %v712_v49 = vld [vmem:[%s1965_s7 + $0x78] sm:$0xff]  ;;  %v711_v50 = vld [vmem:[%s1965_s7 + $0x70] sm:$0xff]  ;;  %v710_v51 = vld [vmem:[%s1965_s7 + $0x68] sm:$0xff] }
  0x12   :  { %1417 = vmatpush3.msra.mxu1 %v524_v22  ;;  %v709_v52 = vld [vmem:[%s1965_s7 + $0x60] sm:$0xff]  ;;  %v708_v53 = vld [vmem:[%s1965_s7 + $0x58] sm:$0xff]  ;;  %v707_v54 = vld [vmem:[%s1965_s7 + $0x50] sm:$0xff] }
  0x13   :  { %1385 = vmatpush3.bf16.msra.mxu0 %v1549_v6  ;;  %1418 = vmatprep.subr.mxu1 %v523_v27  ;;  %v706_v55 = vld [vmem:[%s1965_s7 + $0x48] sm:$0xff]  ;;  %v705_v56 = vld [vmem:[%s1965_s7 + $0x40] sm:$0xff]  ;;  %v704_v57 = vld [vmem:[%s1965_s7 + $0x38] sm:$0xff] }
  0x14   :  { %1386 = vmatprep.subr.bf16.mxu0 %v1550_v7  ;;  %1419 = vmatpush3.msra.mxu1 %v523_v27  ;;  %v703_v58 = vld [vmem:[%s1965_s7 + $0x30] sm:$0xff]  ;;  %v702_v59 = vld [vmem:[%s1965_s7 + $0x28] sm:$0xff]  ;;  %v701_v60 = vld [vmem:[%s1965_s7 + $0x20] sm:$0xff] }
  0x15   :  { %437 = vperm.xlu0 %1543, %v386_v24   ;;  %442 = vperm.xlu1 %1544, %v387_v25   ;;  %v1818_v2 = vld [vmem:[%s1966_s4] ss:$0 sm:$0xff] }
  0x16   :  { %1420 = vmatprep.subr.mxu1 %v522_v30  ;;  %v1824_v6 = vld [vmem:[%s1967_s3] ss:$0 sm:$0xff] }
  0x17   :  { %1387 = vmatpush3.bf16.msra.mxu0 %v1550_v7  ;;  %1421 = vmatpush3.msra.mxu1 %v522_v30 }
  0x18   :  { %1388 = vmatprep.subr.bf16.mxu0 %v1551_v12  ;;  %1422 = vmatprep.subr.mxu1 %v521_v31 }
  0x19   :  { %447 = vperm.xlu0 %1543, %v388_v28   ;;  %452 = vperm.xlu1 %1544, %v389_v29  }
  0x1a   :  { %1423 = vmatpush3.msra.mxu1 %v521_v31 }
  0x1b   :  { %1389 = vmatpush3.bf16.msra.mxu0 %v1551_v12  ;;  %1424 = vmatprep.subr.mxu1 %v520_v36 }
  0x1c   :  { %1390 = vmatprep.subr.bf16.mxu0 %v1552_v17  ;;  %1425 = vmatpush3.msra.mxu1 %v520_v36 }
  0x1d   :  { %457 = vperm.xlu0 %1543, %v390_v33   ;;  %462 = vperm.xlu1 %1544, %v391_v34  }
  0x1e   :  { %1426 = vmatprep.subr.mxu1 %v519_v39 }
  0x1f   :  { %1391 = vmatpush3.bf16.msra.mxu0 %v1552_v17  ;;  %1427 = vmatpush3.msra.mxu1 %v519_v39 }
  0x20   :  { %1428 = vmatprep.subr.mxu1 %v518_v40  ;;  %1464 = vmatprep.subr.mxu0 %v712_v49 }
  0x21   :  { %467 = vperm.xlu0 %1543, %v392_v37   ;;  %472 = vperm.xlu1 %1544, %v393_v38  }
  0x22   :  { %1393 = vmatmul.mubr.bf16.vlgmr.msra.gmra.mxu0 %v1554_v23  ;;  %1429 = vmatpush3.msra.mxu1 %v518_v40 }
  0x23   :  { %1396 = vmatprep.mubr.bf16.mxu0 %v1555_v26  ;;  %1430 = vmatprep.subr.mxu1 %v517_v44 }
  0x24   :  { %1431 = vmatpush3.msra.mxu1 %v517_v44  ;;  %1465 = vmatpush3.msra.mxu0 %v712_v49 }
  0x25   :  { %1432 = vmatprep.subr.mxu1 %v516_v45  ;;  %1466 = vmatprep.subr.mxu0 %v711_v50 }
  0x26   :  { %1433 = vmatpush3.msra.mxu1 %v516_v45  ;;  %1467 = vmatpush3.msra.mxu0 %v711_v50 }
  0x27   :  { %1434 = vmatprep.subr.mxu1 %v515_v46  ;;  %1468 = vmatprep.subr.mxu0 %v710_v51 }
  0x28   :  { %1435 = vmatpush3.msra.mxu1 %v515_v46  ;;  %1469 = vmatpush3.msra.mxu0 %v710_v51 }
  0x29   :  { %1436 = vmatprep.subr.mxu1 %v514_v47  ;;  %1470 = vmatprep.subr.mxu0 %v709_v52 }
  0x2a   :  { %1397 = vmatmul.mubr.bf16.gmra.mxu0 %v1556_v32  ;;  %1437 = vmatpush3.msra.mxu1 %v514_v47 }
  0x2b   :  { %1400 = vmatprep.mubr.bf16.mxu0 %v1557_v35  ;;  %1438 = vmatprep.subr.mxu1 %v513_v48 }
  0x2c   :  { %1439 = vmatpush3.msra.mxu1 %v513_v48  ;;  %1471 = vmatpush3.msra.mxu0 %v709_v52 }
  0x2d   :  { %1472 = vmatprep.subr.mxu0 %v708_v53 }
  0x2e   :  { %1473 = vmatpush3.msra.mxu0 %v708_v53 }
  0x2f   :  { %1474 = vmatprep.subr.mxu0 %v707_v54 }
  0x30   :  { %1475 = vmatpush3.msra.mxu0 %v707_v54 }
  0x31   :  { %1476 = vmatprep.subr.mxu0 %v706_v55 }
  0x32   :  { %1401 = vmatmul.mubr.bf16.gmra.mxu0 %v1558_v41 }
  0x33   :  { %1404 = vmatprep.mubr.bf16.mxu0 %v1559_v42  ;;  %1477 = vmatpush3.msra.mxu0 %v706_v55 }
  0x34   :  { %1478 = vmatprep.subr.mxu0 %v705_v56 }
  0x35   :  { %1479 = vmatpush3.msra.mxu0 %v705_v56 }
  0x36   :  { %1480 = vmatprep.subr.mxu0 %v704_v57 }
  0x37   :  { %1481 = vmatpush3.msra.mxu0 %v704_v57 }
  0x38   :  { %1482 = vmatprep.subr.mxu0 %v703_v58 }
  0x39   :  { %1483 = vmatpush3.msra.mxu0 %v703_v58 }
  0x3a   :  { %1405 = vmatmul.mubr.bf16.gmra.mxu0 %v1560_v43  ;;  %1484 = vmatprep.subr.mxu0 %v702_v59 }
  0x3b   :  { %1485 = vmatpush3.msra.mxu0 %v702_v59 }
  0x3c   :  { %1486 = vmatprep.subr.mxu0 %v701_v60 }
  0x3d   :  { %1487 = vmatpush3.msra.mxu0 %v701_v60 }
  0x80   :  { %v398_v61 = vpop.permute.xlu0 %397  ;;  %v408_v62 = vpop.permute.xlu1 %407 }
  0x81   :  { %v481_v4 = vmul.f32 %v1818_v2, %v398_v61  ;;  %v483_v12 = vmul.f32 %v1818_v2, %v408_v62 }
  0x84   :  { %v403_v63 = vpop.permute.xlu0 %402  ;;  %v413_v0 = vpop.permute.xlu1 %412 }
  0x85   :  { %v482_v15 = vmul.f32 %v1818_v2, %v403_v63  ;;  %v484_v19 = vmul.f32 %v1818_v2, %v413_v0 }
  0x88   :  { %v418_v1 = vpop.permute.xlu0 %417  ;;  %v423_v5 = vpop.permute.xlu1 %422 }
  0x89   :  { %v485_v24 = vmul.f32 %v1818_v2, %v418_v1  ;;  %v486_v33 = vmul.f32 %v1818_v2, %v423_v5 }
  0x8c   :  { %v428_v10 = vpop.permute.xlu0 %427  ;;  %v433_v17 = vpop.permute.xlu1 %432 }
  0x8d   :  { %v487_v35 = vmul.f32 %v1818_v2, %v428_v10  ;;  %v488_v42 = vmul.f32 %v1818_v2, %v433_v17  ;;  %v700_v17 = vld [vmem:[%s1965_s7 + $0x18] sm:$0xff] }
  0x8e   :  { %1488 = vmatprep.subr.mxu0 %v700_v17 }
  0x8f   :  { %1489 = vmatpush3.msra.mxu0 %v700_v17 }
  0x90   :  { %v438_v25 = vpop.permute.xlu0 %437  ;;  %v443_v30 = vpop.permute.xlu1 %442 }
  0x91   :  { %v489_v43 = vmul.f32 %v1818_v2, %v438_v25  ;;  %v490_v51 = vmul.f32 %v1818_v2, %v443_v30 }
  0x94   :  { %v448_v37 = vpop.permute.xlu0 %447  ;;  %v453_v45 = vpop.permute.xlu1 %452 }
  0x95   :  { %v491_v54 = vmul.f32 %v1818_v2, %v448_v37  ;;  %v492_v61 = vmul.f32 %v1818_v2, %v453_v45 }
  0x98   :  { %v458_v52 = vpop.permute.xlu0 %457  ;;  %v463_v58 = vpop.permute.xlu1 %462 }
  0x99   :  { %v493_v62 = vmul.f32 %v1818_v2, %v458_v52 }
  0x9c   :  { %v468_v1 = vpop.permute.xlu0 %467 }
  0x9d   :  { %v495_v10 = vmul.f32 %v1818_v2, %v468_v1 }
  0xe2   :  { %v1394_v3 = vpop.f32.mrf.mxu0 }
  0xe3   :  { %v364_v13 = vmul.f32 %v1394_v3, %v1824_v6 }
  0xe4   :  { %v241_v7 = vpop.f32.mrf.mxu0 }
  0xe5   :  { %v362_v8 = vmul.f32 %v1824_v6, %v241_v7  ;;  %v499_v22 = vadd.f32 %v483_v12, %v364_v13 }
  0xe6   :  { %v1395_v9 = vpop.f32.mrf.mxu0 }
  0xe7   :  { %v497_v11 = vadd.f32 %v481_v4, %v362_v8  ;;  %v365_v20 = vmul.f32 %v1395_v9, %v1824_v6  ;;  %v494_v8 = vmul.f32 %v1818_v2, %v463_v58 }
  0xe8   :  { %v244_v14 = vpop.f32.mrf.mxu0 }
  0xe9   :  { %v363_v16 = vmul.f32 %v1824_v6, %v244_v14  ;;  %1440 = vmatprep.mubr.f32.mxu1 %v497_v11  ;;  %v500_v28 = vadd.f32 %v484_v19, %v365_v20  ;;  %v473_v11 = vpop.permute.xlu1 %472  ;;  %v1205_v19 = vld [vmem:[%s1968_s6] ss:$0 sm:$0xff] }
  0xea   :  { %v1398_v18 = vpop.f32.mrf.mxu0 }
  0xeb   :  { %v498_v21 = vadd.f32 %v482_v15, %v363_v16  ;;  %v368_v31 = vmul.f32 %v1398_v18, %v1824_v6  ;;  %v496_v15 = vmul.f32 %v1818_v2, %v473_v11  ;;  %v699_v18 = vld [vmem:[%s1965_s7 + $0x10] sm:$0xff]  ;;  %v698_v2 = vld [vmem:[%s1965_s7 + $0x8] sm:$0xff] }
  0xec   :  { %v257_v23 = vpop.f32.mrf.mxu0  ;;  %1490 = vmatprep.subr.mxu0 %v699_v18 }
  0xed   :  { %v366_v26 = vmul.f32 %v1824_v6, %v257_v23  ;;  %1441 = vmatmul.mubr.f32.vlgmr.msra.gmra.mxu1 %v498_v21  ;;  %v503_v40 = vadd.f32 %v487_v35, %v368_v31  ;;  %1491 = vmatpush3.msra.mxu0 %v699_v18 }
  0xee   :  { %v1399_v27 = vpop.f32.mrf.mxu0  ;;  %1443 = vmatprep.mubr.f32.mxu1 %v499_v22  ;;  %1492 = vmatprep.subr.mxu0 %v698_v2 }
  0xef   :  { %v501_v29 = vadd.f32 %v485_v24, %v366_v26  ;;  %v369_v38 = vmul.f32 %v1399_v27, %v1824_v6  ;;  %1493 = vmatpush3.msra.mxu0 %v698_v2 }
  0xf0   :  { %v260_v32 = vpop.f32.mrf.mxu0 }
  0xf1   :  { %v367_v34 = vmul.f32 %v1824_v6, %v260_v32  ;;  %1444 = vmatmul.mubr.f32.gmra.mxu1 %v500_v28  ;;  %v504_v47 = vadd.f32 %v488_v42, %v369_v38 }
  0xf2   :  { %v1402_v36 = vpop.f32.mrf.mxu0  ;;  %1446 = vmatprep.mubr.f32.mxu1 %v501_v29 }
  0xf3   :  { %v502_v39 = vadd.f32 %v486_v33, %v367_v34  ;;  %v372_v49 = vmul.f32 %v1402_v36, %v1824_v6 }
  0xf4   :  { %v273_v41 = vpop.f32.mrf.mxu0 }
  0xf5   :  { %v370_v44 = vmul.f32 %v1824_v6, %v273_v41  ;;  %1447 = vmatmul.mubr.f32.gmra.mxu1 %v502_v39  ;;  %v507_v59 = vadd.f32 %v491_v54, %v372_v49 }
  0xf6   :  { %v1403_v46 = vpop.f32.mrf.mxu0  ;;  %1449 = vmatprep.mubr.f32.mxu1 %v503_v40 }
  0xf7   :  { %v505_v48 = vadd.f32 %v489_v43, %v370_v44  ;;  %v373_v56 = vmul.f32 %v1403_v46, %v1824_v6 }
  0xf8   :  { %v276_v50 = vpop.f32.mrf.mxu0 }
  0xf9   :  { %v371_v53 = vmul.f32 %v1824_v6, %v276_v50  ;;  %1450 = vmatmul.mubr.f32.gmra.mxu1 %v504_v47  ;;  %v508_v3 = vadd.f32 %v492_v61, %v373_v56 }
  0xfa   :  { %v1406_v55 = vpop.f32.mrf.mxu0  ;;  %1452 = vmatprep.mubr.f32.mxu1 %v505_v48 }
  0xfb   :  { %v506_v57 = vadd.f32 %v490_v51, %v371_v53  ;;  %v376_v5 = vmul.f32 %v1406_v55, %v1824_v6 }
  0xfc   :  { %v289_v60 = vpop.f32.mrf.mxu0 }
  0xfd   :  { %v374_v63 = vmul.f32 %v1824_v6, %v289_v60  ;;  %1453 = vmatmul.mubr.f32.gmra.mxu1 %v506_v57  ;;  %v511_v14 = vadd.f32 %v495_v10, %v376_v5  ;;  %v1563_v5 = vmov 0.0  }
  0xfe   :  { %v1407_v0 = vpop.f32.mrf.mxu0  ;;  %1455 = vmatprep.mubr.f32.mxu1 %v507_v59  ;;  %1520 = vmatprep.subr.bf16.mxu1 %v1563_v5 }
  0xff   :  { %v509_v4 = vadd.f32 %v493_v62, %v374_v63  ;;  %v377_v12 = vmul.f32 %v1407_v0, %v1824_v6 }
 0x100   :  { %v292_v7 = vpop.f32.mrf.mxu0 }
 0x101   :  { %v375_v9 = vmul.f32 %v1824_v6, %v292_v7  ;;  %1456 = vmatmul.mubr.f32.gmra.mxu1 %v508_v3  ;;  %v512_v16 = vadd.f32 %v496_v15, %v377_v12  ;;  %v697_v6 = vld [vmem:[%s1965_s7] sm:$0xff] }
 0x102   :  { %1458 = vmatprep.mubr.f32.mxu1 %v509_v4  ;;  %1494 = vmatprep.subr.mxu0 %v697_v6  ;;  %v1877_v7 = vld [vmem:[%s1970_s8] ss:$0 sm:$0xff] }
 0x103   :  { %v510_v13 = vadd.f32 %v494_v8, %v375_v9  ;;  %1495 = vmatpush3.msra.mxu0 %v697_v6 }
 0x105   :  { %1459 = vmatmul.mubr.f32.gmra.mxu1 %v510_v13 }
 0x106   :  { %1461 = vmatprep.mubr.f32.mxu1 %v511_v14 }
 0x109   :  { %1462 = vmatmul.mubr.f32.gmra.mxu1 %v512_v16 }
 0x10a   :  { %1536 = vmatprep.mubr.msk.bf16.mxu1 %vm1564_vm0, %v1563_v5 }
 0x1ad   :  { %v1442_v20 = vpop.f32.mrf.mxu1 }
 0x1ae   :  { %v608_v21 = vadd.f32 %v1442_v20, %v1205_v19 }
 0x1af   :  { %v602_v22 = vpop.f32.mrf.mxu1 }
 0x1b0   :  { %v603_v23 = vadd.f32 %v1205_v19, %v602_v22  ;;  %v682_v26 = vmax.f32 %v608_v21, 0.0 }
 0x1b1   :  { %v1445_v24 = vpop.f32.mrf.mxu1 }
 0x1b2   :  { %v681_v25 = vmax.f32 %v603_v23, 0.0  ;;  %v618_v27 = vadd.f32 %v1445_v24, %v1205_v19 }
 0x1b3   :  { %v612_v28 = vpop.f32.mrf.mxu1 }
 0x1b4   :  { %v613_v29 = vadd.f32 %v1205_v19, %v612_v28  ;;  %1496 = vmatprep.mubr.f32.mxu0 %v681_v25  ;;  %v684_v32 = vmax.f32 %v618_v27, 0.0 }
 0x1b5   :  { %v1448_v30 = vpop.f32.mrf.mxu1  ;;  %1497 = vmatmul.mubr.f32.vlgmr.msra.gmra.mxu0 %v682_v26 }
 0x1b6   :  { %v683_v31 = vmax.f32 %v613_v29, 0.0  ;;  %v628_v33 = vadd.f32 %v1448_v30, %v1205_v19 }
 0x1b7   :  { %v622_v34 = vpop.f32.mrf.mxu1 }
 0x1b8   :  { %v623_v35 = vadd.f32 %v1205_v19, %v622_v34  ;;  %1499 = vmatprep.mubr.f32.mxu0 %v683_v31  ;;  %v686_v38 = vmax.f32 %v628_v33, 0.0 }
 0x1b9   :  { %v1451_v36 = vpop.f32.mrf.mxu1  ;;  %1500 = vmatmul.mubr.f32.gmra.mxu0 %v684_v32 }
 0x1ba   :  { %v685_v37 = vmax.f32 %v623_v35, 0.0  ;;  %v638_v39 = vadd.f32 %v1451_v36, %v1205_v19 }
 0x1bb   :  { %v632_v40 = vpop.f32.mrf.mxu1 }
 0x1bc   :  { %v633_v41 = vadd.f32 %v1205_v19, %v632_v40  ;;  %1502 = vmatprep.mubr.f32.mxu0 %v685_v37  ;;  %v688_v44 = vmax.f32 %v638_v39, 0.0 }
 0x1bd   :  { %v1454_v42 = vpop.f32.mrf.mxu1  ;;  %1503 = vmatmul.mubr.f32.gmra.mxu0 %v686_v38 }
 0x1be   :  { %v687_v43 = vmax.f32 %v633_v41, 0.0  ;;  %v648_v45 = vadd.f32 %v1454_v42, %v1205_v19 }
 0x1bf   :  { %v642_v46 = vpop.f32.mrf.mxu1 }
 0x1c0   :  { %v643_v47 = vadd.f32 %v1205_v19, %v642_v46  ;;  %1505 = vmatprep.mubr.f32.mxu0 %v687_v43  ;;  %v690_v50 = vmax.f32 %v648_v45, 0.0 }
 0x1c1   :  { %v1457_v48 = vpop.f32.mrf.mxu1  ;;  %1506 = vmatmul.mubr.f32.gmra.mxu0 %v688_v44 }
 0x1c2   :  { %v689_v49 = vmax.f32 %v643_v47, 0.0  ;;  %v658_v51 = vadd.f32 %v1457_v48, %v1205_v19 }
 0x1c3   :  { %v652_v52 = vpop.f32.mrf.mxu1 }
 0x1c4   :  { %v653_v53 = vadd.f32 %v1205_v19, %v652_v52  ;;  %1508 = vmatprep.mubr.f32.mxu0 %v689_v49  ;;  %v692_v56 = vmax.f32 %v658_v51, 0.0 }
 0x1c5   :  { %v1460_v54 = vpop.f32.mrf.mxu1  ;;  %1509 = vmatmul.mubr.f32.gmra.mxu0 %v690_v50 }
 0x1c6   :  { %v691_v55 = vmax.f32 %v653_v53, 0.0  ;;  %v668_v57 = vadd.f32 %v1460_v54, %v1205_v19 }
 0x1c7   :  { %v662_v58 = vpop.f32.mrf.mxu1 }
 0x1c8   :  { %v663_v59 = vadd.f32 %v1205_v19, %v662_v58  ;;  %1511 = vmatprep.mubr.f32.mxu0 %v691_v55  ;;  %v694_v62 = vmax.f32 %v668_v57, 0.0 }
 0x1c9   :  { %v1463_v60 = vpop.f32.mrf.mxu1  ;;  %1512 = vmatmul.mubr.f32.gmra.mxu0 %v692_v56 }
 0x1ca   :  { %v693_v61 = vmax.f32 %v663_v59, 0.0  ;;  %v678_v63 = vadd.f32 %v1463_v60, %v1205_v19 }
 0x1cb   :  { %v672_v0 = vpop.f32.mrf.mxu1 }
 0x1cc   :  { %v673_v1 = vadd.f32 %v1205_v19, %v672_v0  ;;  %1514 = vmatprep.mubr.f32.mxu0 %v693_v61  ;;  %v696_v4 = vmax.f32 %v678_v63, 0.0 }
 0x1cd   :  { %1515 = vmatmul.mubr.f32.gmra.mxu0 %v694_v62 }
 0x1ce   :  { %v695_v3 = vmax.f32 %v673_v1, 0.0 }
 0x1d0   :  { %1517 = vmatprep.mubr.f32.mxu0 %v695_v3 }
 0x1d1   :  { %1518 = vmatmul.mubr.f32.gmra.mxu0 %v696_v4 }
 0x275   :  { %v1498_v8 = vpop.f32.mrf.mxu0 }
 0x276   :  { %v792_v9 = vadd.f32 %v1498_v8, %v1877_v7 }
 0x277   :  { %v786_v10 = vpop.f32.mrf.mxu0 }
 0x278   :  { %v787_v11 = vadd.f32 %v1877_v7, %v786_v10  ;;  %v866_v13 = vmax.f32 %v792_v9, 0.0 }
 0x279   :  { %v1501_v12 = vpop.f32.mrf.mxu0 }
 0x27a   :  { %v865_v14 = vmax.f32 %v787_v11, 0.0  ;;  %v802_v15 = vadd.f32 %v1501_v12, %v1877_v7  ;;  %v1083_v23 = vmul.f32 %v866_v13, %v866_v13 }
 0x27b   :  { %v796_v16 = vpop.f32.mrf.mxu0 }
 0x27c   :  { %v1882_v17 = vpack.c.bf16 %v866_v13, %v865_v14  ;;  %v868_v18 = vmax.f32 %v802_v15, 0.0  ;;  %v797_v2 = vadd.f32 %v1877_v7, %v796_v16  ;;  %v1082_v20 = vmul.f32 %v865_v14, %v865_v14 }
 0x27d   :  { %v1504_v6 = vpop.f32.mrf.mxu0  ;;  %v1060_v26 = vadd.f32 %v866_v13, %v865_v14 }
 0x27e   :  { %1244 = vst [vmem:[%s1971_s10] sm:$0xff] %v1882_v17   ;;  %v812_v19 = vadd.f32 %v1504_v6, %v1877_v7  ;;  %v867_v21 = vmax.f32 %v797_v2, 0.0  ;;  %v1047_v27 = vmul.f32 0.0, %v868_v18  ;;  %v1098_v33 = vadd.f32 %v1083_v23, %v1082_v20 }
 0x27f   :  { %v806_v22 = vpop.f32.mrf.mxu0 }
 0x280   :  { %v870_v24 = vmax.f32 %v812_v19, 0.0  ;;  %v807_v25 = vadd.f32 %v1877_v7, %v806_v22  ;;  %v1891_v28 = vpack.c.bf16 %v868_v18, %v867_v21  ;;  %v1046_v29 = vmul.f32 0.0, %v867_v21 }
 0x281   :  { %v1507_v30 = vpop.f32.mrf.mxu0  ;;  %v1085_v41 = vmul.f32 %v1047_v27, %v1047_v27 }
 0x282   :  { %v869_v31 = vmax.f32 %v807_v25, 0.0  ;;  %v822_v32 = vadd.f32 %v1507_v30, %v1877_v7  ;;  %1280 = vst [vmem:[%s1971_s10 + $0x8] sm:$0xff] %v1891_v28   ;;  %v1061_v34 = vadd.f32 %v1060_v26, %v1046_v29  ;;  %v1084_v35 = vmul.f32 %v1046_v29, %v1046_v29 }
 0x283   :  { %v816_v36 = vpop.f32.mrf.mxu0  ;;  %v1049_v37 = vmul.f32 0.0, %v870_v24 }
 0x284   :  { %v1898_v38 = vpack.c.bf16 %v870_v24, %v869_v31  ;;  %v1048_v39 = vmul.f32 0.0, %v869_v31  ;;  %v872_v40 = vmax.f32 %v822_v32, 0.0  ;;  %v1099_v42 = vadd.f32 %v1098_v33, %v1084_v35 }
 0x285   :  { %v1062_v43 = vadd.f32 %v1061_v34, %v1047_v27  ;;  %v817_v44 = vadd.f32 %v1877_v7, %v816_v36  ;;  %v1510_v45 = vpop.f32.mrf.mxu0  ;;  %v1087_v52 = vmul.f32 %v1049_v37, %v1049_v37 }
 0x286   :  { %1281 = vst [vmem:[%s1971_s10 + $0x10] sm:$0xff] %v1898_v38   ;;  %v1086_v46 = vmul.f32 %v1048_v39, %v1048_v39  ;;  %v832_v47 = vadd.f32 %v1510_v45, %v1877_v7  ;;  %v1100_v49 = vadd.f32 %v1099_v42, %v1085_v41  ;;  %v1051_v53 = vmul.f32 0.0, %v872_v40 }
 0x287   :  { %v1063_v48 = vadd.f32 %v1062_v43, %v1048_v39  ;;  %v871_v50 = vmax.f32 %v817_v44, 0.0  ;;  %v826_v51 = vpop.f32.mrf.mxu0 }
 0x288   :  { %v874_v54 = vmax.f32 %v832_v47, 0.0  ;;  %v827_v55 = vadd.f32 %v1877_v7, %v826_v51  ;;  %v1101_v56 = vadd.f32 %v1100_v49, %v1086_v46  ;;  %v1089_v11 = vmul.f32 %v1051_v53, %v1051_v53 }
 0x289   :  { %v1907_v57 = vpack.c.bf16 %v872_v40, %v871_v50  ;;  %v1050_v58 = vmul.f32 0.0, %v871_v50  ;;  %v1064_v59 = vadd.f32 %v1063_v48, %v1049_v37  ;;  %v1513_v60 = vpop.f32.mrf.mxu0 }
 0x28a   :  { %v873_v61 = vmax.f32 %v827_v55, 0.0  ;;  %v842_v62 = vadd.f32 %v1513_v60, %v1877_v7  ;;  %v1102_v1 = vadd.f32 %v1101_v56, %v1087_v52  ;;  %v1053_v4 = vmul.f32 0.0, %v874_v54 }
 0x28b   :  { %1282 = vst [vmem:[%s1971_s10 + $0x18] sm:$0xff] %v1907_v57   ;;  %v1065_v63 = vadd.f32 %v1064_v59, %v1050_v58  ;;  %v1088_v0 = vmul.f32 %v1050_v58, %v1050_v58  ;;  %v836_v3 = vpop.f32.mrf.mxu0 }
 0x28c   :  { %v1914_v8 = vpack.c.bf16 %v874_v54, %v873_v61  ;;  %v1052_v9 = vmul.f32 0.0, %v873_v61  ;;  %v876_v10 = vmax.f32 %v842_v62, 0.0  ;;  %v837_v14 = vadd.f32 %v1877_v7, %v836_v3 }
 0x28d   :  { %v1103_v12 = vadd.f32 %v1102_v1, %v1088_v0  ;;  %v1066_v13 = vadd.f32 %v1065_v63, %v1051_v53  ;;  %v1516_v15 = vpop.f32.mrf.mxu0  ;;  %v1091_v21 = vmul.f32 %v1053_v4, %v1053_v4 }
 0x28e   :  { %1283 = vst [vmem:[%s1971_s10 + $0x20] sm:$0xff] %v1914_v8   ;;  %v1090_v16 = vmul.f32 %v1052_v9, %v1052_v9  ;;  %v852_v18 = vadd.f32 %v1516_v15, %v1877_v7  ;;  %v875_v19 = vmax.f32 %v837_v14, 0.0  ;;  %v1055_v22 = vmul.f32 0.0, %v876_v10 }
 0x28f   :  { %v1067_v2 = vadd.f32 %v1066_v13, %v1052_v9  ;;  %v1104_v6 = vadd.f32 %v1103_v12, %v1089_v11  ;;  %v846_v20 = vpop.f32.mrf.mxu0 }
 0x290   :  { %v878_v23 = vmax.f32 %v852_v18, 0.0  ;;  %v847_v24 = vadd.f32 %v1877_v7, %v846_v20  ;;  %v886_v26 = vpack.c.bf16 %v876_v10, %v875_v19  ;;  %v1054_v27 = vmul.f32 0.0, %v875_v19 }
 0x291   :  { %v1105_v25 = vadd.f32 %v1104_v6, %v1090_v16  ;;  %v1068_v29 = vadd.f32 %v1067_v2, %v1053_v4  ;;  %v1519_v30 = vpop.f32.mrf.mxu0  ;;  %v1093_v42 = vmul.f32 %v1055_v22, %v1055_v22 }
 0x292   :  { %v877_v31 = vmax.f32 %v847_v24, 0.0  ;;  %v862_v32 = vadd.f32 %v1519_v30, %v1877_v7  ;;  %1284 = vst [vmem:[%s1971_s10 + $0x28] sm:$0xff] %v886_v26   ;;  %v1092_v34 = vmul.f32 %v1054_v27, %v1054_v27  ;;  %v1057_v37 = vmul.f32 0.0, %v878_v23 }
 0x293   :  { %v1069_v33 = vadd.f32 %v1068_v29, %v1054_v27  ;;  %v1106_v35 = vadd.f32 %v1105_v25, %v1091_v21  ;;  %v856_v36 = vpop.f32.mrf.mxu0 }
 0x294   :  { %v887_v39 = vpack.c.bf16 %v878_v23, %v877_v31  ;;  %v1056_v40 = vmul.f32 0.0, %v877_v31  ;;  %v880_v41 = vmax.f32 %v862_v32, 0.0  ;;  %v857_v45 = vadd.f32 %v1877_v7, %v856_v36 }
 0x295   :  { %v1107_v43 = vadd.f32 %v1106_v35, %v1092_v34  ;;  %v1070_v44 = vadd.f32 %v1069_v33, %v1055_v22  ;;  %v1095_v50 = vmul.f32 %v1057_v37, %v1057_v37 }
 0x296   :  { %1285 = vst [vmem:[%s1971_s10 + $0x30] sm:$0xff] %v887_v39   ;;  %v1094_v46 = vmul.f32 %v1056_v40, %v1056_v40  ;;  %v879_v49 = vmax.f32 %v857_v45, 0.0  ;;  %v1059_v51 = vmul.f32 0.0, %v880_v41 }
 0x297   :  { %v1071_v47 = vadd.f32 %v1070_v44, %v1056_v40  ;;  %v1108_v48 = vadd.f32 %v1107_v43, %v1093_v42 }
 0x298   :  { %v888_v53 = vpack.c.bf16 %v880_v41, %v879_v49  ;;  %v1058_v54 = vmul.f32 0.0, %v879_v49  ;;  %v1097_v59 = vmul.f32 %v1059_v51, %v1059_v51 }
 0x299   :  { %v1109_v52 = vadd.f32 %v1108_v48, %v1094_v46  ;;  %v1072_v55 = vadd.f32 %v1071_v47, %v1057_v37 }
 0x29a   :  { %1286 = vst [vmem:[%s1971_s10 + $0x38] sm:$0xff] %v888_v53   ;;  %v1096_v7 = vmul.f32 %v1058_v54, %v1058_v54  ;;  %1521 = vmatpush3.bf16.msra.mxu1 %v888_v53 }
 0x29b   :  { %v1073_v56 = vadd.f32 %v1072_v55, %v1058_v54  ;;  %v1110_v58 = vadd.f32 %v1109_v52, %v1095_v50  ;;  %1522 = vmatprep.subr.bf16.mxu1 %v1563_v5 }
 0x29d   :  { %v1074_v60 = vadd.f32 %v1073_v56, %v1059_v51  ;;  %v1111_v61 = vadd.f32 %v1110_v58, %v1096_v7 }
 0x29e   :  { %1523 = vmatpush3.bf16.msra.mxu1 %v887_v39 }
 0x29f   :  { %v1075_v62 = vrot.slane %v1074_v60, 4  ;;  %v1112_v63 = vadd.f32 %v1111_v61, %v1097_v59  ;;  %1524 = vmatprep.subr.bf16.mxu1 %v1563_v5 }
 0x2a1   :  { %v1076_v0 = vadd.f32 %v1075_v62, %v1074_v60  ;;  %v1113_v1 = vrot.slane %v1112_v63, 4 }
 0x2a2   :  { %1525 = vmatpush3.bf16.msra.mxu1 %v886_v26 }
 0x2a3   :  { %v1077_v3 = vrot.slane %v1076_v0, 2  ;;  %v1114_v4 = vadd.f32 %v1113_v1, %v1112_v63  ;;  %1526 = vmatprep.subr.bf16.mxu1 %v1563_v5 }
 0x2a5   :  { %v1078_v9 = vadd.f32 %v1077_v3, %v1076_v0  ;;  %v1115_v10 = vrot.slane %v1114_v4, 2 }
 0x2a6   :  { %1527 = vmatpush3.bf16.msra.mxu1 %v1914_v8  ;;  %v1561_v8 = vld [vmem:[%s1969_s9] sm:$0xff]  }
 0x2a7   :  { %v1079_v11 = vrot.slane %v1078_v9, 1  ;;  %v1116_v12 = vadd.f32 %v1115_v10, %v1114_v4  ;;  %1528 = vmatprep.subr.bf16.mxu1 %v1563_v5 }
 0x2a9   :  { %v1080_v13 = vadd.f32 %v1079_v11, %v1078_v9  ;;  %v1117_v14 = vrot.slane %v1116_v12, 1 }
 0x2aa   :  { %1529 = vmatpush3.bf16.msra.mxu1 %v1907_v57 }
 0x2ab   :  { %1081 = vst [vmem:[%s1972_s11] sm:$0x1] %v1080_v13  ;;  %v1118_v15 = vadd.f32 %v1117_v14, %v1116_v12  ;;  %1530 = vmatprep.subr.bf16.mxu1 %v1563_v5 }
 0x2ad   :  { %1119 = vst [vmem:[%s1973_s12] sm:$0x1] %v1118_v15 }
 0x2ae   :  { %1531 = vmatpush3.bf16.msra.mxu1 %v1898_v38 }
 0x2af   :  { %1532 = vmatprep.subr.bf16.mxu1 %v1563_v5 }
 0x2b2   :  { %1533 = vmatpush3.bf16.msra.mxu1 %v1891_v28 }
 0x2b3   :  { %1534 = vmatprep.subr.bf16.mxu1 %v1563_v5 }
 0x2b6   :  { %1535 = vmatpush3.bf16.msra.mxu1 %v1882_v17 }
 0x2b9   :  { %1537 = vmatmul.mubr.bf16.vlgmr.msra.gmra.mxu1 %v1561_v8 }
 0x379   :  { %v1162_v57 = vpop.f32.mrf.mxu1 }
 0x37a   :  { %1169 = vst [vmem:[%s1974_s13] sm:$0xff] %v1162_v57 }
 0x37b   :  { %v1538_v16 = vpop.f32.mrf.mxu1 }
 0x37d   :  { %v1165_v38 = vpop.f32.mrf.mxu1 }
 0x37e   :  { %1170 = vst [vmem:[%s1974_s13 + $0x8] sm:$0xff] %v1165_v38 }
 0x37f   :  { %v1539_v28 = vpop.f32.mrf.mxu1 }

// kernel: encoder_forward.5
= control target key start
LH: loop header
LB: loop body
LE: loop exit
PB: predicated region body
PF: predicated region fallthrough
CT: control target
= control target key end

     0   :  { %v1600_v2 = vmov 0   ;;  %s1981_s0 = inlined_call_operand.vmem [shape: bf16[128,128], index: 0, kind: input, shape index: {}]   ;;  %s1982_s1 = inlined_call_operand.vmem [shape: bf16[1,128,128], index: 1, kind: input, shape index: {}]   ;;  %s1983_s2 = inlined_call_operand.vmem [shape: f32[128,1], index: 2, kind: input, shape index: {}]   ;;  %s1984_s3 = inlined_call_operand.vmem [shape: f32[1,128], index: 3, kind: input, shape index: {}]   ;;  %s1985_s4 = inlined_call_operand.vmem [shape: f32[1,128], index: 4, kind: input, shape index: {}]   ;;  %s1986_s5 = inlined_call_operand.vmem [shape: f32[128,128], index: 5, kind: input, shape index: {}]   ;;  %s1987_s6 = inlined_call_operand.vmem [shape: f32[1,128], index: 6, kind: input, shape index: {}]   ;;  %s1988_s7 = inlined_call_operand.vmem [shape: f32[128,128], index: 7, kind: input, shape index: {}]   ;;  %s1989_s8 = inlined_call_operand.vmem [shape: f32[1,128], index: 8, kind: input, shape index: {}]   ;;  %s1990_s9 = inlined_call_operand.vmem [shape: bf16[16,128], index: 9, kind: input, shape index: {}]   ;;  %s1991_s10 = inlined_call_operand.hbm [shape: bf16[1,128,128], index: 10, kind: output, shape index: {0}]   ;;  %s1992_s11 = inlined_call_operand.vmem [shape: f32[1,1,128], index: 11, kind: output, shape index: {1}]   ;;  %s1993_s12 = inlined_call_operand.vmem [shape: f32[1,1,128], index: 12, kind: output, shape index: {2}]   ;;  %s1994_s13 = inlined_call_operand.vmem [shape: f32[1,16,128], index: 13, kind: output, shape index: {3}]  }
   0x1   :  { %v1561_v0 = vld [vmem:[%s1982_s1 + $0x38] sm:$0xff]   ;;  %v1562_v1 = vld [vmem:[%s1982_s1 + $0x30] sm:$0xff]   ;;  %1559 = vset.pattern.permute.xlu0 %v1600_v2  ;;  %1560 = vset.pattern.permute.xlu1 %v1600_v2  ;;  %v1563_v3 = vld [vmem:[%s1982_s1 + $0x28] sm:$0xff]  }
   0x2   :  { %1389 = vmatprep.subr.bf16.mxu0 %v1561_v0  ;;  %v1564_v4 = vld [vmem:[%s1982_s1 + $0x20] sm:$0xff]   ;;  %v1565_v6 = vld [vmem:[%s1982_s1 + $0x18] sm:$0xff]   ;;  %v1566_v7 = vld [vmem:[%s1982_s1 + $0x10] sm:$0xff]  }
   0x3   :  { %1390 = vmatpush3.bf16.msra.mxu0 %v1561_v0  ;;  %v1569_v5 = vld [vmem:[%s1981_s0] sm:$0xff]   ;;  %v381_v9 = vld [vmem:[%s1983_s2 + $0x10] sm:$0xff]  ;;  %v380_v10 = vld [vmem:[%s1983_s2 + $0x8] sm:$0xff] }
   0x4   :  { %1391 = vmatprep.subr.bf16.mxu0 %v1562_v1  ;;  %1405 = vmatprep.mubr.bf16.mxu0 %v1569_v5  ;;  %v379_v8 = vld [vmem:[%s1983_s2] sm:$0xff]  ;;  %v382_v11 = vld [vmem:[%s1983_s2 + $0x18] sm:$0xff]  ;;  %v1567_v12 = vld [vmem:[%s1982_s1 + $0x8] sm:$0xff]  }
   0x5   :  { %398 = vperm.xlu0 %1559, %v379_v8   ;;  %408 = vperm.xlu1 %1560, %v381_v9   ;;  %v529_v13 = vld [vmem:[%s1986_s5 + $0x78] sm:$0xff]  ;;  %v383_v14 = vld [vmem:[%s1983_s2 + $0x20] sm:$0xff]  ;;  %v384_v15 = vld [vmem:[%s1983_s2 + $0x28] sm:$0xff] }
   0x6   :  { %1421 = vmatprep.subr.mxu1 %v529_v13  ;;  %v528_v16 = vld [vmem:[%s1986_s5 + $0x70] sm:$0xff] }
   0x7   :  { %1392 = vmatpush3.bf16.msra.mxu0 %v1562_v1  ;;  %1422 = vmatpush3.msra.mxu1 %v529_v13 }
   0x8   :  { %1393 = vmatprep.subr.bf16.mxu0 %v1563_v3 }
   0x9   :  { %403 = vperm.xlu0 %1559, %v380_v10   ;;  %413 = vperm.xlu1 %1560, %v382_v11  }
   0xb   :  { %1394 = vmatpush3.bf16.msra.mxu0 %v1563_v3 }
   0xc   :  { %1395 = vmatprep.subr.bf16.mxu0 %v1564_v4 }
   0xf   :  { %1396 = vmatpush3.bf16.msra.mxu0 %v1564_v4 }
  0x10   :  { %1397 = vmatprep.subr.bf16.mxu0 %v1565_v6 }
  0x13   :  { %1398 = vmatpush3.bf16.msra.mxu0 %v1565_v6 }
  0x14   :  { %1399 = vmatprep.subr.bf16.mxu0 %v1566_v7 }
  0x17   :  { %1400 = vmatpush3.bf16.msra.mxu0 %v1566_v7 }
  0x18   :  { %19 = vsyncpa [#allocation4], 0  ;;  %1401 = vmatprep.subr.bf16.mxu0 %v1567_v12  ;;  %v1568_v17 = vld [vmem:[%s1982_s1] sm:$0xff]   ;;  %1423 = vmatprep.subr.mxu1 %v528_v16  ;;  %v527_v18 = vld [vmem:[%s1986_s5 + $0x68] sm:$0xff]  ;;  %vm1602_vm0 = vmmov 0  }
  0x19   :  { %418 = vperm.xlu0 %1559, %v383_v14   ;;  %423 = vperm.xlu1 %1560, %v384_v15   ;;  %v385_v19 = vld [vmem:[%s1983_s2 + $0x30] sm:$0xff]  ;;  %v386_v20 = vld [vmem:[%s1983_s2 + $0x38] sm:$0xff]  ;;  %v526_v21 = vld [vmem:[%s1986_s5 + $0x60] sm:$0xff] }
  0x1a   :  { %1424 = vmatpush3.msra.mxu1 %v528_v16  ;;  %v525_v22 = vld [vmem:[%s1986_s5 + $0x58] sm:$0xff]  ;;  %v1570_v23 = vld [vmem:[%s1981_s0 + $0x8] sm:$0xff]   ;;  %v387_v24 = vld [vmem:[%s1983_s2 + $0x40] sm:$0xff] }
  0x1b   :  { %1402 = vmatpush3.bf16.msra.mxu0 %v1567_v12  ;;  %1425 = vmatprep.subr.mxu1 %v527_v18  ;;  %v388_v25 = vld [vmem:[%s1983_s2 + $0x48] sm:$0xff]  ;;  %v1571_v26 = vld [vmem:[%s1981_s0 + $0x10] sm:$0xff]   ;;  %v390_v29 = vld [vmem:[%s1983_s2 + $0x58] sm:$0xff] }
  0x1c   :  { %1403 = vmatprep.subr.bf16.mxu0 %v1568_v17  ;;  %1426 = vmatpush3.msra.mxu1 %v527_v18  ;;  %v524_v27 = vld [vmem:[%s1986_s5 + $0x50] sm:$0xff]  ;;  %v523_v30 = vld [vmem:[%s1986_s5 + $0x48] sm:$0xff]  ;;  %v522_v31 = vld [vmem:[%s1986_s5 + $0x40] sm:$0xff] }
  0x1d   :  { %428 = vperm.xlu0 %1559, %v385_v19   ;;  %433 = vperm.xlu1 %1560, %v386_v20   ;;  %v389_v28 = vld [vmem:[%s1983_s2 + $0x50] sm:$0xff]  ;;  %v1572_v32 = vld [vmem:[%s1981_s0 + $0x18] sm:$0xff]   ;;  %v391_v33 = vld [vmem:[%s1983_s2 + $0x60] sm:$0xff] }
  0x1e   :  { %1427 = vmatprep.subr.mxu1 %v526_v21  ;;  %v392_v34 = vld [vmem:[%s1983_s2 + $0x68] sm:$0xff]  ;;  %v1573_v35 = vld [vmem:[%s1981_s0 + $0x20] sm:$0xff]   ;;  %v521_v36 = vld [vmem:[%s1986_s5 + $0x38] sm:$0xff] }
  0x1f   :  { %1404 = vmatpush3.bf16.msra.mxu0 %v1568_v17  ;;  %1428 = vmatpush3.msra.mxu1 %v526_v21  ;;  %v393_v37 = vld [vmem:[%s1983_s2 + $0x70] sm:$0xff]  ;;  %v394_v38 = vld [vmem:[%s1983_s2 + $0x78] sm:$0xff]  ;;  %v519_v40 = vld [vmem:[%s1986_s5 + $0x28] sm:$0xff] }
  0x20   :  { %1429 = vmatprep.subr.mxu1 %v525_v22  ;;  %v520_v39 = vld [vmem:[%s1986_s5 + $0x30] sm:$0xff]  ;;  %v1574_v41 = vld [vmem:[%s1981_s0 + $0x28] sm:$0xff]   ;;  %v1576_v43 = vld [vmem:[%s1981_s0 + $0x38] sm:$0xff]  }
  0x21   :  { %438 = vperm.xlu0 %1559, %v387_v24   ;;  %443 = vperm.xlu1 %1560, %v388_v25   ;;  %v1575_v42 = vld [vmem:[%s1981_s0 + $0x30] sm:$0xff]   ;;  %v518_v44 = vld [vmem:[%s1986_s5 + $0x20] sm:$0xff]  ;;  %v517_v45 = vld [vmem:[%s1986_s5 + $0x18] sm:$0xff] }
  0x22   :  { %1406 = vmatmul.mubr.bf16.vlgmr.msra.gmra.mxu0 %v1570_v23  ;;  %1430 = vmatpush3.msra.mxu1 %v525_v22  ;;  %v516_v46 = vld [vmem:[%s1986_s5 + $0x10] sm:$0xff]  ;;  %v515_v47 = vld [vmem:[%s1986_s5 + $0x8] sm:$0xff]  ;;  %v514_v48 = vld [vmem:[%s1986_s5] sm:$0xff] }
  0x23   :  { %1409 = vmatprep.mubr.bf16.mxu0 %v1571_v26  ;;  %1431 = vmatprep.subr.mxu1 %v524_v27  ;;  %v713_v49 = vld [vmem:[%s1988_s7 + $0x78] sm:$0xff]  ;;  %v712_v50 = vld [vmem:[%s1988_s7 + $0x70] sm:$0xff]  ;;  %v711_v51 = vld [vmem:[%s1988_s7 + $0x68] sm:$0xff] }
  0x24   :  { %1432 = vmatpush3.msra.mxu1 %v524_v27  ;;  %1477 = vmatprep.subr.mxu0 %v713_v49  ;;  %v710_v52 = vld [vmem:[%s1988_s7 + $0x60] sm:$0xff]  ;;  %v709_v53 = vld [vmem:[%s1988_s7 + $0x58] sm:$0xff]  ;;  %v708_v54 = vld [vmem:[%s1988_s7 + $0x50] sm:$0xff] }
  0x25   :  { %448 = vperm.xlu0 %1559, %v389_v28   ;;  %453 = vperm.xlu1 %1560, %v390_v29   ;;  %v707_v55 = vld [vmem:[%s1988_s7 + $0x48] sm:$0xff]  ;;  %v706_v56 = vld [vmem:[%s1988_s7 + $0x40] sm:$0xff]  ;;  %v705_v57 = vld [vmem:[%s1988_s7 + $0x38] sm:$0xff] }
  0x26   :  { %1433 = vmatprep.subr.mxu1 %v523_v30  ;;  %1478 = vmatpush3.msra.mxu0 %v713_v49  ;;  %v704_v58 = vld [vmem:[%s1988_s7 + $0x30] sm:$0xff]  ;;  %v703_v59 = vld [vmem:[%s1988_s7 + $0x28] sm:$0xff]  ;;  %v702_v60 = vld [vmem:[%s1988_s7 + $0x20] sm:$0xff] }
  0x27   :  { %1434 = vmatpush3.msra.mxu1 %v523_v30  ;;  %1479 = vmatprep.subr.mxu0 %v712_v50  ;;  %v1859_v2 = vld [vmem:[%s1985_s4] ss:$0 sm:$0xff] }
  0x28   :  { %1435 = vmatprep.subr.mxu1 %v522_v31  ;;  %1480 = vmatpush3.msra.mxu0 %v712_v50  ;;  %v1865_v6 = vld [vmem:[%s1984_s3] ss:$0 sm:$0xff] }
  0x29   :  { %458 = vperm.xlu0 %1559, %v391_v33   ;;  %463 = vperm.xlu1 %1560, %v392_v34  }
  0x2a   :  { %1410 = vmatmul.mubr.bf16.gmra.mxu0 %v1572_v32  ;;  %1436 = vmatpush3.msra.mxu1 %v522_v31 }
  0x2b   :  { %1413 = vmatprep.mubr.bf16.mxu0 %v1573_v35  ;;  %1437 = vmatprep.subr.mxu1 %v521_v36 }
  0x2c   :  { %1438 = vmatpush3.msra.mxu1 %v521_v36  ;;  %1481 = vmatprep.subr.mxu0 %v711_v51 }
  0x2d   :  { %468 = vperm.xlu0 %1559, %v393_v37   ;;  %473 = vperm.xlu1 %1560, %v394_v38  }
  0x2e   :  { %1439 = vmatprep.subr.mxu1 %v520_v39  ;;  %1482 = vmatpush3.msra.mxu0 %v711_v51 }
  0x2f   :  { %1440 = vmatpush3.msra.mxu1 %v520_v39  ;;  %1483 = vmatprep.subr.mxu0 %v710_v52 }
  0x30   :  { %1441 = vmatprep.subr.mxu1 %v519_v40  ;;  %1484 = vmatpush3.msra.mxu0 %v710_v52 }
  0x31   :  { %1442 = vmatpush3.msra.mxu1 %v519_v40  ;;  %1485 = vmatprep.subr.mxu0 %v709_v53 }
  0x32   :  { %1414 = vmatmul.mubr.bf16.gmra.mxu0 %v1574_v41  ;;  %1443 = vmatprep.subr.mxu1 %v518_v44 }
  0x33   :  { %1417 = vmatprep.mubr.bf16.mxu0 %v1575_v42  ;;  %1444 = vmatpush3.msra.mxu1 %v518_v44 }
  0x34   :  { %1445 = vmatprep.subr.mxu1 %v517_v45  ;;  %1486 = vmatpush3.msra.mxu0 %v709_v53 }
  0x35   :  { %1446 = vmatpush3.msra.mxu1 %v517_v45  ;;  %1487 = vmatprep.subr.mxu0 %v708_v54 }
  0x36   :  { %1447 = vmatprep.subr.mxu1 %v516_v46  ;;  %1488 = vmatpush3.msra.mxu0 %v708_v54 }
  0x37   :  { %1448 = vmatpush3.msra.mxu1 %v516_v46  ;;  %1489 = vmatprep.subr.mxu0 %v707_v55 }
  0x38   :  { %1449 = vmatprep.subr.mxu1 %v515_v47  ;;  %1490 = vmatpush3.msra.mxu0 %v707_v55 }
  0x39   :  { %1450 = vmatpush3.msra.mxu1 %v515_v47  ;;  %1491 = vmatprep.subr.mxu0 %v706_v56 }
  0x3a   :  { %1418 = vmatmul.mubr.bf16.gmra.mxu0 %v1576_v43  ;;  %1451 = vmatprep.subr.mxu1 %v514_v48 }
  0x3b   :  { %1452 = vmatpush3.msra.mxu1 %v514_v48  ;;  %1492 = vmatpush3.msra.mxu0 %v706_v56 }
  0x3c   :  { %1493 = vmatprep.subr.mxu0 %v705_v57 }
  0x3d   :  { %1494 = vmatpush3.msra.mxu0 %v705_v57 }
  0x3e   :  { %1495 = vmatprep.subr.mxu0 %v704_v58 }
  0x3f   :  { %1496 = vmatpush3.msra.mxu0 %v704_v58 }
  0x40   :  { %1497 = vmatprep.subr.mxu0 %v703_v59 }
  0x41   :  { %1498 = vmatpush3.msra.mxu0 %v703_v59 }
  0x42   :  { %1499 = vmatprep.subr.mxu0 %v702_v60 }
  0x43   :  { %1500 = vmatpush3.msra.mxu0 %v702_v60 }
  0x80   :  { %v399_v61 = vpop.permute.xlu0 %398  ;;  %v409_v62 = vpop.permute.xlu1 %408 }
  0x81   :  { %v482_v4 = vmul.f32 %v1859_v2, %v399_v61  ;;  %v484_v12 = vmul.f32 %v1859_v2, %v409_v62 }
  0x84   :  { %v404_v63 = vpop.permute.xlu0 %403  ;;  %v414_v0 = vpop.permute.xlu1 %413 }
  0x85   :  { %v483_v15 = vmul.f32 %v1859_v2, %v404_v63  ;;  %v485_v19 = vmul.f32 %v1859_v2, %v414_v0 }
  0x94   :  { %v419_v1 = vpop.permute.xlu0 %418  ;;  %v424_v5 = vpop.permute.xlu1 %423 }
  0x95   :  { %v486_v24 = vmul.f32 %v1859_v2, %v419_v1  ;;  %v487_v33 = vmul.f32 %v1859_v2, %v424_v5 }
  0x98   :  { %v429_v10 = vpop.permute.xlu0 %428  ;;  %v434_v17 = vpop.permute.xlu1 %433 }
  0x99   :  { %v488_v35 = vmul.f32 %v1859_v2, %v429_v10  ;;  %v489_v42 = vmul.f32 %v1859_v2, %v434_v17  ;;  %v701_v17 = vld [vmem:[%s1988_s7 + $0x18] sm:$0xff] }
  0x9a   :  { %1501 = vmatprep.subr.mxu0 %v701_v17 }
  0x9b   :  { %1502 = vmatpush3.msra.mxu0 %v701_v17 }
  0x9c   :  { %v439_v25 = vpop.permute.xlu0 %438  ;;  %v444_v30 = vpop.permute.xlu1 %443 }
  0x9d   :  { %v490_v43 = vmul.f32 %v1859_v2, %v439_v25  ;;  %v491_v51 = vmul.f32 %v1859_v2, %v444_v30 }
  0xa0   :  { %v449_v37 = vpop.permute.xlu0 %448  ;;  %v454_v45 = vpop.permute.xlu1 %453 }
  0xa1   :  { %v492_v54 = vmul.f32 %v1859_v2, %v449_v37  ;;  %v493_v61 = vmul.f32 %v1859_v2, %v454_v45 }
  0xa4   :  { %v459_v52 = vpop.permute.xlu0 %458  ;;  %v464_v58 = vpop.permute.xlu1 %463 }
  0xa5   :  { %v494_v62 = vmul.f32 %v1859_v2, %v459_v52 }
  0xa8   :  { %v469_v1 = vpop.permute.xlu0 %468 }
  0xa9   :  { %v496_v10 = vmul.f32 %v1859_v2, %v469_v1 }
  0xe2   :  { %v1407_v3 = vpop.f32.mrf.mxu0 }
  0xe3   :  { %v365_v13 = vmul.f32 %v1407_v3, %v1865_v6 }
  0xe4   :  { %v242_v7 = vpop.f32.mrf.mxu0 }
  0xe5   :  { %v363_v8 = vmul.f32 %v1865_v6, %v242_v7  ;;  %v500_v22 = vadd.f32 %v484_v12, %v365_v13 }
  0xe6   :  { %v1408_v9 = vpop.f32.mrf.mxu0 }
  0xe7   :  { %v498_v11 = vadd.f32 %v482_v4, %v363_v8  ;;  %v366_v20 = vmul.f32 %v1408_v9, %v1865_v6  ;;  %v495_v8 = vmul.f32 %v1859_v2, %v464_v58 }
  0xe8   :  { %v245_v14 = vpop.f32.mrf.mxu0 }
  0xe9   :  { %v364_v16 = vmul.f32 %v1865_v6, %v245_v14  ;;  %1453 = vmatprep.mubr.f32.mxu1 %v498_v11  ;;  %v501_v28 = vadd.f32 %v485_v19, %v366_v20  ;;  %v474_v11 = vpop.permute.xlu1 %473  ;;  %v1218_v19 = vld [vmem:[%s1987_s6] ss:$0 sm:$0xff] }
  0xea   :  { %v1411_v18 = vpop.f32.mrf.mxu0 }
  0xeb   :  { %v499_v21 = vadd.f32 %v483_v15, %v364_v16  ;;  %v369_v31 = vmul.f32 %v1411_v18, %v1865_v6  ;;  %v497_v15 = vmul.f32 %v1859_v2, %v474_v11  ;;  %v700_v18 = vld [vmem:[%s1988_s7 + $0x10] sm:$0xff]  ;;  %v699_v2 = vld [vmem:[%s1988_s7 + $0x8] sm:$0xff] }
  0xec   :  { %v258_v23 = vpop.f32.mrf.mxu0  ;;  %1503 = vmatprep.subr.mxu0 %v700_v18 }
  0xed   :  { %v367_v26 = vmul.f32 %v1865_v6, %v258_v23  ;;  %1454 = vmatmul.mubr.f32.vlgmr.msra.gmra.mxu1 %v499_v21  ;;  %v504_v40 = vadd.f32 %v488_v35, %v369_v31  ;;  %1504 = vmatpush3.msra.mxu0 %v700_v18 }
  0xee   :  { %v1412_v27 = vpop.f32.mrf.mxu0  ;;  %1456 = vmatprep.mubr.f32.mxu1 %v500_v22  ;;  %1505 = vmatprep.subr.mxu0 %v699_v2 }
  0xef   :  { %v502_v29 = vadd.f32 %v486_v24, %v367_v26  ;;  %v370_v38 = vmul.f32 %v1412_v27, %v1865_v6  ;;  %1506 = vmatpush3.msra.mxu0 %v699_v2 }
  0xf0   :  { %v261_v32 = vpop.f32.mrf.mxu0 }
  0xf1   :  { %v368_v34 = vmul.f32 %v1865_v6, %v261_v32  ;;  %1457 = vmatmul.mubr.f32.gmra.mxu1 %v501_v28  ;;  %v505_v47 = vadd.f32 %v489_v42, %v370_v38 }
  0xf2   :  { %v1415_v36 = vpop.f32.mrf.mxu0  ;;  %1459 = vmatprep.mubr.f32.mxu1 %v502_v29 }
  0xf3   :  { %v503_v39 = vadd.f32 %v487_v33, %v368_v34  ;;  %v373_v49 = vmul.f32 %v1415_v36, %v1865_v6 }
  0xf4   :  { %v274_v41 = vpop.f32.mrf.mxu0 }
  0xf5   :  { %v371_v44 = vmul.f32 %v1865_v6, %v274_v41  ;;  %1460 = vmatmul.mubr.f32.gmra.mxu1 %v503_v39  ;;  %v508_v59 = vadd.f32 %v492_v54, %v373_v49 }
  0xf6   :  { %v1416_v46 = vpop.f32.mrf.mxu0  ;;  %1462 = vmatprep.mubr.f32.mxu1 %v504_v40 }
  0xf7   :  { %v506_v48 = vadd.f32 %v490_v43, %v371_v44  ;;  %v374_v56 = vmul.f32 %v1416_v46, %v1865_v6 }
  0xf8   :  { %v277_v50 = vpop.f32.mrf.mxu0 }
  0xf9   :  { %v372_v53 = vmul.f32 %v1865_v6, %v277_v50  ;;  %1463 = vmatmul.mubr.f32.gmra.mxu1 %v505_v47  ;;  %v509_v3 = vadd.f32 %v493_v61, %v374_v56 }
  0xfa   :  { %v1419_v55 = vpop.f32.mrf.mxu0  ;;  %1465 = vmatprep.mubr.f32.mxu1 %v506_v48 }
  0xfb   :  { %v507_v57 = vadd.f32 %v491_v51, %v372_v53  ;;  %v377_v5 = vmul.f32 %v1419_v55, %v1865_v6 }
  0xfc   :  { %v290_v60 = vpop.f32.mrf.mxu0 }
  0xfd   :  { %v375_v63 = vmul.f32 %v1865_v6, %v290_v60  ;;  %1466 = vmatmul.mubr.f32.gmra.mxu1 %v507_v57  ;;  %v512_v14 = vadd.f32 %v496_v10, %v377_v5  ;;  %v1601_v5 = vmov 0.0  }
  0xfe   :  { %v1420_v0 = vpop.f32.mrf.mxu0  ;;  %1468 = vmatprep.mubr.f32.mxu1 %v508_v59  ;;  %1533 = vmatprep.subr.bf16.mxu1 %v1601_v5 }
  0xff   :  { %v510_v4 = vadd.f32 %v494_v62, %v375_v63  ;;  %v378_v12 = vmul.f32 %v1420_v0, %v1865_v6 }
 0x100   :  { %v293_v7 = vpop.f32.mrf.mxu0 }
 0x101   :  { %v376_v9 = vmul.f32 %v1865_v6, %v293_v7  ;;  %1469 = vmatmul.mubr.f32.gmra.mxu1 %v509_v3  ;;  %v513_v16 = vadd.f32 %v497_v15, %v378_v12  ;;  %v698_v6 = vld [vmem:[%s1988_s7] sm:$0xff] }
 0x102   :  { %1471 = vmatprep.mubr.f32.mxu1 %v510_v4  ;;  %1507 = vmatprep.subr.mxu0 %v698_v6  ;;  %v1918_v7 = vld [vmem:[%s1989_s8] ss:$0 sm:$0xff] }
 0x103   :  { %v511_v13 = vadd.f32 %v495_v8, %v376_v9  ;;  %1508 = vmatpush3.msra.mxu0 %v698_v6 }
 0x105   :  { %1472 = vmatmul.mubr.f32.gmra.mxu1 %v511_v13 }
 0x106   :  { %1474 = vmatprep.mubr.f32.mxu1 %v512_v14 }
 0x109   :  { %1475 = vmatmul.mubr.f32.gmra.mxu1 %v513_v16 }
 0x10a   :  { %1549 = vmatprep.mubr.msk.bf16.mxu1 %vm1602_vm0, %v1601_v5 }
 0x1ad   :  { %v1455_v20 = vpop.f32.mrf.mxu1 }
 0x1ae   :  { %v609_v21 = vadd.f32 %v1455_v20, %v1218_v19 }
 0x1af   :  { %v603_v22 = vpop.f32.mrf.mxu1 }
 0x1b0   :  { %v604_v23 = vadd.f32 %v1218_v19, %v603_v22  ;;  %v683_v26 = vmax.f32 %v609_v21, 0.0 }
 0x1b1   :  { %v1458_v24 = vpop.f32.mrf.mxu1 }
 0x1b2   :  { %v682_v25 = vmax.f32 %v604_v23, 0.0  ;;  %v619_v27 = vadd.f32 %v1458_v24, %v1218_v19 }
 0x1b3   :  { %v613_v28 = vpop.f32.mrf.mxu1 }
 0x1b4   :  { %v614_v29 = vadd.f32 %v1218_v19, %v613_v28  ;;  %1509 = vmatprep.mubr.f32.mxu0 %v682_v25  ;;  %v685_v32 = vmax.f32 %v619_v27, 0.0 }
 0x1b5   :  { %v1461_v30 = vpop.f32.mrf.mxu1  ;;  %1510 = vmatmul.mubr.f32.vlgmr.msra.gmra.mxu0 %v683_v26 }
 0x1b6   :  { %v684_v31 = vmax.f32 %v614_v29, 0.0  ;;  %v629_v33 = vadd.f32 %v1461_v30, %v1218_v19 }
 0x1b7   :  { %v623_v34 = vpop.f32.mrf.mxu1 }
 0x1b8   :  { %v624_v35 = vadd.f32 %v1218_v19, %v623_v34  ;;  %1512 = vmatprep.mubr.f32.mxu0 %v684_v31  ;;  %v687_v38 = vmax.f32 %v629_v33, 0.0 }
 0x1b9   :  { %v1464_v36 = vpop.f32.mrf.mxu1  ;;  %1513 = vmatmul.mubr.f32.gmra.mxu0 %v685_v32 }
 0x1ba   :  { %v686_v37 = vmax.f32 %v624_v35, 0.0  ;;  %v639_v39 = vadd.f32 %v1464_v36, %v1218_v19 }
 0x1bb   :  { %v633_v40 = vpop.f32.mrf.mxu1 }
 0x1bc   :  { %v634_v41 = vadd.f32 %v1218_v19, %v633_v40  ;;  %1515 = vmatprep.mubr.f32.mxu0 %v686_v37  ;;  %v689_v44 = vmax.f32 %v639_v39, 0.0 }
 0x1bd   :  { %v1467_v42 = vpop.f32.mrf.mxu1  ;;  %1516 = vmatmul.mubr.f32.gmra.mxu0 %v687_v38 }
 0x1be   :  { %v688_v43 = vmax.f32 %v634_v41, 0.0  ;;  %v649_v45 = vadd.f32 %v1467_v42, %v1218_v19 }
 0x1bf   :  { %v643_v46 = vpop.f32.mrf.mxu1 }
 0x1c0   :  { %v644_v47 = vadd.f32 %v1218_v19, %v643_v46  ;;  %1518 = vmatprep.mubr.f32.mxu0 %v688_v43  ;;  %v691_v50 = vmax.f32 %v649_v45, 0.0 }
 0x1c1   :  { %v1470_v48 = vpop.f32.mrf.mxu1  ;;  %1519 = vmatmul.mubr.f32.gmra.mxu0 %v689_v44 }
 0x1c2   :  { %v690_v49 = vmax.f32 %v644_v47, 0.0  ;;  %v659_v51 = vadd.f32 %v1470_v48, %v1218_v19 }
 0x1c3   :  { %v653_v52 = vpop.f32.mrf.mxu1 }
 0x1c4   :  { %v654_v53 = vadd.f32 %v1218_v19, %v653_v52  ;;  %1521 = vmatprep.mubr.f32.mxu0 %v690_v49  ;;  %v693_v56 = vmax.f32 %v659_v51, 0.0 }
 0x1c5   :  { %v1473_v54 = vpop.f32.mrf.mxu1  ;;  %1522 = vmatmul.mubr.f32.gmra.mxu0 %v691_v50 }
 0x1c6   :  { %v692_v55 = vmax.f32 %v654_v53, 0.0  ;;  %v669_v57 = vadd.f32 %v1473_v54, %v1218_v19 }
 0x1c7   :  { %v663_v58 = vpop.f32.mrf.mxu1 }
 0x1c8   :  { %v664_v59 = vadd.f32 %v1218_v19, %v663_v58  ;;  %1524 = vmatprep.mubr.f32.mxu0 %v692_v55  ;;  %v695_v62 = vmax.f32 %v669_v57, 0.0 }
 0x1c9   :  { %v1476_v60 = vpop.f32.mrf.mxu1  ;;  %1525 = vmatmul.mubr.f32.gmra.mxu0 %v693_v56 }
 0x1ca   :  { %v694_v61 = vmax.f32 %v664_v59, 0.0  ;;  %v679_v63 = vadd.f32 %v1476_v60, %v1218_v19 }
 0x1cb   :  { %v673_v0 = vpop.f32.mrf.mxu1 }
 0x1cc   :  { %v674_v1 = vadd.f32 %v1218_v19, %v673_v0  ;;  %1527 = vmatprep.mubr.f32.mxu0 %v694_v61  ;;  %v697_v4 = vmax.f32 %v679_v63, 0.0 }
 0x1cd   :  { %1528 = vmatmul.mubr.f32.gmra.mxu0 %v695_v62 }
 0x1ce   :  { %v696_v3 = vmax.f32 %v674_v1, 0.0 }
 0x1d0   :  { %1530 = vmatprep.mubr.f32.mxu0 %v696_v3 }
 0x1d1   :  { %1531 = vmatmul.mubr.f32.gmra.mxu0 %v697_v4 }
 0x275   :  { %v1511_v8 = vpop.f32.mrf.mxu0 }
 0x276   :  { %v793_v9 = vadd.f32 %v1511_v8, %v1918_v7 }
 0x277   :  { %v787_v10 = vpop.f32.mrf.mxu0 }
 0x278   :  { %v788_v11 = vadd.f32 %v1918_v7, %v787_v10  ;;  %v867_v13 = vmax.f32 %v793_v9, 0.0 }
 0x279   :  { %v1514_v12 = vpop.f32.mrf.mxu0 }
 0x27a   :  { %v866_v14 = vmax.f32 %v788_v11, 0.0  ;;  %v803_v15 = vadd.f32 %v1514_v12, %v1918_v7  ;;  %v1084_v23 = vmul.f32 %v867_v13, %v867_v13 }
 0x27b   :  { %v797_v16 = vpop.f32.mrf.mxu0 }
 0x27c   :  { %v1923_v17 = vpack.c.bf16 %v867_v13, %v866_v14  ;;  %v869_v18 = vmax.f32 %v803_v15, 0.0  ;;  %v798_v2 = vadd.f32 %v1918_v7, %v797_v16  ;;  %v1083_v20 = vmul.f32 %v866_v14, %v866_v14 }
 0x27d   :  { %v1517_v6 = vpop.f32.mrf.mxu0  ;;  %v1061_v26 = vadd.f32 %v867_v13, %v866_v14 }
 0x27e   :  { %1257 = vst [vmem:[#allocation3] sm:$0xff] %v1923_v17   ;;  %v813_v19 = vadd.f32 %v1517_v6, %v1918_v7  ;;  %v868_v21 = vmax.f32 %v798_v2, 0.0  ;;  %v1048_v27 = vmul.f32 0.0, %v869_v18  ;;  %v1099_v33 = vadd.f32 %v1084_v23, %v1083_v20 }
 0x27f   :  { %v807_v22 = vpop.f32.mrf.mxu0 }
 0x280   :  { %v871_v24 = vmax.f32 %v813_v19, 0.0  ;;  %v808_v25 = vadd.f32 %v1918_v7, %v807_v22  ;;  %v1929_v28 = vpack.c.bf16 %v869_v18, %v868_v21  ;;  %v1047_v29 = vmul.f32 0.0, %v868_v21 }
 0x281   :  { %v1520_v30 = vpop.f32.mrf.mxu0  ;;  %v1086_v41 = vmul.f32 %v1048_v27, %v1048_v27 }
 0x282   :  { %v870_v31 = vmax.f32 %v808_v25, 0.0  ;;  %v823_v32 = vadd.f32 %v1520_v30, %v1918_v7  ;;  %1293 = vst [vmem:[#allocation3 + $0x8] sm:$0xff] %v1929_v28   ;;  %v1062_v34 = vadd.f32 %v1061_v26, %v1047_v29  ;;  %v1085_v35 = vmul.f32 %v1047_v29, %v1047_v29 }
 0x283   :  { %v817_v36 = vpop.f32.mrf.mxu0  ;;  %v1050_v37 = vmul.f32 0.0, %v871_v24 }
 0x284   :  { %v1933_v38 = vpack.c.bf16 %v871_v24, %v870_v31  ;;  %v1049_v39 = vmul.f32 0.0, %v870_v31  ;;  %v873_v40 = vmax.f32 %v823_v32, 0.0  ;;  %v1100_v42 = vadd.f32 %v1099_v33, %v1085_v35 }
 0x285   :  { %v1063_v43 = vadd.f32 %v1062_v34, %v1048_v27  ;;  %v818_v44 = vadd.f32 %v1918_v7, %v817_v36  ;;  %v1523_v45 = vpop.f32.mrf.mxu0  ;;  %v1088_v52 = vmul.f32 %v1050_v37, %v1050_v37 }
 0x286   :  { %1294 = vst [vmem:[#allocation3 + $0x10] sm:$0xff] %v1933_v38   ;;  %v1087_v46 = vmul.f32 %v1049_v39, %v1049_v39  ;;  %v833_v47 = vadd.f32 %v1523_v45, %v1918_v7  ;;  %v1101_v49 = vadd.f32 %v1100_v42, %v1086_v41  ;;  %v1052_v53 = vmul.f32 0.0, %v873_v40 }
 0x287   :  { %v1064_v48 = vadd.f32 %v1063_v43, %v1049_v39  ;;  %v872_v50 = vmax.f32 %v818_v44, 0.0  ;;  %v827_v51 = vpop.f32.mrf.mxu0 }
 0x288   :  { %v875_v54 = vmax.f32 %v833_v47, 0.0  ;;  %v828_v55 = vadd.f32 %v1918_v7, %v827_v51  ;;  %v1102_v56 = vadd.f32 %v1101_v49, %v1087_v46  ;;  %v1090_v11 = vmul.f32 %v1052_v53, %v1052_v53 }
 0x289   :  { %v1939_v57 = vpack.c.bf16 %v873_v40, %v872_v50  ;;  %v1051_v58 = vmul.f32 0.0, %v872_v50  ;;  %v1065_v59 = vadd.f32 %v1064_v48, %v1050_v37  ;;  %v1526_v60 = vpop.f32.mrf.mxu0 }
 0x28a   :  { %v874_v61 = vmax.f32 %v828_v55, 0.0  ;;  %v843_v62 = vadd.f32 %v1526_v60, %v1918_v7  ;;  %v1103_v1 = vadd.f32 %v1102_v56, %v1088_v52  ;;  %v1054_v4 = vmul.f32 0.0, %v875_v54 }
 0x28b   :  { %1295 = vst [vmem:[#allocation3 + $0x18] sm:$0xff] %v1939_v57   ;;  %v1066_v63 = vadd.f32 %v1065_v59, %v1051_v58  ;;  %v1089_v0 = vmul.f32 %v1051_v58, %v1051_v58  ;;  %v837_v3 = vpop.f32.mrf.mxu0 }
 0x28c   :  { %v1943_v8 = vpack.c.bf16 %v875_v54, %v874_v61  ;;  %v1053_v9 = vmul.f32 0.0, %v874_v61  ;;  %v877_v10 = vmax.f32 %v843_v62, 0.0  ;;  %v838_v14 = vadd.f32 %v1918_v7, %v837_v3 }
 0x28d   :  { %v1104_v12 = vadd.f32 %v1103_v1, %v1089_v0  ;;  %v1067_v13 = vadd.f32 %v1066_v63, %v1052_v53  ;;  %v1529_v15 = vpop.f32.mrf.mxu0  ;;  %v1092_v21 = vmul.f32 %v1054_v4, %v1054_v4 }
 0x28e   :  { %1296 = vst [vmem:[#allocation3 + $0x20] sm:$0xff] %v1943_v8   ;;  %v1091_v16 = vmul.f32 %v1053_v9, %v1053_v9  ;;  %v853_v18 = vadd.f32 %v1529_v15, %v1918_v7  ;;  %v876_v19 = vmax.f32 %v838_v14, 0.0  ;;  %v1056_v22 = vmul.f32 0.0, %v877_v10 }
 0x28f   :  { %v1068_v2 = vadd.f32 %v1067_v13, %v1053_v9  ;;  %v1105_v6 = vadd.f32 %v1104_v12, %v1090_v11  ;;  %v847_v20 = vpop.f32.mrf.mxu0 }
 0x290   :  { %v879_v23 = vmax.f32 %v853_v18, 0.0  ;;  %v848_v24 = vadd.f32 %v1918_v7, %v847_v20  ;;  %v887_v26 = vpack.c.bf16 %v877_v10, %v876_v19  ;;  %v1055_v27 = vmul.f32 0.0, %v876_v19 }
 0x291   :  { %v1106_v25 = vadd.f32 %v1105_v6, %v1091_v16  ;;  %v1069_v29 = vadd.f32 %v1068_v2, %v1054_v4  ;;  %v1532_v30 = vpop.f32.mrf.mxu0  ;;  %v1094_v42 = vmul.f32 %v1056_v22, %v1056_v22 }
 0x292   :  { %v878_v31 = vmax.f32 %v848_v24, 0.0  ;;  %v863_v32 = vadd.f32 %v1532_v30, %v1918_v7  ;;  %1297 = vst [vmem:[#allocation3 + $0x28] sm:$0xff] %v887_v26   ;;  %v1093_v34 = vmul.f32 %v1055_v27, %v1055_v27  ;;  %v1058_v37 = vmul.f32 0.0, %v879_v23 }
 0x293   :  { %v1070_v33 = vadd.f32 %v1069_v29, %v1055_v27  ;;  %v1107_v35 = vadd.f32 %v1106_v25, %v1092_v21  ;;  %v857_v36 = vpop.f32.mrf.mxu0 }
 0x294   :  { %v888_v39 = vpack.c.bf16 %v879_v23, %v878_v31  ;;  %v1057_v40 = vmul.f32 0.0, %v878_v31  ;;  %v881_v41 = vmax.f32 %v863_v32, 0.0  ;;  %v858_v45 = vadd.f32 %v1918_v7, %v857_v36 }
 0x295   :  { %v1108_v43 = vadd.f32 %v1107_v35, %v1093_v34  ;;  %v1071_v44 = vadd.f32 %v1070_v33, %v1056_v22  ;;  %v1096_v50 = vmul.f32 %v1058_v37, %v1058_v37 }
 0x296   :  { %1298 = vst [vmem:[#allocation3 + $0x30] sm:$0xff] %v888_v39   ;;  %v1095_v46 = vmul.f32 %v1057_v40, %v1057_v40  ;;  %v880_v49 = vmax.f32 %v858_v45, 0.0  ;;  %v1060_v51 = vmul.f32 0.0, %v881_v41 }
 0x297   :  { %v1072_v47 = vadd.f32 %v1071_v44, %v1057_v40  ;;  %v1109_v48 = vadd.f32 %v1108_v43, %v1094_v42 }
 0x298   :  { %v889_v53 = vpack.c.bf16 %v881_v41, %v880_v49  ;;  %v1059_v54 = vmul.f32 0.0, %v880_v49  ;;  %v1098_v60 = vmul.f32 %v1060_v51, %v1060_v51 }
 0x299   :  { %v1110_v52 = vadd.f32 %v1109_v48, %v1095_v46  ;;  %v1073_v55 = vadd.f32 %v1072_v47, %v1058_v37 }
 0x29a   :  { %1299 = vst [vmem:[#allocation3 + $0x38] sm:$0xff] %v889_v53   ;;  %v1097_v58 = vmul.f32 %v1059_v54, %v1059_v54  ;;  %1534 = vmatpush3.bf16.msra.mxu1 %v889_v53 }
 0x29b   :  { %v1074_v56 = vadd.f32 %v1073_v55, %v1059_v54  ;;  %v1111_v59 = vadd.f32 %v1110_v52, %v1096_v50  ;;  %1535 = vmatprep.subr.bf16.mxu1 %v1601_v5 }
 0x29d   :  { %v1075_v7 = vadd.f32 %v1074_v56, %v1060_v51  ;;  %v1112_v61 = vadd.f32 %v1111_v59, %v1097_v58 }
 0x29e   :  { %1536 = vmatpush3.bf16.msra.mxu1 %v888_v39 }
 0x29f   :  { %v1076_v62 = vrot.slane %v1075_v7, 4  ;;  %v1113_v63 = vadd.f32 %v1112_v61, %v1098_v60  ;;  %1537 = vmatprep.subr.bf16.mxu1 %v1601_v5 }
 0x2a1   :  { %v1077_v0 = vadd.f32 %v1076_v62, %v1075_v7  ;;  %v1114_v1 = vrot.slane %v1113_v63, 4 }
 0x2a2   :  { %1538 = vmatpush3.bf16.msra.mxu1 %v887_v26 }
 0x2a3   :  { %v1078_v3 = vrot.slane %v1077_v0, 2  ;;  %v1115_v4 = vadd.f32 %v1114_v1, %v1113_v63  ;;  %1539 = vmatprep.subr.bf16.mxu1 %v1601_v5 }
 0x2a5   :  { %v1079_v9 = vadd.f32 %v1078_v3, %v1077_v0  ;;  %v1116_v10 = vrot.slane %v1115_v4, 2 }
 0x2a6   :  { %1540 = vmatpush3.bf16.msra.mxu1 %v1943_v8  ;;  %v1577_v8 = vld [vmem:[%s1990_s9] sm:$0xff]  }
 0x2a7   :  { %v1080_v11 = vrot.slane %v1079_v9, 1  ;;  %v1117_v12 = vadd.f32 %v1116_v10, %v1115_v4  ;;  %1541 = vmatprep.subr.bf16.mxu1 %v1601_v5 }
 0x2a9   :  { %v1081_v13 = vadd.f32 %v1080_v11, %v1079_v9  ;;  %v1118_v14 = vrot.slane %v1117_v12, 1 }
 0x2aa   :  { %1542 = vmatpush3.bf16.msra.mxu1 %v1939_v57 }
 0x2ab   :  { %1082 = vst [vmem:[%s1992_s11] sm:$0x1] %v1081_v13  ;;  %v1119_v15 = vadd.f32 %v1118_v14, %v1117_v12  ;;  %1543 = vmatprep.subr.bf16.mxu1 %v1601_v5  ;;  %s1603_s11 = smov [#allocation3]  }
 0x2ac   :  { %s1177_s30 = sshll.u32 %s1603_s11, 4  ;;  %s1178_s30 = int_to_ptr.vmem [resolvable:$true] %s1177_s30 }
 0x2ad   :  { %1120 = vst [vmem:[%s1993_s12] sm:$0x1] %v1119_v15  ;;  %s1578_s14 = scalar_lea.vmem %s1178_s30, 1024  ;;  %p1583_p1 = scmp.lt.s32.totalorder %s1178_s30, %s1178_s30 }
 0x2ae   :  { %1544 = vmatpush3.bf16.msra.mxu1 %v1933_v38  ;;  %p1579_p0 = scmp.ne.s32.totalorder %s1178_s30, %s1578_s14  ;;  %p1584_p2 = scmp.lt.s32.totalorder %s1578_s14, %s1578_s14 }
 0x2af   :  { %1545 = vmatprep.subr.bf16.mxu1 %v1601_v5 }
 0x2b0   :  { %p1585_p3 = por %p1584_p2, %p1583_p1 }
 0x2b2   :  { %1546 = vmatpush3.bf16.msra.mxu1 %v1929_v28  ;;  %p1586_p4 = pnand %p1585_p3, %p1579_p0 }
 0x2b3   :  { %1547 = vmatprep.subr.bf16.mxu1 %v1601_v5 }
 0x2b6   :  { %1548 = vmatpush3.bf16.msra.mxu1 %v1923_v17 }
 0x2b9   :  { %1550 = vmatmul.mubr.bf16.vlgmr.msra.gmra.mxu1 %v1577_v8 }
 0x2ba   :  { %1589 = shalt.err (!%p1586_p4)
}
 0x2bb   :  { %s1604_s12 = smov 64   ;;  %s1605_s1 = smov 4  }
 0x2bc   :  { %1183 = dma.vmem_to_hbm [thread:$0]  %s1178_s30, 1024, %s1991_s10, [#allocation4], %s1604_s12, %s1604_s12, %s1605_s1  }
 0x379   :  { %v1163_v5 = vpop.f32.mrf.mxu1 }
 0x37a   :  { %1170 = vst [vmem:[%s1994_s13] sm:$0xff] %v1163_v5 }
 0x37b   :  { %v1551_v17 = vpop.f32.mrf.mxu1 }
 0x37d   :  { %v1166_v28 = vpop.f32.mrf.mxu1 }
 0x37e   :  { %1171 = vst [vmem:[%s1994_s13 + $0x8] sm:$0xff] %v1166_v28 }
 0x37f   :  { %v1552_v38 = vpop.f32.mrf.mxu1 }
 0x380   :  { %1598 = dma.done.wait [#allocation4], 1024  }
 0x381   :  { %1599 = vsyncadd [#allocation4], 4294966272 }
 0x382   :  { %1199 = vsyncpa [#allocation4], 1 }

</bundles_post_ra>
